<compile_context>
chip_gen: v7x
topology: tpu7x:2x2x1
jax: 0.10.0
libtpu: 0.0.40
codegen_flags: <defaults>
</compile_context>

<pallas_src>
import jax
import jax.numpy as jnp
from jax.experimental import pallas as pl
from jax.experimental.pallas import tpu as pltpu


def _round_up(x, m):
    return (x + m - 1) // m * m


def _pick_block(n):
    # Images per grid step; keep >=2 grid steps when possible (v7x has 2 TCs).
    return max(1, min(4, n // 2))


# ----------------------------------------------------------------------------
# Stage 1: conv1 (3x3, pad 1) + bias + ReLU + maxpool 2x2, fused.
# The im2col slab is built in the wrapper with rows ordered
#   row = (2*(h%2)+(w%2))*256 + (h//2)*16 + (w//2)
# so the 2x2 pool is a max over 4 aligned 256-row slabs (no in-kernel relayout).
# ----------------------------------------------------------------------------
def _conv1_pool_kernel(xc_ref, w_ref, b_ref, o_ref):
    # xc_ref: (B, 1024, 27) bf16 ; w_ref: (27, 16) bf16 ; b_ref: (1, 16) f32
    # o_ref : (B, 256, 16) bf16, rows = ho*16 + wo
    bsz = xc_ref.shape[0]
    rows = xc_ref.shape[1]
    k = xc_ref.shape[2]
    co = w_ref.shape[1]
    x = xc_ref[...].reshape(bsz * rows, k)
    h = jnp.dot(x, w_ref[...], preferred_element_type=jnp.float32)
    h = h.reshape(bsz, 4, rows // 4, co)
    m = jnp.maximum(jnp.maximum(h[:, 0], h[:, 1]),
                    jnp.maximum(h[:, 2], h[:, 3]))          # 2x2 max pool
    o_ref[...] = jnp.maximum(m + b_ref[...], 0.0).astype(o_ref.dtype)


def conv1_pool_pallas(x_col, w1, b1, *, block):
    n, rows, k = x_col.shape
    co = w1.shape[1]
    return pl.pallas_call(
        _conv1_pool_kernel,
        out_shape=jax.ShapeDtypeStruct((n, rows // 4, co), jnp.bfloat16),
        grid_spec=pltpu.PrefetchScalarGridSpec(
            num_scalar_prefetch=0,
            grid=(n // block,),
            in_specs=[
                pl.BlockSpec((block, rows, k), lambda i: (i, 0, 0)),
                pl.BlockSpec((k, co), lambda i: (0, 0)),
                pl.BlockSpec((1, co), lambda i: (0, 0)),
            ],
            out_specs=pl.BlockSpec((block, rows // 4, co), lambda i: (i, 0, 0)),
        ),
        compiler_params=pltpu.CompilerParams(
            dimension_semantics=("parallel",)),
    )(x_col, w1, b1)


# ----------------------------------------------------------------------------
# Stage 2: conv2 (3x3, pad 1) + bias + ReLU + maxpool 2x2, fused.
# 9 shifted bf16 matmuls over the VMEM-resident padded tile (no im2col in
# HBM); the pool is applied to the f32 accumulator before the store.
# ----------------------------------------------------------------------------
def _conv2_pool_kernel(xp_ref, w_ref, b_ref, o_ref):
    # xp_ref: (B, 18, 18, 16) bf16 ; w_ref: (3, 3, 16, 32) bf16
    # b_ref : (1, 32) f32 ; o_ref: (B, 64, 32) bf16, rows = ho*8 + wo
    bsz = xp_ref.shape[0]
    cin = xp_ref.shape[-1]
    co = w_ref.shape[-1]
    acc = jnp.zeros((bsz * 256, co), jnp.float32)
    for di in range(3):
        for dj in range(3):
            xs = xp_ref[:, di:di + 16, dj:dj + 16, :].reshape(bsz * 256, cin)
            acc = acc + jnp.dot(xs, w_ref[di, dj],
                                preferred_element_type=jnp.float32)
    # 2x2 maxpool on the accumulator, then bias + ReLU, then bf16 store.
    y = acc.reshape(bsz, 8, 2, 16, co)
    y = jnp.maximum(y[:, :, 0], y[:, :, 1])                 # pool over H
    y = y.reshape(bsz, 8, 8, 2, co)
    y = jnp.maximum(y[:, :, :, 0], y[:, :, :, 1])           # pool over W
    y = jnp.maximum(y.reshape(bsz, 64, co) + b_ref[...], 0.0)
    o_ref[...] = y.astype(o_ref.dtype)


def conv2_pool_pallas(p1_padded, w2, b2, *, block):
    n, hp, wp, cin = p1_padded.shape
    co = w2.shape[-1]
    return pl.pallas_call(
        _conv2_pool_kernel,
        out_shape=jax.ShapeDtypeStruct((n, 64, co), jnp.bfloat16),
        grid_spec=pltpu.PrefetchScalarGridSpec(
            num_scalar_prefetch=0,
            grid=(n // block,),
            in_specs=[
                pl.BlockSpec((block, hp, wp, cin), lambda i: (i, 0, 0, 0)),
                pl.BlockSpec((3, 3, cin, co), lambda i: (0, 0, 0, 0)),
                pl.BlockSpec((1, co), lambda i: (0, 0)),
            ],
            out_specs=pl.BlockSpec((block, 64, co), lambda i: (i, 0, 0)),
        ),
        compiler_params=pltpu.CompilerParams(
            dimension_semantics=("parallel",)),
    )(p1_padded, w2, b2)


# ----------------------------------------------------------------------------
# FC: y = x @ w + b, real K=2048 (bf16), output padded to 128 lanes.
# ----------------------------------------------------------------------------
def _linear_kernel(x_ref, w_ref, b_ref, o_ref):
    acc = jnp.dot(x_ref[...], w_ref[...], preferred_element_type=jnp.float32)
    o_ref[...] = (acc + b_ref[...]).astype(o_ref.dtype)


def linear_pallas(x, w, b, *, tm=256):
    M, K = x.shape
    _, NO = w.shape
    m_unit = 16 if x.dtype == jnp.bfloat16 else 8
    tm_eff = min(tm, _round_up(M, m_unit))
    if M >= 2 * m_unit and _round_up(M, tm_eff) // tm_eff < 2:
        tm_eff = _round_up(pl.cdiv(M, 2), m_unit)   # >=2 steps for megacore
    Mp = _round_up(M, tm_eff)
    if Mp != M:
        x = jnp.pad(x, ((0, Mp - M), (0, 0)))
    out = pl.pallas_call(
        _linear_kernel,
        out_shape=jax.ShapeDtypeStruct((Mp, NO), jnp.float32),
        grid_spec=pltpu.PrefetchScalarGridSpec(
            num_scalar_prefetch=0,
            grid=(Mp // tm_eff,),
            in_specs=[
                pl.BlockSpec((tm_eff, K), lambda i: (i, 0)),
                pl.BlockSpec((K, NO), lambda i: (0, 0)),
                pl.BlockSpec((1, NO), lambda i: (0, 0)),
            ],
            out_specs=pl.BlockSpec((tm_eff, NO), lambda i: (i, 0)),
        ),
        compiler_params=pltpu.CompilerParams(
            dimension_semantics=("parallel",)),
    )(x, w, b)
    return out[:M]


# ----------------------------------------------------------------------------
# Wrapper-side im2col for conv1 (slot-major row order for the fused pool)
# ----------------------------------------------------------------------------
def _im2col_conv1(x_nhwc):
    """(N,32,32,3) f32 -> (N,1024,27) bf16; row = slot*256 + ho*16 + wo."""
    n = x_nhwc.shape[0]
    xp = jnp.pad(x_nhwc, ((0, 0), (1, 1), (1, 1), (0, 0)))
    taps = [xp[:, di:di + 32, dj:dj + 32, :]
            for di in range(3) for dj in range(3)]
    p = jnp.stack(taps, axis=3)                       # (n,32,32,9,3) k=(di,dj,c)
    p = p.reshape(n, 16, 2, 16, 2, 27)                # (n,ho,sh,wo,sw,k)
    p = p.transpose(0, 2, 4, 1, 3, 5)                 # (n,sh,sw,ho,wo,k)
    return p.reshape(n, 1024, 27).astype(jnp.bfloat16)


# ----------------------------------------------------------------------------
# Parameters: PyTorch-layout init, one-time conversion to kernel layout (bf16)
# ----------------------------------------------------------------------------
def init_torch_params(key):
    k = jax.random.split(key, 6)
    return {
        "conv1_w": jax.random.normal(k[0], (16, 3, 3, 3), jnp.float32) * 0.1,
        "conv1_b": jax.random.normal(k[1], (16,), jnp.float32) * 0.1,
        "conv2_w": jax.random.normal(k[2], (32, 16, 3, 3), jnp.float32) * 0.05,
        "conv2_b": jax.random.normal(k[3], (32,), jnp.float32) * 0.05,
        "fc_w": jax.random.normal(k[4], (10, 32 * 8 * 8), jnp.float32) * 0.02,
        "fc_b": jax.random.normal(k[5], (10,), jnp.float32) * 0.02,
    }


def prepare_params(tp):
    """One-time permute / bf16-cast to the kernels' layouts (no K padding)."""
    # conv1: (O,I,kh,kw) -> (kh*kw*I, O) = (27,16), matching the im2col k order.
    w1 = jnp.transpose(tp["conv1_w"], (2, 3, 1, 0)).reshape(27, 16)
    b1 = tp["conv1_b"].reshape(1, 16)
    # conv2: (O,I,kh,kw) -> (kh,kw,I,O) = (3,3,16,32); real Cin = 16.
    w2 = jnp.transpose(tp["conv2_w"], (2, 3, 1, 0))
    b2 = tp["conv2_b"].reshape(1, 32)
    # fc: PyTorch flattens (C,H,W); our activations flatten (H,W,C).
    # Real K = 2048; only the 10 outputs are padded to 128 for a dense store.
    wf = tp["fc_w"].reshape(10, 32, 8, 8).transpose(2, 3, 1, 0).reshape(2048, 10)
    wf = jnp.pad(wf, ((0, 0), (0, 118)))
    bf = jnp.pad(tp["fc_b"], (0, 118)).reshape(1, 128)
    return {
        "w1": w1.astype(jnp.bfloat16), "b1": b1,
        "w2": w2.astype(jnp.bfloat16), "b2": b2,
        "wf": wf.astype(jnp.bfloat16), "bf": bf,
    }


# ----------------------------------------------------------------------------
# Forward pass
# ----------------------------------------------------------------------------
@jax.jit
def encoder_forward(params, x_nchw):
    n = x_nchw.shape[0]
    blk = _pick_block(n)
    n_pad = _round_up(n, blk)
    x = jnp.transpose(x_nchw, (0, 2, 3, 1))                     # NCHW -> NHWC
    if n_pad != n:
        x = jnp.pad(x, ((0, n_pad - n), (0, 0), (0, 0), (0, 0)))
    xc = _im2col_conv1(x)                                       # (Np,1024,27)
    p1 = conv1_pool_pallas(xc, params["w1"], params["b1"], block=blk)
    p1 = jnp.pad(p1.reshape(n_pad, 16, 16, 16),                 # pad for conv2
                 ((0, 0), (1, 1), (1, 1), (0, 0)))              # (Np,18,18,16)
    p2 = conv2_pool_pallas(p1, params["w2"], params["b2"], block=blk)
    feats = p2.reshape(n_pad, 8 * 8 * 32)                       # (H,W,C) flat
    logits = linear_pallas(feats, params["wf"], params["bf"])   # (Np,128) f32
    return logits[:n, :10]


# ----------------------------------------------------------------------------
# Pure-JAX reference (PyTorch semantics, f32 throughout) for validation
# ----------------------------------------------------------------------------
def reference_forward(tp, x):
    def conv(h, w, b):
        y = jax.lax.conv_general_dilated(
            h, w, window_strides=(1, 1), padding=((1, 1), (1, 1)),
            dimension_numbers=("NCHW", "OIHW", "NCHW"))
        return jax.nn.relu(y + b[None, :, None, None])

    def pool(h):
        return jax.lax.reduce_window(h, -jnp.inf, jax.lax.max,
                                     (1, 1, 2, 2), (1, 1, 2, 2), "VALID")

    h = pool(conv(x, tp["conv1_w"], tp["conv1_b"]))
    h = pool(conv(h, tp["conv2_w"], tp["conv2_b"]))
    h = h.reshape(h.shape[0], -1)
    return h @ tp["fc_w"].T + tp["fc_b"]


if __name__ == "__main__":
    key = jax.random.PRNGKey(0)
    pkey, xkey = jax.random.split(key)
    torch_params = init_torch_params(pkey)
    params = prepare_params(torch_params)
    x = jax.random.normal(xkey, (2, 3, 32, 32), jnp.float32)

    out = encoder_forward(params, x)
    jax.block_until_ready(out)
    assert out.shape == (2, 10), out.shape

    ref = reference_forward(torch_params, x)
    err = float(jnp.max(jnp.abs(out - ref)))
    assert err < 5e-2, f"max abs error vs reference: {err}"

    print("KERNEL_OK")
</pallas_src>

<mosaic_0001>
module attributes {stable_mosaic.version = 11 : i64} {
  func.func @_conv1_pool_kernel(%arg0: i32, %arg1: memref<1x1024x27xbf16, #tpu.memory_space<vmem>>, %arg2: memref<27x16xbf16, #tpu.memory_space<vmem>>, %arg3: memref<1x16xf32, #tpu.memory_space<vmem>>, %arg4: memref<1x256x16xbf16, #tpu.memory_space<vmem>>) attributes {dimension_semantics = [#tpu.dimension_semantics<parallel>], iteration_bounds = array<i64: 2>, scalar_prefetch = 0 : i64, scratch_operands = 0 : i64, tpu.core_type = #tpu.core_type<tc>, window_params = [{transform_indices = @transform_0, window_bounds = array<i64: 1, 1024, 27>}, {pipeline_mode = #tpu.pipeline_mode<synchronous>, transform_indices = @transform_1, window_bounds = array<i64: 27, 16>}, {pipeline_mode = #tpu.pipeline_mode<synchronous>, transform_indices = @transform_2, window_bounds = array<i64: 1, 16>}, {transform_indices = @transform_3, window_bounds = array<i64: 1, 256, 16>}]} {
    %c0 = arith.constant 0 : index
    %c0_0 = arith.constant 0 : index
    %c0_1 = arith.constant 0 : index
    %0 = vector.load %arg1[%c0, %c0_0, %c0_1] : memref<1x1024x27xbf16, #tpu.memory_space<vmem>>, vector<1x1024x27xbf16>
    %1 = vector.shape_cast %0 : vector<1x1024x27xbf16> to vector<1024x27xbf16>
    %c0_2 = arith.constant 0 : index
    %c0_3 = arith.constant 0 : index
    %2 = vector.load %arg2[%c0_2, %c0_3] : memref<27x16xbf16, #tpu.memory_space<vmem>>, vector<27x16xbf16>
    %cst = arith.constant dense<0.000000e+00> : vector<1024x16xf32>
    %3 = tpu.matmul %1, %2, %cst {dimension_numbers = #tpu.dot_dimension_numbers<[1], [0], [0], [1], [0, 0, 1, 1], [], []>} : vector<1024x27xbf16>, vector<27x16xbf16>, vector<1024x16xf32> -> vector<1024x16xf32>
    %4 = vector.shape_cast %3 : vector<1024x16xf32> to vector<1x4x256x16xf32>
    %5 = vector.extract_strided_slice %4 {offsets = [0, 0, 0, 0], sizes = [1, 1, 256, 16], strides = [1, 1, 1, 1]} : vector<1x4x256x16xf32> to vector<1x1x256x16xf32>
    %6 = vector.shape_cast %5 : vector<1x1x256x16xf32> to vector<1x256x16xf32>
    %7 = vector.extract_strided_slice %4 {offsets = [0, 1, 0, 0], sizes = [1, 1, 256, 16], strides = [1, 1, 1, 1]} : vector<1x4x256x16xf32> to vector<1x1x256x16xf32>
    %8 = vector.shape_cast %7 : vector<1x1x256x16xf32> to vector<1x256x16xf32>
    %9 = arith.maximumf %6, %8 : vector<1x256x16xf32>
    %10 = vector.extract_strided_slice %4 {offsets = [0, 2, 0, 0], sizes = [1, 1, 256, 16], strides = [1, 1, 1, 1]} : vector<1x4x256x16xf32> to vector<1x1x256x16xf32>
    %11 = vector.shape_cast %10 : vector<1x1x256x16xf32> to vector<1x256x16xf32>
    %12 = vector.extract_strided_slice %4 {offsets = [0, 3, 0, 0], sizes = [1, 1, 256, 16], strides = [1, 1, 1, 1]} : vector<1x4x256x16xf32> to vector<1x1x256x16xf32>
    %13 = vector.shape_cast %12 : vector<1x1x256x16xf32> to vector<1x256x16xf32>
    %14 = arith.maximumf %11, %13 : vector<1x256x16xf32>
    %15 = arith.maximumf %9, %14 : vector<1x256x16xf32>
    %c0_4 = arith.constant 0 : index
    %c0_5 = arith.constant 0 : index
    %16 = vector.load %arg3[%c0_4, %c0_5] : memref<1x16xf32, #tpu.memory_space<vmem>>, vector<1x16xf32>
    %17 = vector.shape_cast %16 : vector<1x16xf32> to vector<1x1x16xf32>
    %18 = vector.broadcast %17 : vector<1x1x16xf32> to vector<1x256x16xf32>
    %19 = arith.addf %15, %18 : vector<1x256x16xf32>
    %cst_6 = arith.constant 0.000000e+00 : f32
    %20 = vector.broadcast %cst_6 : f32 to vector<1x256x16xf32>
    %21 = arith.maximumf %19, %20 : vector<1x256x16xf32>
    %22 = arith.truncf %21 : vector<1x256x16xf32> to vector<1x256x16xbf16>
    %c0_7 = arith.constant 0 : index
    %c0_8 = arith.constant 0 : index
    %c0_9 = arith.constant 0 : index
    %23 = vector.load %arg4[%c0_7, %c0_8, %c0_9] : memref<1x256x16xbf16, #tpu.memory_space<vmem>>, vector<1x256x16xbf16>
    tpu.vector_store %arg4[%c0_7, %c0_8, %c0_9], %22 {strides = array<i32>} : memref<1x256x16xbf16, #tpu.memory_space<vmem>>, vector<1x256x16xbf16>,
    return
  }
  func.func @transform_0(%arg0: i32) -> (i32, i32, i32) {
    %c0_i32 = arith.constant 0 : i32
    %c0_i32_0 = arith.constant 0 : i32
    %c0_i32_1 = arith.constant 0 : i32
    return %arg0, %c0_i32, %c0_i32_0 : i32, i32, i32
  }
  func.func @transform_1(%arg0: i32) -> (i32, i32) {
    %c0_i32 = arith.constant 0 : i32
    %c0_i32_0 = arith.constant 0 : i32
    %c0_i32_1 = arith.constant 0 : i32
    return %c0_i32, %c0_i32_0 : i32, i32
  }
  func.func @transform_2(%arg0: i32) -> (i32, i32) {
    %c0_i32 = arith.constant 0 : i32
    %c0_i32_0 = arith.constant 0 : i32
    %c0_i32_1 = arith.constant 0 : i32
    return %c0_i32, %c0_i32_0 : i32, i32
  }
  func.func @transform_3(%arg0: i32) -> (i32, i32, i32) {
    %c0_i32 = arith.constant 0 : i32
    %c0_i32_0 = arith.constant 0 : i32
    %c0_i32_1 = arith.constant 0 : i32
    return %arg0, %c0_i32, %c0_i32_0 : i32, i32, i32
  }
}

module attributes {stable_mosaic.version = 11 : i64} {
  func.func @_conv2_pool_kernel(%arg0: i32, %arg1: memref<1x18x18x16xbf16, #tpu.memory_space<vmem>>, %arg2: memref<3x3x16x32xbf16, #tpu.memory_space<vmem>>, %arg3: memref<1x32xf32, #tpu.memory_space<vmem>>, %arg4: memref<1x64x32xbf16, #tpu.memory_space<vmem>>) attributes {dimension_semantics = [#tpu.dimension_semantics<parallel>], iteration_bounds = array<i64: 2>, scalar_prefetch = 0 : i64, scratch_operands = 0 : i64, tpu.core_type = #tpu.core_type<tc>, window_params = [{transform_indices = @transform_0, window_bounds = array<i64: 1, 18, 18, 16>}, {pipeline_mode = #tpu.pipeline_mode<synchronous>, transform_indices = @transform_1, window_bounds = array<i64: 3, 3, 16, 32>}, {pipeline_mode = #tpu.pipeline_mode<synchronous>, transform_indices = @transform_2, window_bounds = array<i64: 1, 32>}, {transform_indices = @transform_3, window_bounds = array<i64: 1, 64, 32>}]} {
    %cst = arith.constant 0.000000e+00 : f32
    %0 = vector.broadcast %cst : f32 to vector<256x32xf32>
    %c0 = arith.constant 0 : index
    %c0_0 = arith.constant 0 : index
    %c0_1 = arith.constant 0 : index
    %c0_2 = arith.constant 0 : index
    %1 = vector.load %arg1[%c0, %c0_0, %c0_1, %c0_2] : memref<1x18x18x16xbf16, #tpu.memory_space<vmem>>, vector<1x16x16x16xbf16>
    %2 = vector.shape_cast %1 : vector<1x16x16x16xbf16> to vector<256x16xbf16>
    %c0_3 = arith.constant 0 : index
    %c0_4 = arith.constant 0 : index
    %c0_5 = arith.constant 0 : index
    %c0_6 = arith.constant 0 : index
    %3 = vector.load %arg2[%c0_3, %c0_4, %c0_5, %c0_6] : memref<3x3x16x32xbf16, #tpu.memory_space<vmem>>, vector<1x1x16x32xbf16>
    %4 = vector.shape_cast %3 : vector<1x1x16x32xbf16> to vector<16x32xbf16>
    %cst_7 = arith.constant dense<0.000000e+00> : vector<256x32xf32>
    %5 = tpu.matmul %2, %4, %cst_7 {dimension_numbers = #tpu.dot_dimension_numbers<[1], [0], [0], [1], [0, 0, 1, 1], [], []>} : vector<256x16xbf16>, vector<16x32xbf16>, vector<256x32xf32> -> vector<256x32xf32>
    %6 = arith.addf %0, %5 : vector<256x32xf32>
    %c0_8 = arith.constant 0 : index
    %c0_9 = arith.constant 0 : index
    %c1 = arith.constant 1 : index
    %c0_10 = arith.constant 0 : index
    %7 = vector.load %arg1[%c0_8, %c0_9, %c1, %c0_10] : memref<1x18x18x16xbf16, #tpu.memory_space<vmem>>, vector<1x16x16x16xbf16>
    %8 = vector.shape_cast %7 : vector<1x16x16x16xbf16> to vector<256x16xbf16>
    %c0_11 = arith.constant 0 : index
    %c1_12 = arith.constant 1 : index
    %c0_13 = arith.constant 0 : index
    %c0_14 = arith.constant 0 : index
    %9 = vector.load %arg2[%c0_11, %c1_12, %c0_13, %c0_14] : memref<3x3x16x32xbf16, #tpu.memory_space<vmem>>, vector<1x1x16x32xbf16>
    %10 = vector.shape_cast %9 : vector<1x1x16x32xbf16> to vector<16x32xbf16>
    %cst_15 = arith.constant dense<0.000000e+00> : vector<256x32xf32>
    %11 = tpu.matmul %8, %10, %cst_15 {dimension_numbers = #tpu.dot_dimension_numbers<[1], [0], [0], [1], [0, 0, 1, 1], [], []>} : vector<256x16xbf16>, vector<16x32xbf16>, vector<256x32xf32> -> vector<256x32xf32>
    %12 = arith.addf %6, %11 : vector<256x32xf32>
    %c0_16 = arith.constant 0 : index
    %c0_17 = arith.constant 0 : index
    %c2 = arith.constant 2 : index
    %c0_18 = arith.constant 0 : index
    %13 = vector.load %arg1[%c0_16, %c0_17, %c2, %c0_18] : memref<1x18x18x16xbf16, #tpu.memory_space<vmem>>, vector<1x16x16x16xbf16>
    %14 = vector.shape_cast %13 : vector<1x16x16x16xbf16> to vector<256x16xbf16>
    %c0_19 = arith.constant 0 : index
    %c2_20 = arith.constant 2 : index
    %c0_21 = arith.constant 0 : index
    %c0_22 = arith.constant 0 : index
    %15 = vector.load %arg2[%c0_19, %c2_20, %c0_21, %c0_22] : memref<3x3x16x32xbf16, #tpu.memory_space<vmem>>, vector<1x1x16x32xbf16>
    %16 = vector.shape_cast %15 : vector<1x1x16x32xbf16> to vector<16x32xbf16>
    %cst_23 = arith.constant dense<0.000000e+00> : vector<256x32xf32>
    %17 = tpu.matmul %14, %16, %cst_23 {dimension_numbers = #tpu.dot_dimension_numbers<[1], [0], [0], [1], [0, 0, 1, 1], [], []>} : vector<256x16xbf16>, vector<16x32xbf16>, vector<256x32xf32> -> vector<256x32xf32>
    %18 = arith.addf %12, %17 : vector<256x32xf32>
    %c0_24 = arith.constant 0 : index
    %c1_25 = arith.constant 1 : index
    %c0_26 = arith.constant 0 : index
    %c0_27 = arith.constant 0 : index
    %19 = vector.load %arg1[%c0_24, %c1_25, %c0_26, %c0_27] : memref<1x18x18x16xbf16, #tpu.memory_space<vmem>>, vector<1x16x16x16xbf16>
    %20 = vector.shape_cast %19 : vector<1x16x16x16xbf16> to vector<256x16xbf16>
    %c1_28 = arith.constant 1 : index
    %c0_29 = arith.constant 0 : index
    %c0_30 = arith.constant 0 : index
    %c0_31 = arith.constant 0 : index
    %21 = vector.load %arg2[%c1_28, %c0_29, %c0_30, %c0_31] : memref<3x3x16x32xbf16, #tpu.memory_space<vmem>>, vector<1x1x16x32xbf16>
    %22 = vector.shape_cast %21 : vector<1x1x16x32xbf16> to vector<16x32xbf16>
    %cst_32 = arith.constant dense<0.000000e+00> : vector<256x32xf32>
    %23 = tpu.matmul %20, %22, %cst_32 {dimension_numbers = #tpu.dot_dimension_numbers<[1], [0], [0], [1], [0, 0, 1, 1], [], []>} : vector<256x16xbf16>, vector<16x32xbf16>, vector<256x32xf32> -> vector<256x32xf32>
    %24 = arith.addf %18, %23 : vector<256x32xf32>
    %c0_33 = arith.constant 0 : index
    %c1_34 = arith.constant 1 : index
    %c1_35 = arith.constant 1 : index
    %c0_36 = arith.constant 0 : index
    %25 = vector.load %arg1[%c0_33, %c1_34, %c1_35, %c0_36] : memref<1x18x18x16xbf16, #tpu.memory_space<vmem>>, vector<1x16x16x16xbf16>
    %26 = vector.shape_cast %25 : vector<1x16x16x16xbf16> to vector<256x16xbf16>
    %c1_37 = arith.constant 1 : index
    %c1_38 = arith.constant 1 : index
    %c0_39 = arith.constant 0 : index
    %c0_40 = arith.constant 0 : index
    %27 = vector.load %arg2[%c1_37, %c1_38, %c0_39, %c0_40] : memref<3x3x16x32xbf16, #tpu.memory_space<vmem>>, vector<1x1x16x32xbf16>
    %28 = vector.shape_cast %27 : vector<1x1x16x32xbf16> to vector<16x32xbf16>
    %cst_41 = arith.constant dense<0.000000e+00> : vector<256x32xf32>
    %29 = tpu.matmul %26, %28, %cst_41 {dimension_numbers = #tpu.dot_dimension_numbers<[1], [0], [0], [1], [0, 0, 1, 1], [], []>} : vector<256x16xbf16>, vector<16x32xbf16>, vector<256x32xf32> -> vector<256x32xf32>
    %30 = arith.addf %24, %29 : vector<256x32xf32>
    %c0_42 = arith.constant 0 : index
    %c1_43 = arith.constant 1 : index
    %c2_44 = arith.constant 2 : index
    %c0_45 = arith.constant 0 : index
    %31 = vector.load %arg1[%c0_42, %c1_43, %c2_44, %c0_45] : memref<1x18x18x16xbf16, #tpu.memory_space<vmem>>, vector<1x16x16x16xbf16>
    %32 = vector.shape_cast %31 : vector<1x16x16x16xbf16> to vector<256x16xbf16>
    %c1_46 = arith.constant 1 : index
    %c2_47 = arith.constant 2 : index
    %c0_48 = arith.constant 0 : index
    %c0_49 = arith.constant 0 : index
    %33 = vector.load %arg2[%c1_46, %c2_47, %c0_48, %c0_49] : memref<3x3x16x32xbf16, #tpu.memory_space<vmem>>, vector<1x1x16x32xbf16>
    %34 = vector.shape_cast %33 : vector<1x1x16x32xbf16> to vector<16x32xbf16>
    %cst_50 = arith.constant dense<0.000000e+00> : vector<256x32xf32>
    %35 = tpu.matmul %32, %34, %cst_50 {dimension_numbers = #tpu.dot_dimension_numbers<[1], [0], [0], [1], [0, 0, 1, 1], [], []>} : vector<256x16xbf16>, vector<16x32xbf16>, vector<256x32xf32> -> vector<256x32xf32>
    %36 = arith.addf %30, %35 : vector<256x32xf32>
    %c0_51 = arith.constant 0 : index
    %c2_52 = arith.constant 2 : index
    %c0_53 = arith.constant 0 : index
    %c0_54 = arith.constant 0 : index
    %37 = vector.load %arg1[%c0_51, %c2_52, %c0_53, %c0_54] : memref<1x18x18x16xbf16, #tpu.memory_space<vmem>>, vector<1x16x16x16xbf16>
    %38 = vector.shape_cast %37 : vector<1x16x16x16xbf16> to vector<256x16xbf16>
    %c2_55 = arith.constant 2 : index
    %c0_56 = arith.constant 0 : index
    %c0_57 = arith.constant 0 : index
    %c0_58 = arith.constant 0 : index
    %39 = vector.load %arg2[%c2_55, %c0_56, %c0_57, %c0_58] : memref<3x3x16x32xbf16, #tpu.memory_space<vmem>>, vector<1x1x16x32xbf16>
    %40 = vector.shape_cast %39 : vector<1x1x16x32xbf16> to vector<16x32xbf16>
    %cst_59 = arith.constant dense<0.000000e+00> : vector<256x32xf32>
    %41 = tpu.matmul %38, %40, %cst_59 {dimension_numbers = #tpu.dot_dimension_numbers<[1], [0], [0], [1], [0, 0, 1, 1], [], []>} : vector<256x16xbf16>, vector<16x32xbf16>, vector<256x32xf32> -> vector<256x32xf32>
    %42 = arith.addf %36, %41 : vector<256x32xf32>
    %c0_60 = arith.constant 0 : index
    %c2_61 = arith.constant 2 : index
    %c1_62 = arith.constant 1 : index
    %c0_63 = arith.constant 0 : index
    %43 = vector.load %arg1[%c0_60, %c2_61, %c1_62, %c0_63] : memref<1x18x18x16xbf16, #tpu.memory_space<vmem>>, vector<1x16x16x16xbf16>
    %44 = vector.shape_cast %43 : vector<1x16x16x16xbf16> to vector<256x16xbf16>
    %c2_64 = arith.constant 2 : index
    %c1_65 = arith.constant 1 : index
    %c0_66 = arith.constant 0 : index
    %c0_67 = arith.constant 0 : index
    %45 = vector.load %arg2[%c2_64, %c1_65, %c0_66, %c0_67] : memref<3x3x16x32xbf16, #tpu.memory_space<vmem>>, vector<1x1x16x32xbf16>
    %46 = vector.shape_cast %45 : vector<1x1x16x32xbf16> to vector<16x32xbf16>
    %cst_68 = arith.constant dense<0.000000e+00> : vector<256x32xf32>
    %47 = tpu.matmul %44, %46, %cst_68 {dimension_numbers = #tpu.dot_dimension_numbers<[1], [0], [0], [1], [0, 0, 1, 1], [], []>} : vector<256x16xbf16>, vector<16x32xbf16>, vector<256x32xf32> -> vector<256x32xf32>
    %48 = arith.addf %42, %47 : vector<256x32xf32>
    %c0_69 = arith.constant 0 : index
    %c2_70 = arith.constant 2 : index
    %c2_71 = arith.constant 2 : index
    %c0_72 = arith.constant 0 : index
    %49 = vector.load %arg1[%c0_69, %c2_70, %c2_71, %c0_72] : memref<1x18x18x16xbf16, #tpu.memory_space<vmem>>, vector<1x16x16x16xbf16>
    %50 = vector.shape_cast %49 : vector<1x16x16x16xbf16> to vector<256x16xbf16>
    %c2_73 = arith.constant 2 : index
    %c2_74 = arith.constant 2 : index
    %c0_75 = arith.constant 0 : index
    %c0_76 = arith.constant 0 : index
    %51 = vector.load %arg2[%c2_73, %c2_74, %c0_75, %c0_76] : memref<3x3x16x32xbf16, #tpu.memory_space<vmem>>, vector<1x1x16x32xbf16>
    %52 = vector.shape_cast %51 : vector<1x1x16x32xbf16> to vector<16x32xbf16>
    %cst_77 = arith.constant dense<0.000000e+00> : vector<256x32xf32>
    %53 = tpu.matmul %50, %52, %cst_77 {dimension_numbers = #tpu.dot_dimension_numbers<[1], [0], [0], [1], [0, 0, 1, 1], [], []>} : vector<256x16xbf16>, vector<16x32xbf16>, vector<256x32xf32> -> vector<256x32xf32>
    %54 = arith.addf %48, %53 : vector<256x32xf32>
    %55 = vector.shape_cast %54 : vector<256x32xf32> to vector<1x8x2x16x32xf32>
    %56 = vector.extract_strided_slice %55 {offsets = [0, 0, 0, 0, 0], sizes = [1, 8, 1, 16, 32], strides = [1, 1, 1, 1, 1]} : vector<1x8x2x16x32xf32> to vector<1x8x1x16x32xf32>
    %57 = vector.shape_cast %56 : vector<1x8x1x16x32xf32> to vector<1x8x16x32xf32>
    %58 = vector.extract_strided_slice %55 {offsets = [0, 0, 1, 0, 0], sizes = [1, 8, 1, 16, 32], strides = [1, 1, 1, 1, 1]} : vector<1x8x2x16x32xf32> to vector<1x8x1x16x32xf32>
    %59 = vector.shape_cast %58 : vector<1x8x1x16x32xf32> to vector<1x8x16x32xf32>
    %60 = arith.maximumf %57, %59 : vector<1x8x16x32xf32>
    %61 = vector.shape_cast %60 : vector<1x8x16x32xf32> to vector<1x8x8x2x32xf32>
    %62 = vector.extract_strided_slice %61 {offsets = [0, 0, 0, 0, 0], sizes = [1, 8, 8, 1, 32], strides = [1, 1, 1, 1, 1]} : vector<1x8x8x2x32xf32> to vector<1x8x8x1x32xf32>
    %63 = vector.shape_cast %62 : vector<1x8x8x1x32xf32> to vector<1x8x8x32xf32>
    %64 = vector.extract_strided_slice %61 {offsets = [0, 0, 0, 1, 0], sizes = [1, 8, 8, 1, 32], strides = [1, 1, 1, 1, 1]} : vector<1x8x8x2x32xf32> to vector<1x8x8x1x32xf32>
    %65 = vector.shape_cast %64 : vector<1x8x8x1x32xf32> to vector<1x8x8x32xf32>
    %66 = arith.maximumf %63, %65 : vector<1x8x8x32xf32>
    %67 = vector.shape_cast %66 : vector<1x8x8x32xf32> to vector<1x64x32xf32>
    %c0_78 = arith.constant 0 : index
    %c0_79 = arith.constant 0 : index
    %68 = vector.load %arg3[%c0_78, %c0_79] : memref<1x32xf32, #tpu.memory_space<vmem>>, vector<1x32xf32>
    %69 = vector.shape_cast %68 : vector<1x32xf32> to vector<1x1x32xf32>
    %70 = vector.broadcast %69 : vector<1x1x32xf32> to vector<1x64x32xf32>
    %71 = arith.addf %67, %70 : vector<1x64x32xf32>
    %cst_80 = arith.constant 0.000000e+00 : f32
    %72 = vector.broadcast %cst_80 : f32 to vector<1x64x32xf32>
    %73 = arith.maximumf %71, %72 : vector<1x64x32xf32>
    %74 = arith.truncf %73 : vector<1x64x32xf32> to vector<1x64x32xbf16>
    %c0_81 = arith.constant 0 : index
    %c0_82 = arith.constant 0 : index
    %c0_83 = arith.constant 0 : index
    %75 = vector.load %arg4[%c0_81, %c0_82, %c0_83] : memref<1x64x32xbf16, #tpu.memory_space<vmem>>, vector<1x64x32xbf16>
    tpu.vector_store %arg4[%c0_81, %c0_82, %c0_83], %74 {strides = array<i32>} : memref<1x64x32xbf16, #tpu.memory_space<vmem>>, vector<1x64x32xbf16>,
    return
  }
  func.func @transform_0(%arg0: i32) -> (i32, i32, i32, i32) {
    %c0_i32 = arith.constant 0 : i32
    %c0_i32_0 = arith.constant 0 : i32
    %c0_i32_1 = arith.constant 0 : i32
    %c0_i32_2 = arith.constant 0 : i32
    return %arg0, %c0_i32, %c0_i32_0, %c0_i32_1 : i32, i32, i32, i32
  }
  func.func @transform_1(%arg0: i32) -> (i32, i32, i32, i32) {
    %c0_i32 = arith.constant 0 : i32
    %c0_i32_0 = arith.constant 0 : i32
    %c0_i32_1 = arith.constant 0 : i32
    %c0_i32_2 = arith.constant 0 : i32
    %c0_i32_3 = arith.constant 0 : i32
    return %c0_i32, %c0_i32_0, %c0_i32_1, %c0_i32_2 : i32, i32, i32, i32
  }
  func.func @transform_2(%arg0: i32) -> (i32, i32) {
    %c0_i32 = arith.constant 0 : i32
    %c0_i32_0 = arith.constant 0 : i32
    %c0_i32_1 = arith.constant 0 : i32
    return %c0_i32, %c0_i32_0 : i32, i32
  }
  func.func @transform_3(%arg0: i32) -> (i32, i32, i32) {
    %c0_i32 = arith.constant 0 : i32
    %c0_i32_0 = arith.constant 0 : i32
    %c0_i32_1 = arith.constant 0 : i32
    return %arg0, %c0_i32, %c0_i32_0 : i32, i32, i32
  }
}

module attributes {stable_mosaic.version = 11 : i64} {
  func.func @_linear_kernel(%arg0: i32, %arg1: memref<16x2048xbf16, #tpu.memory_space<vmem>>, %arg2: memref<2048x128xbf16, #tpu.memory_space<vmem>>, %arg3: memref<1x128xf32, #tpu.memory_space<vmem>>, %arg4: memref<16x128xf32, #tpu.memory_space<vmem>>) attributes {dimension_semantics = [#tpu.dimension_semantics<parallel>], iteration_bounds = array<i64: 1>, scalar_prefetch = 0 : i64, scratch_operands = 0 : i64, tpu.core_type = #tpu.core_type<tc>, window_params = [{transform_indices = @transform_0, window_bounds = array<i64: 16, 2048>}, {pipeline_mode = #tpu.pipeline_mode<synchronous>, transform_indices = @transform_1, window_bounds = array<i64: 2048, 128>}, {pipeline_mode = #tpu.pipeline_mode<synchronous>, transform_indices = @transform_2, window_bounds = array<i64: 1, 128>}, {transform_indices = @transform_3, window_bounds = array<i64: 16, 128>}]} {
    %c0 = arith.constant 0 : index
    %c0_0 = arith.constant 0 : index
    %0 = vector.load %arg1[%c0, %c0_0] : memref<16x2048xbf16, #tpu.memory_space<vmem>>, vector<16x2048xbf16>
    %c0_1 = arith.constant 0 : index
    %c0_2 = arith.constant 0 : index
    %1 = vector.load %arg2[%c0_1, %c0_2] : memref<2048x128xbf16, #tpu.memory_space<vmem>>, vector<2048x128xbf16>
    %cst = arith.constant dense<0.000000e+00> : vector<16x128xf32>
    %2 = tpu.matmul %0, %1, %cst {dimension_numbers = #tpu.dot_dimension_numbers<[1], [0], [0], [1], [0, 0, 1, 1], [], []>} : vector<16x2048xbf16>, vector<2048x128xbf16>, vector<16x128xf32> -> vector<16x128xf32>
    %c0_3 = arith.constant 0 : index
    %c0_4 = arith.constant 0 : index
    %3 = vector.load %arg3[%c0_3, %c0_4] : memref<1x128xf32, #tpu.memory_space<vmem>>, vector<1x128xf32>
    %4 = vector.broadcast %3 : vector<1x128xf32> to vector<16x128xf32>
    %5 = arith.addf %2, %4 : vector<16x128xf32>
    %c0_5 = arith.constant 0 : index
    %c0_6 = arith.constant 0 : index
    %6 = vector.load %arg4[%c0_5, %c0_6] : memref<16x128xf32, #tpu.memory_space<vmem>>, vector<16x128xf32>
    tpu.vector_store %arg4[%c0_5, %c0_6], %5 {strides = array<i32>} : memref<16x128xf32, #tpu.memory_space<vmem>>, vector<16x128xf32>,
    return
  }
  func.func @transform_0(%arg0: i32) -> (i32, i32) {
    %c0_i32 = arith.constant 0 : i32
    %c0_i32_0 = arith.constant 0 : i32
    return %arg0, %c0_i32 : i32, i32
  }
  func.func @transform_1(%arg0: i32) -> (i32, i32) {
    %c0_i32 = arith.constant 0 : i32
    %c0_i32_0 = arith.constant 0 : i32
    %c0_i32_1 = arith.constant 0 : i32
    return %c0_i32, %c0_i32_0 : i32, i32
  }
  func.func @transform_2(%arg0: i32) -> (i32, i32) {
    %c0_i32 = arith.constant 0 : i32
    %c0_i32_0 = arith.constant 0 : i32
    %c0_i32_1 = arith.constant 0 : i32
    return %c0_i32, %c0_i32_0 : i32, i32
  }
  func.func @transform_3(%arg0: i32) -> (i32, i32) {
    %c0_i32 = arith.constant 0 : i32
    %c0_i32_0 = arith.constant 0 : i32
    return %arg0, %c0_i32 : i32, i32
  }
}

</mosaic_0001>

<bundles_post_ra>
// kernel: encoder_forward.3
= control target key start
LH: loop header
LB: loop body
LE: loop exit
PB: predicated region body
PF: predicated region fallthrough
CT: control target
= control target key end

     0   :  { %s2277_s12 = smov 0   ;;  %s2729_s0 = inlined_call_operand.vmem [shape: bf16[2,1024,27], index: 0, kind: input, shape index: {}]   ;;  %s2730_s1 = inlined_call_operand.vmem [shape: bf16[27,16], index: 1, kind: input, shape index: {}]   ;;  %s2731_s2 = inlined_call_operand.vmem [shape: f32[1,16], index: 2, kind: input, shape index: {}]   ;;  %s2732_s3 = inlined_call_operand.vmem [shape: bf16[2,256,16], index: 3, kind: output, shape index: {}]  }
   0x1 LB: > { %s1763_s13 = sadd.s32 4294967295, %s2254_s12   ;;  %p1767_p0 = scmp.ge.s32.totalorder %s2254_s12, 1  ;;  %s2254_s12 = sphi %s2277_s12, %s13_s12  }
   0x2   : > { %p137_p1 = scmp.lt.s32.totalorder %s2254_s12, 3 }
   0x4   : > { %p138_p2 = pnand %p1767_p0, %p137_p1 }
   0x6   : > { %141 = sbr.rel (%p138_p2) target bundleno = 369 (0x171), region = 32 }
   0xd   : > { %v2182_v0 = vld [vmem:[%s2730_s1] sm:$0xff]   ;;  %vm828_vm0 = vcmask 1044480   ;;  %v2183_v1 = vld [vmem:[%s2730_s1 + $0x8] sm:$0x3f]   ;;  %vm829_vm1 = vcmask 1045504   ;;  %p161_p3 = scmp.lt.s32.totalorder %s1763_s13, 1 }
   0xe   : > { %2037 = vmatprep.subr.bf16.mxu0 %v2182_v0  ;;  %2169 = vmatprep.subr.bf16.mxu1 %v2182_v0  ;;  %v2256_v2 = vmov 65535   ;;  %vm635_vm2 = vcmask 220160   ;;  %vm1675_vm3 = vcmask 125952  }
   0xf   : > { %2038 = vmatpush3.bf16.msra.mxu0 %v2182_v0  ;;  %2171 = vmatpush3.bf16.msra.mxu1 %v2182_v0  ;;  %v830_v3 = vsel %vm828_vm0, 4294967295, %v2256_v2  ;;  %s2766_s13 = smov (!%p161_p3, %s1763_s13), 1 }
  0x10   : > { %v831_v4 = vsel %vm829_vm1, %v830_v3, 0  ;;  %s1937_s18 = sshll.u32 %s2766_s13, 9  ;;  %s1938_s24 = sshll.u32 %s2766_s13, 7 }
  0x11   : > { %v833_v5 = vand.u32 %v2183_v1, %v831_v4  ;;  %s2297_s21 = scalar_lea.vmem %s2729_s0, %s1937_s18  ;;  %s2575_s27 = scalar_lea.vmem %s2732_s3, %s1938_s24 }
  0x12   : > { %v2184_v6 = vld [vmem:[%s2297_s21] sm:$0xff]   ;;  %v2186_v8 = vld [vmem:[%s2297_s21 + $0x8] sm:$0xff]   ;;  %v2188_v10 = vld [vmem:[%s2297_s21 + $0x10] sm:$0xff]  }
  0x13   : > { %2039 = vmatprep.subr.bf16.mxu0 %v833_v5  ;;  %2170 = vmatprep.subr.bf16.mxu1 %v833_v5  ;;  %v2185_v7 = vld [vmem:[%s2297_s21 + $0x100] sm:$0xff]   ;;  %v2187_v9 = vld [vmem:[%s2297_s21 + $0x108] sm:$0xff]   ;;  %v2189_v11 = vld [vmem:[%s2297_s21 + $0x110] sm:$0xff]  }
  0x14   : > { %2040 = vmatpush3.bf16.msra.mxu0 %v833_v5  ;;  %2172 = vmatpush3.bf16.msra.mxu1 %v833_v5  ;;  %v2190_v12 = vld [vmem:[%s2297_s21 + $0x18] sm:$0xff]   ;;  %v2192_v14 = vld [vmem:[%s2297_s21 + $0x20] sm:$0xff]   ;;  %v2194_v16 = vld [vmem:[%s2297_s21 + $0x28] sm:$0xff]  }
  0x15   : > { %2041 = vmatprep.mubr.msk.bf16.mxu0 %vm635_vm2, %v2184_v6  ;;  %2105 = vmatprep.mubr.msk.bf16.mxu1 %vm635_vm2, %v2185_v7  ;;  %v2191_v13 = vld [vmem:[%s2297_s21 + $0x118] sm:$0xff]   ;;  %v2193_v15 = vld [vmem:[%s2297_s21 + $0x120] sm:$0xff]   ;;  %v2195_v17 = vld [vmem:[%s2297_s21 + $0x128] sm:$0xff]  }
  0x16   : > { %v2196_v18 = vld [vmem:[%s2297_s21 + $0x30] sm:$0xff]   ;;  %v2198_v20 = vld [vmem:[%s2297_s21 + $0x38] sm:$0xff]   ;;  %v2200_v22 = vld [vmem:[%s2297_s21 + $0x40] sm:$0xff]  }
  0x17   : > { %2042 = vmatmul.mubr.msk.bf16.vlgmr.msra.gmra.mrb[0].mxu0 %vm635_vm2, %v2186_v8  ;;  %2106 = vmatmul.mubr.msk.bf16.vlgmr.msra.gmra.mrb[0].mxu1 %vm635_vm2, %v2187_v9  ;;  %v2197_v19 = vld [vmem:[%s2297_s21 + $0x130] sm:$0xff]   ;;  %v2199_v21 = vld [vmem:[%s2297_s21 + $0x138] sm:$0xff]   ;;  %v2201_v23 = vld [vmem:[%s2297_s21 + $0x140] sm:$0xff]  }
  0x18   : > { %2045 = vmatprep.mubr.msk.bf16.mxu0 %vm635_vm2, %v2188_v10  ;;  %2109 = vmatprep.mubr.msk.bf16.mxu1 %vm635_vm2, %v2189_v11  ;;  %v2202_v24 = vld [vmem:[%s2297_s21 + $0x48] sm:$0xff]   ;;  %v2204_v26 = vld [vmem:[%s2297_s21 + $0x50] sm:$0xff]   ;;  %v2206_v28 = vld [vmem:[%s2297_s21 + $0x58] sm:$0xff]  }
  0x19   : > { %v2203_v25 = vld [vmem:[%s2297_s21 + $0x148] sm:$0xff]   ;;  %v2205_v27 = vld [vmem:[%s2297_s21 + $0x150] sm:$0xff]   ;;  %v2207_v29 = vld [vmem:[%s2297_s21 + $0x158] sm:$0xff]  }
  0x1a   : > { %v2208_v30 = vld [vmem:[%s2297_s21 + $0x60] sm:$0xff]   ;;  %v2210_v32 = vld [vmem:[%s2297_s21 + $0x68] sm:$0xff]   ;;  %v2212_v34 = vld [vmem:[%s2297_s21 + $0x70] sm:$0xff]  }
  0x1b   : > { %v2209_v31 = vld [vmem:[%s2297_s21 + $0x160] sm:$0xff]   ;;  %v2211_v33 = vld [vmem:[%s2297_s21 + $0x168] sm:$0xff]   ;;  %v2213_v35 = vld [vmem:[%s2297_s21 + $0x170] sm:$0xff]  }
  0x1c   : > { %v2214_v36 = vld [vmem:[%s2297_s21 + $0x78] sm:$0xff]   ;;  %v2216_v38 = vld [vmem:[%s2297_s21 + $0x80] sm:$0xff]   ;;  %v2218_v40 = vld [vmem:[%s2297_s21 + $0x88] sm:$0xff]  }
  0x1d   : > { %v2215_v37 = vld [vmem:[%s2297_s21 + $0x178] sm:$0xff]   ;;  %v2217_v39 = vld [vmem:[%s2297_s21 + $0x180] sm:$0xff]   ;;  %v2219_v41 = vld [vmem:[%s2297_s21 + $0x188] sm:$0xff]  }
  0x1e   : > { %v2220_v42 = vld [vmem:[%s2297_s21 + $0x90] sm:$0xff]   ;;  %v2222_v44 = vld [vmem:[%s2297_s21 + $0x98] sm:$0xff]   ;;  %v2224_v46 = vld [vmem:[%s2297_s21 + $0xa0] sm:$0xff]  }
  0x1f   : > { %2046 = vmatmul.mubr.msk.bf16.gmra.mrb[4].mxu0 %vm635_vm2, %v2190_v12  ;;  %2110 = vmatmul.mubr.msk.bf16.gmra.mrb[4].mxu1 %vm635_vm2, %v2191_v13  ;;  %v2221_v43 = vld [vmem:[%s2297_s21 + $0x190] sm:$0xff]   ;;  %v2223_v45 = vld [vmem:[%s2297_s21 + $0x198] sm:$0xff]   ;;  %v2225_v47 = vld [vmem:[%s2297_s21 + $0x1a0] sm:$0xff]  }
  0x20   : > { %2049 = vmatprep.mubr.msk.bf16.mxu0 %vm635_vm2, %v2192_v14  ;;  %2113 = vmatprep.mubr.msk.bf16.mxu1 %vm635_vm2, %v2193_v15  ;;  %v2226_v48 = vld [vmem:[%s2297_s21 + $0xa8] sm:$0xff]   ;;  %v2228_v50 = vld [vmem:[%s2297_s21 + $0xb0] sm:$0xff]   ;;  %v2230_v52 = vld [vmem:[%s2297_s21 + $0xb8] sm:$0xff]  }
  0x21   : > { %v2227_v49 = vld [vmem:[%s2297_s21 + $0x1a8] sm:$0xff]   ;;  %v2229_v51 = vld [vmem:[%s2297_s21 + $0x1b0] sm:$0xff]   ;;  %v2231_v53 = vld [vmem:[%s2297_s21 + $0x1b8] sm:$0xff]  }
  0x22   : > { %v2232_v54 = vld [vmem:[%s2297_s21 + $0xc0] sm:$0xff]   ;;  %v2234_v56 = vld [vmem:[%s2297_s21 + $0xc8] sm:$0xff]   ;;  %v2236_v58 = vld [vmem:[%s2297_s21 + $0xd0] sm:$0xff]  }
  0x23   : > { %v2233_v55 = vld [vmem:[%s2297_s21 + $0x1c0] sm:$0xff]   ;;  %v2235_v57 = vld [vmem:[%s2297_s21 + $0x1c8] sm:$0xff]   ;;  %v2237_v59 = vld [vmem:[%s2297_s21 + $0x1d0] sm:$0xff]  }
  0x24   : > { %v2238_v60 = vld [vmem:[%s2297_s21 + $0xd8] sm:$0xff]   ;;  %v2240_v62 = vld [vmem:[%s2297_s21 + $0xe0] sm:$0xff]   ;;  %v2242_v0 = vld [vmem:[%s2297_s21 + $0xe8] sm:$0xff]  }
  0x25   : > { %v2239_v61 = vld [vmem:[%s2297_s21 + $0x1d8] sm:$0xff]   ;;  %v2241_v63 = vld [vmem:[%s2297_s21 + $0x1e0] sm:$0xff]   ;;  %v2243_v1 = vld [vmem:[%s2297_s21 + $0x1e8] sm:$0xff]  }
  0x26   : > { %v2244_v2 = vld [vmem:[%s2297_s21 + $0xf0] sm:$0xff]   ;;  %v2246_v4 = vld [vmem:[%s2297_s21 + $0xf8] sm:$0xff]  }
  0x27   : > { %2050 = vmatmul.mubr.msk.bf16.gmra.mrb[8].mxu0 %vm635_vm2, %v2194_v16  ;;  %2114 = vmatmul.mubr.msk.bf16.gmra.mrb[8].mxu1 %vm635_vm2, %v2195_v17  ;;  %v2245_v3 = vld [vmem:[%s2297_s21 + $0x1f0] sm:$0xff]   ;;  %v2247_v5 = vld [vmem:[%s2297_s21 + $0x1f8] sm:$0xff]  }
  0x28   : > { %2053 = vmatprep.mubr.msk.bf16.mxu0 %vm635_vm2, %v2196_v18  ;;  %2117 = vmatprep.mubr.msk.bf16.mxu1 %vm635_vm2, %v2197_v19 }
  0x2f   : > { %2054 = vmatmul.mubr.msk.bf16.gmra.mrb[12].mxu0 %vm635_vm2, %v2198_v20  ;;  %2118 = vmatmul.mubr.msk.bf16.gmra.mrb[12].mxu1 %vm635_vm2, %v2199_v21 }
  0x30   : > { %2057 = vmatprep.mubr.msk.bf16.mxu0 %vm635_vm2, %v2200_v22  ;;  %2121 = vmatprep.mubr.msk.bf16.mxu1 %vm635_vm2, %v2201_v23 }
  0x37   : > { %2058 = vmatmul.mubr.msk.bf16.gmra.mrb[16].mxu0 %vm635_vm2, %v2202_v24  ;;  %2122 = vmatmul.mubr.msk.bf16.gmra.mrb[16].mxu1 %vm635_vm2, %v2203_v25 }
  0x38   : > { %2061 = vmatprep.mubr.msk.bf16.mxu0 %vm635_vm2, %v2204_v26  ;;  %2125 = vmatprep.mubr.msk.bf16.mxu1 %vm635_vm2, %v2205_v27 }
  0x3f   : > { %2062 = vmatmul.mubr.msk.bf16.gmra.mrb[20].mxu0 %vm635_vm2, %v2206_v28  ;;  %2126 = vmatmul.mubr.msk.bf16.gmra.mrb[20].mxu1 %vm635_vm2, %v2207_v29 }
  0x40   : > { %2065 = vmatprep.mubr.msk.bf16.mxu0 %vm635_vm2, %v2208_v30  ;;  %2129 = vmatprep.mubr.msk.bf16.mxu1 %vm635_vm2, %v2209_v31 }
  0x47   : > { %2066 = vmatmul.mubr.msk.bf16.gmra.mrb[24].mxu0 %vm635_vm2, %v2210_v32  ;;  %2130 = vmatmul.mubr.msk.bf16.gmra.mrb[24].mxu1 %vm635_vm2, %v2211_v33 }
  0x48   : > { %2069 = vmatprep.mubr.msk.bf16.mxu0 %vm635_vm2, %v2212_v34  ;;  %2133 = vmatprep.mubr.msk.bf16.mxu1 %vm635_vm2, %v2213_v35 }
  0x4f   : > { %2070 = vmatmul.mubr.msk.bf16.gmra.mrb[28].mxu0 %vm635_vm2, %v2214_v36  ;;  %2134 = vmatmul.mubr.msk.bf16.gmra.mrb[28].mxu1 %vm635_vm2, %v2215_v37 }
  0x50   : > { %2073 = vmatprep.mubr.msk.bf16.mxu0 %vm635_vm2, %v2216_v38  ;;  %2137 = vmatprep.mubr.msk.bf16.mxu1 %vm635_vm2, %v2217_v39 }
  0x57   : > { %2074 = vmatmul.mubr.msk.bf16.gmra.mrb[32].mxu0 %vm635_vm2, %v2218_v40  ;;  %2138 = vmatmul.mubr.msk.bf16.gmra.mrb[32].mxu1 %vm635_vm2, %v2219_v41 }
  0x58   : > { %2077 = vmatprep.mubr.msk.bf16.mxu0 %vm635_vm2, %v2220_v42  ;;  %2141 = vmatprep.mubr.msk.bf16.mxu1 %vm635_vm2, %v2221_v43 }
  0x5f   : > { %2078 = vmatmul.mubr.msk.bf16.gmra.mrb[36].mxu0 %vm635_vm2, %v2222_v44  ;;  %2142 = vmatmul.mubr.msk.bf16.gmra.mrb[36].mxu1 %vm635_vm2, %v2223_v45 }
  0x60   : > { %2081 = vmatprep.mubr.msk.bf16.mxu0 %vm635_vm2, %v2224_v46  ;;  %2145 = vmatprep.mubr.msk.bf16.mxu1 %vm635_vm2, %v2225_v47 }
  0x67   : > { %2082 = vmatmul.mubr.msk.bf16.gmra.mrb[40].mxu0 %vm635_vm2, %v2226_v48  ;;  %2146 = vmatmul.mubr.msk.bf16.gmra.mrb[40].mxu1 %vm635_vm2, %v2227_v49 }
  0x68   : > { %2085 = vmatprep.mubr.msk.bf16.mxu0 %vm635_vm2, %v2228_v50  ;;  %2149 = vmatprep.mubr.msk.bf16.mxu1 %vm635_vm2, %v2229_v51 }
  0x6f   : > { %2086 = vmatmul.mubr.msk.bf16.gmra.mrb[44].mxu0 %vm635_vm2, %v2230_v52  ;;  %2150 = vmatmul.mubr.msk.bf16.gmra.mrb[44].mxu1 %vm635_vm2, %v2231_v53 }
  0x70   : > { %2089 = vmatprep.mubr.msk.bf16.mxu0 %vm635_vm2, %v2232_v54  ;;  %2153 = vmatprep.mubr.msk.bf16.mxu1 %vm635_vm2, %v2233_v55 }
  0x77   : > { %2090 = vmatmul.mubr.msk.bf16.gmra.mrb[48].mxu0 %vm635_vm2, %v2234_v56  ;;  %2154 = vmatmul.mubr.msk.bf16.gmra.mrb[48].mxu1 %vm635_vm2, %v2235_v57 }
  0x78   : > { %2093 = vmatprep.mubr.msk.bf16.mxu0 %vm635_vm2, %v2236_v58  ;;  %2157 = vmatprep.mubr.msk.bf16.mxu1 %vm635_vm2, %v2237_v59 }
  0x7f   : > { %2094 = vmatmul.mubr.msk.bf16.gmra.mrb[52].mxu0 %vm635_vm2, %v2238_v60  ;;  %2158 = vmatmul.mubr.msk.bf16.gmra.mrb[52].mxu1 %vm635_vm2, %v2239_v61 }
  0x80   : > { %2097 = vmatprep.mubr.msk.bf16.mxu0 %vm635_vm2, %v2240_v62  ;;  %2161 = vmatprep.mubr.msk.bf16.mxu1 %vm635_vm2, %v2241_v63 }
  0x87   : > { %2098 = vmatmul.mubr.msk.bf16.gmra.mrb[56].mxu0 %vm635_vm2, %v2242_v0  ;;  %2162 = vmatmul.mubr.msk.bf16.gmra.mrb[56].mxu1 %vm635_vm2, %v2243_v1 }
  0x88   : > { %2101 = vmatprep.mubr.msk.bf16.mxu0 %vm635_vm2, %v2244_v2  ;;  %2165 = vmatprep.mubr.msk.bf16.mxu1 %vm635_vm2, %v2245_v3 }
  0x8f   : > { %2102 = vmatmul.mubr.msk.bf16.gmra.mrb[60].mxu0 %vm635_vm2, %v2246_v4  ;;  %2166 = vmatmul.mubr.msk.bf16.gmra.mrb[60].mxu1 %vm635_vm2, %v2247_v5 }
  0xea   : > { %v2427_v6 = vpop.f32.mrb[0].mxu0  ;;  %v2429_v7 = vpop.f32.mrb[0].mxu1 }
  0xeb   : > { %v2431_v8 = vpop.f32.mrb[1].mxu0  ;;  %v2433_v9 = vpop.f32.mrb[1].mxu1 }
  0xec   : > { %v2435_v10 = vpop.f32.mrb[2].mxu0  ;;  %v2437_v11 = vpop.f32.mrb[2].mxu1 }
  0xed   : > { %v2439_v12 = vpop.f32.mrb[3].mxu0  ;;  %v2441_v13 = vpop.f32.mrb[3].mxu1 }
  0xf2   : > { %v2443_v14 = vpop.f32.mrb[4].mxu0  ;;  %v2445_v15 = vpop.f32.mrb[4].mxu1 }
  0xf3   : > { %v2447_v16 = vpop.f32.mrb[5].mxu0  ;;  %v2449_v17 = vpop.f32.mrb[5].mxu1 }
  0xf4   : > { %v2451_v18 = vpop.f32.mrb[6].mxu0  ;;  %v2453_v19 = vpop.f32.mrb[6].mxu1 }
  0xf5   : > { %v2455_v20 = vpop.f32.mrb[7].mxu0  ;;  %v2457_v21 = vpop.f32.mrb[7].mxu1 }
  0xfa   : > { %v2459_v22 = vpop.f32.mrb[8].mxu0  ;;  %v2461_v23 = vpop.f32.mrb[8].mxu1 }
  0xfb   : > { %v2463_v24 = vpop.f32.mrb[9].mxu0  ;;  %v2465_v25 = vpop.f32.mrb[9].mxu1 }
  0xfc   : > { %v2467_v26 = vpop.f32.mrb[10].mxu0  ;;  %v2469_v27 = vpop.f32.mrb[10].mxu1 }
  0xfd   : > { %v2471_v28 = vpop.f32.mrb[11].mxu0  ;;  %v2473_v29 = vpop.f32.mrb[11].mxu1 }
 0x102   : > { %v2475_v30 = vpop.f32.mrb[12].mxu0  ;;  %v2477_v31 = vpop.f32.mrb[12].mxu1 }
 0x103   : > { %v2479_v32 = vpop.f32.mrb[13].mxu0  ;;  %v2481_v33 = vpop.f32.mrb[13].mxu1 }
 0x104   : > { %v2483_v34 = vpop.f32.mrb[14].mxu0  ;;  %v2485_v35 = vpop.f32.mrb[14].mxu1 }
 0x105   : > { %v2487_v36 = vpop.f32.mrb[15].mxu0  ;;  %v2489_v37 = vpop.f32.mrb[15].mxu1 }
 0x10a   : > { %v2491_v38 = vpop.f32.mrb[16].mxu0  ;;  %v2493_v39 = vpop.f32.mrb[16].mxu1 }
 0x10b   : > { %v2495_v40 = vpop.f32.mrb[17].mxu0  ;;  %v2497_v41 = vpop.f32.mrb[17].mxu1 }
 0x10c   : > { %v2499_v42 = vpop.f32.mrb[18].mxu0  ;;  %v2501_v43 = vpop.f32.mrb[18].mxu1 }
 0x10d   : > { %v2503_v44 = vpop.f32.mrb[19].mxu0  ;;  %v2505_v45 = vpop.f32.mrb[19].mxu1 }
 0x112   : > { %v2507_v46 = vpop.f32.mrb[20].mxu0  ;;  %v2509_v47 = vpop.f32.mrb[20].mxu1 }
 0x113   : > { %v2511_v48 = vpop.f32.mrb[21].mxu0  ;;  %v2513_v49 = vpop.f32.mrb[21].mxu1 }
 0x114   : > { %v2515_v50 = vpop.f32.mrb[22].mxu0  ;;  %v2517_v51 = vpop.f32.mrb[22].mxu1 }
 0x115   : > { %v2519_v52 = vpop.f32.mrb[23].mxu0  ;;  %v2521_v53 = vpop.f32.mrb[23].mxu1 }
 0x11a   : > { %v2523_v54 = vpop.f32.mrb[24].mxu0  ;;  %v2525_v55 = vpop.f32.mrb[24].mxu1 }
 0x11b   : > { %2733 = vst [vmem:[#allocation2_spill] sm:$0xff] %v2523_v54  ;;  %2734 = vst [vmem:[#allocation3_spill] sm:$0xff] %v2525_v55  ;;  %v2527_v56 = vpop.f32.mrb[25].mxu0  ;;  %v2529_v57 = vpop.f32.mrb[25].mxu1 }
 0x11c   : > { %2735 = vst [vmem:[#allocation4_spill] sm:$0xff] %v2527_v56  ;;  %2736 = vst [vmem:[#allocation5_spill] sm:$0xff] %v2529_v57  ;;  %v2531_v58 = vpop.f32.mrb[26].mxu0  ;;  %v2533_v59 = vpop.f32.mrb[26].mxu1 }
 0x11d   : > { %2737 = vst [vmem:[#allocation6_spill] sm:$0xff] %v2531_v58  ;;  %2738 = vst [vmem:[#allocation7_spill] sm:$0xff] %v2533_v59  ;;  %v2535_v60 = vpop.f32.mrb[27].mxu0  ;;  %v2537_v61 = vpop.f32.mrb[27].mxu1 }
 0x11e   : > { %2739 = vst [vmem:[#allocation8_spill] sm:$0xff] %v2535_v60  ;;  %2740 = vst [vmem:[#allocation9_spill] sm:$0xff] %v2537_v61 }
 0x122   : > { %v2539_v62 = vpop.f32.mrb[28].mxu0  ;;  %v2541_v63 = vpop.f32.mrb[28].mxu1 }
 0x123   : > { %2741 = vst [vmem:[#allocation10_spill] sm:$0xff] %v2539_v62  ;;  %2742 = vst [vmem:[#allocation11_spill] sm:$0xff] %v2541_v63  ;;  %v2543_v0 = vpop.f32.mrb[29].mxu0  ;;  %v2545_v1 = vpop.f32.mrb[29].mxu1 }
 0x124   : > { %2743 = vst [vmem:[#allocation12_spill] sm:$0xff] %v2543_v0  ;;  %2744 = vst [vmem:[#allocation13_spill] sm:$0xff] %v2545_v1  ;;  %v2547_v2 = vpop.f32.mrb[30].mxu0  ;;  %v2549_v3 = vpop.f32.mrb[30].mxu1 }
 0x125   : > { %2745 = vst [vmem:[#allocation14_spill] sm:$0xff] %v2547_v2  ;;  %2746 = vst [vmem:[#allocation15_spill] sm:$0xff] %v2549_v3  ;;  %v2551_v4 = vpop.f32.mrb[31].mxu0  ;;  %v2553_v5 = vpop.f32.mrb[31].mxu1  ;;  %v2561_v3 = vld [vmem:[%s2731_s2] ss:$0 sm:$0xff] }
 0x126   : > { %2747 = vst [vmem:[#allocation16_spill] sm:$0xff] %v2551_v4  ;;  %2748 = vst [vmem:[#allocation17_spill] sm:$0xff] %v2553_v5 }
 0x12a   : > { %v2075_v59 = vpop.f32.mrb[32].mxu0  ;;  %v2139_v61 = vpop.f32.mrb[32].mxu1 }
 0x12b   : > { %v1382_v60 = vmax.f32 %v2427_v6, %v2075_v59  ;;  %v997_v58 = vpop.f32.mrb[33].mxu0  ;;  %v1414_v63 = vmax.f32 %v2429_v7, %v2139_v61  ;;  %v1253_v62 = vpop.f32.mrb[33].mxu1 }
 0x12c   : > { %v1380_v0 = vmax.f32 %v2431_v8, %v997_v58  ;;  %v2076_v1 = vpop.f32.mrb[34].mxu0  ;;  %v1412_v4 = vmax.f32 %v2433_v9, %v1253_v62  ;;  %v2140_v2 = vpop.f32.mrb[34].mxu1 }
 0x12d   : > { %v1383_v5 = vmax.f32 %v2435_v10, %v2076_v1  ;;  %v1000_v6 = vpop.f32.mrb[35].mxu0  ;;  %v1446_v59 = vmax.f32 %v1382_v60, %v1414_v63  ;;  %v1415_v57 = vmax.f32 %v2437_v11, %v2140_v2  ;;  %v1256_v61 = vpop.f32.mrb[35].mxu1 }
 0x12e   : > { %v1381_v7 = vmax.f32 %v2439_v12, %v1000_v6  ;;  %v1444_v8 = vmax.f32 %v1380_v0, %v1412_v4  ;;  %v1413_v58 = vmax.f32 %v2441_v13, %v1256_v61 }
 0x12f   : > { %v1485_v56 = vadd.f32 %v2561_v3, %v1446_v59  ;;  %v1447_v55 = vmax.f32 %v1383_v5, %v1415_v57 }
 0x130   : > { %v1483_v54 = vadd.f32 %v2561_v3, %v1444_v8  ;;  %v1445_v9 = vmax.f32 %v1381_v7, %v1413_v58 }
 0x131   : > { %v1517_v62 = vmax.f32 %v1485_v56, 0.0  ;;  %v1486_v10 = vadd.f32 %v2561_v3, %v1447_v55 }
 0x132   : > { %v2079_v1 = vpop.f32.mrb[36].mxu0  ;;  %v1515_v11 = vmax.f32 %v1483_v54, 0.0  ;;  %v1484_v12 = vadd.f32 %v2561_v3, %v1445_v9  ;;  %v2143_v57 = vpop.f32.mrb[36].mxu1 }
 0x133   : > { %v1386_v13 = vmax.f32 %v2443_v14, %v2079_v1  ;;  %v1013_v60 = vpop.f32.mrb[37].mxu0  ;;  %v1941_v63 = vpack.c.bf16 %v1517_v62, %v1517_v62  ;;  %v1518_v0 = vmax.f32 %v1486_v10, 0.0  ;;  %v1418_v56 = vmax.f32 %v2445_v15, %v2143_v57  ;;  %v1269_v2 = vpop.f32.mrb[37].mxu1 }
 0x134   : > { %v1384_v55 = vmax.f32 %v2447_v16, %v1013_v60  ;;  %v2080_v4 = vpop.f32.mrb[38].mxu0  ;;  %v1939_v5 = vpack.c.bf16 %v1515_v11, %v1515_v11  ;;  %v1516_v6 = vmax.f32 %v1484_v12, 0.0  ;;  %v1416_v54 = vmax.f32 %v2449_v17, %v1269_v2  ;;  %v2144_v14 = vpop.f32.mrb[38].mxu1 }
 0x135   : > { %v1387_v59 = vmax.f32 %v2451_v18, %v2080_v4  ;;  %v1016_v7 = vpop.f32.mrb[39].mxu0  ;;  %1678 = vst.msk [vmem:[%s2575_s27 + $0x8] sm:$0xf] %vm1675_vm3, %v1941_v63  ;;  %v1942_v61 = vpack.c.bf16 %v1518_v0, %v1518_v0  ;;  %v1450_v8 = vmax.f32 %v1386_v13, %v1418_v56  ;;  %v1419_v15 = vmax.f32 %v2453_v19, %v2144_v14  ;;  %v1272_v58 = vpop.f32.mrb[39].mxu1 }
 0x136   : > { %v1385_v16 = vmax.f32 %v2455_v20, %v1016_v7  ;;  %1676 = vst.msk [vmem:[%s2575_s27] sm:$0xf] %vm1675_vm3, %v1939_v5  ;;  %v1940_v9 = vpack.c.bf16 %v1516_v6, %v1516_v6  ;;  %v1448_v62 = vmax.f32 %v1384_v55, %v1416_v54  ;;  %v1417_v17 = vmax.f32 %v2457_v21, %v1272_v58 }
 0x137   : > { %1679 = vst.msk [vmem:[%s2575_s27 + $0xc] sm:$0xf] %vm1675_vm3, %v1942_v61  ;;  %v1489_v18 = vadd.f32 %v2561_v3, %v1450_v8  ;;  %v1451_v10 = vmax.f32 %v1387_v59, %v1419_v15 }
 0x138   : > { %1677 = vst.msk [vmem:[%s2575_s27 + $0x4] sm:$0xf] %vm1675_vm3, %v1940_v9  ;;  %v1487_v1 = vadd.f32 %v2561_v3, %v1448_v62  ;;  %v1449_v11 = vmax.f32 %v1385_v16, %v1417_v17 }
 0x139   : > { %v1521_v19 = vmax.f32 %v1489_v18, 0.0  ;;  %v1490_v20 = vadd.f32 %v2561_v3, %v1451_v10 }
 0x13a   : > { %v2083_v12 = vpop.f32.mrb[40].mxu0  ;;  %v1519_v13 = vmax.f32 %v1487_v1, 0.0  ;;  %v1488_v57 = vadd.f32 %v2561_v3, %v1449_v11  ;;  %v2147_v60 = vpop.f32.mrb[40].mxu1 }
 0x13b   : > { %v1390_v21 = vmax.f32 %v2459_v22, %v2083_v12  ;;  %v1029_v63 = vpop.f32.mrb[41].mxu0  ;;  %v1945_v0 = vpack.c.bf16 %v1521_v19, %v1521_v19  ;;  %v1522_v56 = vmax.f32 %v1490_v20, 0.0  ;;  %v1422_v55 = vmax.f32 %v2461_v23, %v2147_v60  ;;  %v1285_v4 = vpop.f32.mrb[41].mxu1 }
 0x13c   : > { %v1388_v2 = vmax.f32 %v2463_v24, %v1029_v63  ;;  %v2084_v5 = vpop.f32.mrb[42].mxu0  ;;  %v1943_v6 = vpack.c.bf16 %v1519_v13, %v1519_v13  ;;  %v1520_v54 = vmax.f32 %v1488_v57, 0.0  ;;  %v1420_v59 = vmax.f32 %v2465_v25, %v1285_v4  ;;  %v2148_v22 = vpop.f32.mrb[42].mxu1 }
 0x13d   : > { %v1391_v14 = vmax.f32 %v2467_v26, %v2084_v5  ;;  %v1032_v7 = vpop.f32.mrb[43].mxu0  ;;  %1682 = vst.msk [vmem:[%s2575_s27 + $0x18] sm:$0xf] %vm1675_vm3, %v1945_v0  ;;  %v1946_v61 = vpack.c.bf16 %v1522_v56, %v1522_v56  ;;  %v1454_v8 = vmax.f32 %v1390_v21, %v1422_v55  ;;  %v1423_v23 = vmax.f32 %v2469_v27, %v2148_v22  ;;  %v1288_v15 = vpop.f32.mrb[43].mxu1 }
 0x13e   : > { %v1389_v24 = vmax.f32 %v2471_v28, %v1032_v7  ;;  %1680 = vst.msk [vmem:[%s2575_s27 + $0x10] sm:$0xf] %vm1675_vm3, %v1943_v6  ;;  %v1944_v16 = vpack.c.bf16 %v1520_v54, %v1520_v54  ;;  %v1452_v58 = vmax.f32 %v1388_v2, %v1420_v59  ;;  %v1421_v25 = vmax.f32 %v2473_v29, %v1288_v15 }
 0x13f   : > { %1683 = vst.msk [vmem:[%s2575_s27 + $0x1c] sm:$0xf] %vm1675_vm3, %v1946_v61  ;;  %v1493_v26 = vadd.f32 %v2561_v3, %v1454_v8  ;;  %v1455_v9 = vmax.f32 %v1391_v14, %v1423_v23 }
 0x140   : > { %1681 = vst.msk [vmem:[%s2575_s27 + $0x14] sm:$0xf] %vm1675_vm3, %v1944_v16  ;;  %v1491_v62 = vadd.f32 %v2561_v3, %v1452_v58  ;;  %v1453_v17 = vmax.f32 %v1389_v24, %v1421_v25 }
 0x141   : > { %v1525_v27 = vmax.f32 %v1493_v26, 0.0  ;;  %v1494_v28 = vadd.f32 %v2561_v3, %v1455_v9 }
 0x142   : > { %v2087_v18 = vpop.f32.mrb[44].mxu0  ;;  %v1523_v10 = vmax.f32 %v1491_v62, 0.0  ;;  %v1492_v1 = vadd.f32 %v2561_v3, %v1453_v17  ;;  %v2151_v11 = vpop.f32.mrb[44].mxu1 }
 0x143   : > { %v1394_v29 = vmax.f32 %v2475_v30, %v2087_v18  ;;  %v1045_v19 = vpop.f32.mrb[45].mxu0  ;;  %v1949_v20 = vpack.c.bf16 %v1525_v27, %v1525_v27  ;;  %v1526_v12 = vmax.f32 %v1494_v28, 0.0  ;;  %v1426_v13 = vmax.f32 %v2477_v31, %v2151_v11  ;;  %v1301_v21 = vpop.f32.mrb[45].mxu1 }
 0x144   : > { %v1392_v57 = vmax.f32 %v2479_v32, %v1045_v19  ;;  %v2088_v60 = vpop.f32.mrb[46].mxu0  ;;  %v1947_v63 = vpack.c.bf16 %v1523_v10, %v1523_v10  ;;  %v1524_v0 = vmax.f32 %v1492_v1, 0.0  ;;  %v1424_v56 = vmax.f32 %v2481_v33, %v1301_v21  ;;  %v2152_v30 = vpop.f32.mrb[46].mxu1 }
 0x145   : > { %v1395_v55 = vmax.f32 %v2483_v34, %v2088_v60  ;;  %v1048_v2 = vpop.f32.mrb[47].mxu0  ;;  %1686 = vst.msk [vmem:[%s2575_s27 + $0x28] sm:$0xf] %vm1675_vm3, %v1949_v20  ;;  %v1950_v4 = vpack.c.bf16 %v1526_v12, %v1526_v12  ;;  %v1458_v5 = vmax.f32 %v1394_v29, %v1426_v13  ;;  %v1427_v31 = vmax.f32 %v2485_v35, %v2152_v30  ;;  %v1304_v6 = vpop.f32.mrb[47].mxu1 }
 0x146   : > { %v1393_v32 = vmax.f32 %v2487_v36, %v1048_v2  ;;  %1684 = vst.msk [vmem:[%s2575_s27 + $0x20] sm:$0xf] %vm1675_vm3, %v1947_v63  ;;  %v1948_v54 = vpack.c.bf16 %v1524_v0, %v1524_v0  ;;  %v1456_v59 = vmax.f32 %v1392_v57, %v1424_v56  ;;  %v1425_v33 = vmax.f32 %v2489_v37, %v1304_v6 }
 0x147   : > { %1687 = vst.msk [vmem:[%s2575_s27 + $0x2c] sm:$0xf] %vm1675_vm3, %v1950_v4  ;;  %v1497_v34 = vadd.f32 %v2561_v3, %v1458_v5  ;;  %v1459_v14 = vmax.f32 %v1395_v55, %v1427_v31 }
 0x148   : > { %1685 = vst.msk [vmem:[%s2575_s27 + $0x24] sm:$0xf] %vm1675_vm3, %v1948_v54  ;;  %v1495_v22 = vadd.f32 %v2561_v3, %v1456_v59  ;;  %v1457_v7 = vmax.f32 %v1393_v32, %v1425_v33 }
 0x149   : > { %v1529_v35 = vmax.f32 %v1497_v34, 0.0  ;;  %v1498_v36 = vadd.f32 %v2561_v3, %v1459_v14 }
 0x14a   : > { %v2091_v61 = vpop.f32.mrb[48].mxu0  ;;  %v1527_v8 = vmax.f32 %v1495_v22, 0.0  ;;  %v1496_v23 = vadd.f32 %v2561_v3, %v1457_v7  ;;  %v2155_v24 = vpop.f32.mrb[48].mxu1 }
 0x14b   : > { %v1398_v37 = vmax.f32 %v2491_v38, %v2091_v61  ;;  %v1061_v15 = vpop.f32.mrb[49].mxu0  ;;  %v1953_v16 = vpack.c.bf16 %v1529_v35, %v1529_v35  ;;  %v1530_v58 = vmax.f32 %v1498_v36, 0.0  ;;  %v1430_v25 = vmax.f32 %v2493_v39, %v2155_v24  ;;  %v1317_v9 = vpop.f32.mrb[49].mxu1 }
 0x14c   : > { %v1396_v26 = vmax.f32 %v2495_v40, %v1061_v15  ;;  %v2092_v62 = vpop.f32.mrb[50].mxu0  ;;  %v1951_v17 = vpack.c.bf16 %v1527_v8, %v1527_v8  ;;  %v1528_v27 = vmax.f32 %v1496_v23, 0.0  ;;  %v1428_v28 = vmax.f32 %v2497_v41, %v1317_v9  ;;  %v2156_v38 = vpop.f32.mrb[50].mxu1  ;;  %v2749_v15 = vld [vmem:[#allocation2_spill] sm:$0xff]  ;;  %v2750_v9 = vld [vmem:[#allocation3_spill] sm:$0xff] }
 0x14d   : > { %v1399_v18 = vmax.f32 %v2499_v42, %v2092_v62  ;;  %v1064_v10 = vpop.f32.mrb[51].mxu0  ;;  %1690 = vst.msk [vmem:[%s2575_s27 + $0x38] sm:$0xf] %vm1675_vm3, %v1953_v16  ;;  %v1954_v1 = vpack.c.bf16 %v1530_v58, %v1530_v58  ;;  %v1462_v29 = vmax.f32 %v1398_v37, %v1430_v25  ;;  %v1431_v39 = vmax.f32 %v2501_v43, %v2156_v38  ;;  %v1320_v11 = vpop.f32.mrb[51].mxu1 }
 0x14e   : > { %v1397_v40 = vmax.f32 %v2503_v44, %v1064_v10  ;;  %1688 = vst.msk [vmem:[%s2575_s27 + $0x30] sm:$0xf] %vm1675_vm3, %v1951_v17  ;;  %v1952_v19 = vpack.c.bf16 %v1528_v27, %v1528_v27  ;;  %v1460_v20 = vmax.f32 %v1396_v26, %v1428_v28  ;;  %v1429_v41 = vmax.f32 %v2505_v45, %v1320_v11  ;;  %v2751_v17 = vld [vmem:[#allocation4_spill] sm:$0xff] }
 0x14f   : > { %1691 = vst.msk [vmem:[%s2575_s27 + $0x3c] sm:$0xf] %vm1675_vm3, %v1954_v1  ;;  %v1501_v42 = vadd.f32 %v2561_v3, %v1462_v29  ;;  %v1463_v12 = vmax.f32 %v1399_v18, %v1431_v39  ;;  %v2752_v1 = vld [vmem:[#allocation5_spill] sm:$0xff]  ;;  %v2753_v39 = vld [vmem:[#allocation6_spill] sm:$0xff] }
 0x150   : > { %1689 = vst.msk [vmem:[%s2575_s27 + $0x34] sm:$0xf] %vm1675_vm3, %v1952_v19  ;;  %v1499_v13 = vadd.f32 %v2561_v3, %v1460_v20  ;;  %v1461_v57 = vmax.f32 %v1397_v40, %v1429_v41 }
 0x151   : > { %v1533_v43 = vmax.f32 %v1501_v42, 0.0  ;;  %v1502_v44 = vadd.f32 %v2561_v3, %v1463_v12  ;;  %v2754_v42 = vld [vmem:[#allocation7_spill] sm:$0xff] }
 0x152   : > { %v2095_v21 = vpop.f32.mrb[52].mxu0  ;;  %v1531_v60 = vmax.f32 %v1499_v13, 0.0  ;;  %v1500_v63 = vadd.f32 %v2561_v3, %v1461_v57  ;;  %v2159_v0 = vpop.f32.mrb[52].mxu1  ;;  %v2755_v13 = vld [vmem:[#allocation8_spill] sm:$0xff] }
 0x153   : > { %v1402_v45 = vmax.f32 %v2507_v46, %v2095_v21  ;;  %v1077_v56 = vpop.f32.mrb[53].mxu0  ;;  %v1957_v55 = vpack.c.bf16 %v1533_v43, %v1533_v43  ;;  %v1534_v30 = vmax.f32 %v1502_v44, 0.0  ;;  %v1434_v2 = vmax.f32 %v2509_v47, %v2159_v0  ;;  %v1333_v5 = vpop.f32.mrb[53].mxu1 }
 0x154   : > { %v1400_v4 = vmax.f32 %v2511_v48, %v1077_v56  ;;  %v2096_v31 = vpop.f32.mrb[54].mxu0  ;;  %v1955_v32 = vpack.c.bf16 %v1531_v60, %v1531_v60  ;;  %v1532_v6 = vmax.f32 %v1500_v63, 0.0  ;;  %v1432_v54 = vmax.f32 %v2513_v49, %v1333_v5  ;;  %v2160_v46 = vpop.f32.mrb[54].mxu1  ;;  %v2756_v60 = vld [vmem:[#allocation9_spill] sm:$0xff] }
 0x155   : > { %v1403_v59 = vmax.f32 %v2515_v50, %v2096_v31  ;;  %v1080_v33 = vpop.f32.mrb[55].mxu0  ;;  %1694 = vst.msk [vmem:[%s2575_s27 + $0x48] sm:$0xf] %vm1675_vm3, %v1957_v55  ;;  %v1958_v34 = vpack.c.bf16 %v1534_v30, %v1534_v30  ;;  %v1466_v14 = vmax.f32 %v1402_v45, %v1434_v2  ;;  %v1435_v47 = vmax.f32 %v2517_v51, %v2160_v46  ;;  %v1336_v22 = vpop.f32.mrb[55].mxu1 }
 0x156   : > { %v1401_v48 = vmax.f32 %v2519_v52, %v1080_v33  ;;  %1692 = vst.msk [vmem:[%s2575_s27 + $0x40] sm:$0xf] %vm1675_vm3, %v1955_v32  ;;  %v1956_v7 = vpack.c.bf16 %v1532_v6, %v1532_v6  ;;  %v1464_v35 = vmax.f32 %v1400_v4, %v1432_v54  ;;  %v1433_v49 = vmax.f32 %v2521_v53, %v1336_v22  ;;  %v2757_v32 = vld [vmem:[#allocation10_spill] sm:$0xff] }
 0x157   : > { %1695 = vst.msk [vmem:[%s2575_s27 + $0x4c] sm:$0xf] %vm1675_vm3, %v1958_v34  ;;  %v1505_v50 = vadd.f32 %v2561_v3, %v1466_v14  ;;  %v1467_v36 = vmax.f32 %v1403_v59, %v1435_v47  ;;  %v2758_v34 = vld [vmem:[#allocation11_spill] sm:$0xff]  ;;  %v2759_v47 = vld [vmem:[#allocation12_spill] sm:$0xff] }
 0x158   : > { %1693 = vst.msk [vmem:[%s2575_s27 + $0x44] sm:$0xf] %vm1675_vm3, %v1956_v7  ;;  %v1503_v61 = vadd.f32 %v2561_v3, %v1464_v35  ;;  %v1465_v8 = vmax.f32 %v1401_v48, %v1433_v49 }
 0x159   : > { %v1537_v51 = vmax.f32 %v1505_v50, 0.0  ;;  %v1506_v52 = vadd.f32 %v2561_v3, %v1467_v36  ;;  %v2760_v50 = vld [vmem:[#allocation13_spill] sm:$0xff] }
 0x15a   : > { %v2099_v23 = vpop.f32.mrb[56].mxu0  ;;  %v1535_v37 = vmax.f32 %v1503_v61, 0.0  ;;  %v1504_v24 = vadd.f32 %v2561_v3, %v1465_v8  ;;  %v2163_v16 = vpop.f32.mrb[56].mxu1  ;;  %v2761_v61 = vld [vmem:[#allocation14_spill] sm:$0xff] }
 0x15b   : > { %v1406_v53 = vmax.f32 %v2749_v15, %v2099_v23  ;;  %v1093_v58 = vpop.f32.mrb[57].mxu0  ;;  %v1961_v25 = vpack.c.bf16 %v1537_v51, %v1537_v51  ;;  %v1538_v26 = vmax.f32 %v1506_v52, 0.0  ;;  %v1438_v62 = vmax.f32 %v2750_v9, %v2163_v16  ;;  %v1349_v28 = vpop.f32.mrb[57].mxu1  ;;  %v2764_v9 = vld [vmem:[#allocation17_spill] sm:$0xff] }
 0x15c   : > { %v1404_v27 = vmax.f32 %v2751_v17, %v1093_v58  ;;  %v2100_v18 = vpop.f32.mrb[58].mxu0  ;;  %v1959_v38 = vpack.c.bf16 %v1535_v37, %v1535_v37  ;;  %v1536_v10 = vmax.f32 %v1504_v24, 0.0  ;;  %v1436_v29 = vmax.f32 %v2752_v1, %v1349_v28  ;;  %v2164_v11 = vpop.f32.mrb[58].mxu1  ;;  %v2762_v24 = vld [vmem:[#allocation15_spill] sm:$0xff] }
 0x15d   : > { %v1407_v40 = vmax.f32 %v2753_v39, %v2100_v18  ;;  %v1096_v19 = vpop.f32.mrb[59].mxu0  ;;  %1698 = vst.msk [vmem:[%s2575_s27 + $0x58] sm:$0xf] %vm1675_vm3, %v1961_v25  ;;  %v1962_v20 = vpack.c.bf16 %v1538_v26, %v1538_v26  ;;  %v1470_v41 = vmax.f32 %v1406_v53, %v1438_v62  ;;  %v1439_v12 = vmax.f32 %v2754_v42, %v2164_v11  ;;  %v1352_v43 = vpop.f32.mrb[59].mxu1  ;;  %v2763_v53 = vld [vmem:[#allocation16_spill] sm:$0xff] }
 0x15e   : > { %v1405_v57 = vmax.f32 %v2755_v13, %v1096_v19  ;;  %1696 = vst.msk [vmem:[%s2575_s27 + $0x50] sm:$0xf] %vm1675_vm3, %v1959_v38  ;;  %v1960_v44 = vpack.c.bf16 %v1536_v10, %v1536_v10  ;;  %v1468_v21 = vmax.f32 %v1404_v27, %v1436_v29  ;;  %v1437_v63 = vmax.f32 %v2756_v60, %v1352_v43 }
 0x15f   : > { %1699 = vst.msk [vmem:[%s2575_s27 + $0x5c] sm:$0xf] %vm1675_vm3, %v1962_v20  ;;  %v1509_v45 = vadd.f32 %v2561_v3, %v1470_v41  ;;  %v1471_v0 = vmax.f32 %v1407_v40, %v1439_v12 }
 0x160   : > { %1697 = vst.msk [vmem:[%s2575_s27 + $0x54] sm:$0xf] %vm1675_vm3, %v1960_v44  ;;  %v1507_v56 = vadd.f32 %v2561_v3, %v1468_v21  ;;  %v1469_v55 = vmax.f32 %v1405_v57, %v1437_v63 }
 0x161   : > { %v1541_v30 = vmax.f32 %v1509_v45, 0.0  ;;  %v1510_v2 = vadd.f32 %v2561_v3, %v1471_v0 }
 0x162   : > { %v2103_v4 = vpop.f32.mrb[60].mxu0  ;;  %v1539_v5 = vmax.f32 %v1507_v56, 0.0  ;;  %v1508_v31 = vadd.f32 %v2561_v3, %v1469_v55  ;;  %v2167_v54 = vpop.f32.mrb[60].mxu1 }
 0x163   : > { %v1410_v6 = vmax.f32 %v2757_v32, %v2103_v4  ;;  %v1109_v59 = vpop.f32.mrb[61].mxu0  ;;  %v1965_v46 = vpack.c.bf16 %v1541_v30, %v1541_v30  ;;  %v1542_v33 = vmax.f32 %v1510_v2, 0.0  ;;  %v1442_v14 = vmax.f32 %v2758_v34, %v2167_v54  ;;  %v1365_v22 = vpop.f32.mrb[61].mxu1 }
 0x164   : > { %v1408_v48 = vmax.f32 %v2759_v47, %v1109_v59  ;;  %v2104_v7 = vpop.f32.mrb[62].mxu0  ;;  %v1963_v35 = vpack.c.bf16 %v1539_v5, %v1539_v5  ;;  %v1540_v49 = vmax.f32 %v1508_v31, 0.0  ;;  %v1440_v36 = vmax.f32 %v2760_v50, %v1365_v22  ;;  %v2168_v51 = vpop.f32.mrb[62].mxu1 }
 0x165   : > { %v1411_v8 = vmax.f32 %v2761_v61, %v2104_v7  ;;  %v1112_v52 = vpop.f32.mrb[63].mxu0  ;;  %1702 = vst.msk [vmem:[%s2575_s27 + $0x68] sm:$0xf] %vm1675_vm3, %v1965_v46  ;;  %v1966_v23 = vpack.c.bf16 %v1542_v33, %v1542_v33  ;;  %v1474_v37 = vmax.f32 %v1410_v6, %v1442_v14  ;;  %v1443_v15 = vmax.f32 %v2762_v24, %v2168_v51  ;;  %v1368_v58 = vpop.f32.mrb[63].mxu1 }
 0x166   : > { %v1409_v16 = vmax.f32 %v2763_v53, %v1112_v52  ;;  %1700 = vst.msk [vmem:[%s2575_s27 + $0x60] sm:$0xf] %vm1675_vm3, %v1963_v35  ;;  %v1964_v25 = vpack.c.bf16 %v1540_v49, %v1540_v49  ;;  %v1472_v26 = vmax.f32 %v1408_v48, %v1440_v36  ;;  %v1441_v62 = vmax.f32 %v2764_v9, %v1368_v58 }
 0x167   : > { %1703 = vst.msk [vmem:[%s2575_s27 + $0x6c] sm:$0xf] %vm1675_vm3, %v1966_v23  ;;  %v1513_v17 = vadd.f32 %v2561_v3, %v1474_v37  ;;  %v1475_v27 = vmax.f32 %v1411_v8, %v1443_v15 }
 0x168   : > { %1701 = vst.msk [vmem:[%s2575_s27 + $0x64] sm:$0xf] %vm1675_vm3, %v1964_v25  ;;  %v1511_v28 = vadd.f32 %v2561_v3, %v1472_v26  ;;  %v1473_v18 = vmax.f32 %v1409_v16, %v1441_v62 }
 0x169   : > { %v1545_v38 = vmax.f32 %v1513_v17, 0.0  ;;  %v1514_v10 = vadd.f32 %v2561_v3, %v1475_v27 }
 0x16a   : > { %v1543_v1 = vmax.f32 %v1511_v28, 0.0  ;;  %v1512_v29 = vadd.f32 %v2561_v3, %v1473_v18 }
 0x16b   : > { %v1969_v39 = vpack.c.bf16 %v1545_v38, %v1545_v38  ;;  %v1546_v40 = vmax.f32 %v1514_v10, 0.0 }
 0x16c   : > { %v1967_v11 = vpack.c.bf16 %v1543_v1, %v1543_v1  ;;  %v1544_v19 = vmax.f32 %v1512_v29, 0.0 }
 0x16d   : > { %1706 = vst.msk [vmem:[%s2575_s27 + $0x78] sm:$0xf] %vm1675_vm3, %v1969_v39  ;;  %v1970_v20 = vpack.c.bf16 %v1546_v40, %v1546_v40 }
 0x16e   : > { %1704 = vst.msk [vmem:[%s2575_s27 + $0x70] sm:$0xf] %vm1675_vm3, %v1967_v11  ;;  %v1968_v41 = vpack.c.bf16 %v1544_v19, %v1544_v19 }
 0x16f   : > { %1707 = vst.msk [vmem:[%s2575_s27 + $0x7c] sm:$0xf] %vm1675_vm3, %v1970_v20 }
 0x170   : > { %1705 = vst.msk [vmem:[%s2575_s27 + $0x74] sm:$0xf] %vm1675_vm3, %v1968_v41 }
 0x171 PF: > { %s13_s12 = sadd.s32 1, %s2254_s12  }
 0x172   : > { %p10_p4 = scmp.ge.s32.totalorder %s13_s12, 4  }
 0x174   :  { %12 = sbr.rel (!%p10_p4) target bundleno = 1 (0x1), region = 62 }

// kernel: encoder_forward.5
= control target key start
LH: loop header
LB: loop body
LE: loop exit
PB: predicated region body
PF: predicated region fallthrough
CT: control target
= control target key end

     0   :  { %s2386_s1 = inlined_call_operand.vmem [shape: bf16[2048,128], index: 1, kind: input, shape index: {}]   ;;  %s2387_s0 = inlined_call_operand.vmem [shape: bf16[16,2048], index: 0, kind: input, shape index: {}]   ;;  %s2388_s2 = inlined_call_operand.vmem [shape: f32[1,128], index: 2, kind: input, shape index: {}]   ;;  %s2389_s3 = inlined_call_operand.vmem [shape: f32[16,128], index: 3, kind: output, shape index: {}]  }
   0x1   :  { %v1797_v0 = vld [vmem:[%s2386_s1 + $0x40] sm:$0xff]   ;;  %v1801_v4 = vld [vmem:[%s2386_s1 + $0x48] sm:$0xff]   ;;  %v1805_v8 = vld [vmem:[%s2386_s1 + $0x50] sm:$0xff]  }
   0x2   :  { %v1798_v1 = vld [vmem:[%s2386_s1 + $0xc0] sm:$0xff]   ;;  %1621 = vmatprep.subr.bf16.mxu0 %v1797_v0  ;;  %v1802_v5 = vld [vmem:[%s2386_s1 + $0xc8] sm:$0xff]   ;;  %v1806_v9 = vld [vmem:[%s2386_s1 + $0xd0] sm:$0xff]  }
   0x3   :  { %v1799_v2 = vld [vmem:[%s2386_s1] sm:$0xff]   ;;  %1643 = vmatprep.subr.bf16.mxu1 %v1798_v1  ;;  %v1803_v6 = vld [vmem:[%s2386_s1 + $0x8] sm:$0xff]   ;;  %v1807_v10 = vld [vmem:[%s2386_s1 + $0x10] sm:$0xff]  }
   0x4   :  { %v1800_v3 = vld [vmem:[%s2386_s1 + $0x80] sm:$0xff]   ;;  %1622 = vmatpush3.bf16.msra.mxu0 %v1799_v2  ;;  %v1804_v7 = vld [vmem:[%s2386_s1 + $0x88] sm:$0xff]   ;;  %v1808_v11 = vld [vmem:[%s2386_s1 + $0x90] sm:$0xff]  }
   0x5   :  { %1644 = vmatpush3.bf16.msra.mxu1 %v1800_v3  ;;  %1623 = vmatprep.subr.bf16.mxu0 %v1801_v4  ;;  %v1809_v12 = vld [vmem:[%s2386_s1 + $0x58] sm:$0xff]   ;;  %v1813_v16 = vld [vmem:[%s2386_s1 + $0x60] sm:$0xff]   ;;  %v1817_v20 = vld [vmem:[%s2386_s1 + $0x68] sm:$0xff]  }
   0x6   :  { %1645 = vmatprep.subr.bf16.mxu1 %v1802_v5  ;;  %v1810_v13 = vld [vmem:[%s2386_s1 + $0xd8] sm:$0xff]   ;;  %v1814_v17 = vld [vmem:[%s2386_s1 + $0xe0] sm:$0xff]   ;;  %v1818_v21 = vld [vmem:[%s2386_s1 + $0xe8] sm:$0xff]  }
   0x7   :  { %v1811_v14 = vld [vmem:[%s2386_s1 + $0x18] sm:$0xff]   ;;  %v1815_v18 = vld [vmem:[%s2386_s1 + $0x20] sm:$0xff]   ;;  %v1819_v22 = vld [vmem:[%s2386_s1 + $0x28] sm:$0xff]  }
   0x8   :  { %1624 = vmatpush3.bf16.msra.mxu0 %v1803_v6  ;;  %v1812_v15 = vld [vmem:[%s2386_s1 + $0x98] sm:$0xff]   ;;  %v1816_v19 = vld [vmem:[%s2386_s1 + $0xa0] sm:$0xff]   ;;  %v1820_v23 = vld [vmem:[%s2386_s1 + $0xa8] sm:$0xff]  }
   0x9   :  { %1646 = vmatpush3.bf16.msra.mxu1 %v1804_v7  ;;  %1625 = vmatprep.subr.bf16.mxu0 %v1805_v8  ;;  %v1821_v24 = vld [vmem:[%s2386_s1 + $0x70] sm:$0xff]   ;;  %v1825_v28 = vld [vmem:[%s2386_s1 + $0x78] sm:$0xff]   ;;  %v15_v32 = vld [vmem:[%s2387_s0] sm:$0xff] }
   0xa   :  { %1647 = vmatprep.subr.bf16.mxu1 %v1806_v9  ;;  %v1822_v25 = vld [vmem:[%s2386_s1 + $0xf0] sm:$0xff]   ;;  %v1826_v29 = vld [vmem:[%s2386_s1 + $0xf8] sm:$0xff]   ;;  %v23_v33 = vld [vmem:[%s2387_s0 + $0x40] sm:$0xff] }
   0xb   :  { %v1823_v26 = vld [vmem:[%s2386_s1 + $0x30] sm:$0xff]   ;;  %v1827_v30 = vld [vmem:[%s2386_s1 + $0x38] sm:$0xff]   ;;  %v16_v34 = vld [vmem:[%s2387_s0 + $0x8] sm:$0xff]  ;;  %v1477_v35 = vcombine.low %v15_v32, %v23_v33  ;;  %v1478_v36 = vcombine.high %v15_v32, %v23_v33 }
   0xc   :  { %1626 = vmatpush3.bf16.msra.mxu0 %v1807_v10  ;;  %v1824_v27 = vld [vmem:[%s2386_s1 + $0xb0] sm:$0xff]   ;;  %v1828_v31 = vld [vmem:[%s2386_s1 + $0xb8] sm:$0xff]   ;;  %v24_v37 = vld [vmem:[%s2387_s0 + $0x48] sm:$0xff] }
   0xd   :  { %1648 = vmatpush3.bf16.msra.mxu1 %v1808_v11  ;;  %1627 = vmatprep.subr.bf16.mxu0 %v1809_v12  ;;  %v1479_v38 = vcombine.low %v16_v34, %v24_v37  ;;  %v1480_v39 = vcombine.high %v16_v34, %v24_v37  ;;  %v1829_v40 = vld [vmem:[%s2386_s1 + $0x140] sm:$0xff]   ;;  %v1833_v44 = vld [vmem:[%s2386_s1 + $0x148] sm:$0xff]   ;;  %v1837_v48 = vld [vmem:[%s2386_s1 + $0x150] sm:$0xff]  }
   0xe   :  { %1649 = vmatprep.subr.bf16.mxu1 %v1810_v13  ;;  %1174 = vmatprep.mubr.bf16.mxu0 %v1478_v36  ;;  %v1830_v41 = vld [vmem:[%s2386_s1 + $0x1c0] sm:$0xff]   ;;  %v1834_v45 = vld [vmem:[%s2386_s1 + $0x1c8] sm:$0xff]   ;;  %v1838_v49 = vld [vmem:[%s2386_s1 + $0x1d0] sm:$0xff]  }
   0xf   :  { %1215 = vmatprep.mubr.bf16.mxu1 %v1480_v39  ;;  %v1831_v42 = vld [vmem:[%s2386_s1 + $0x100] sm:$0xff]   ;;  %v1835_v46 = vld [vmem:[%s2386_s1 + $0x108] sm:$0xff]   ;;  %v1839_v50 = vld [vmem:[%s2386_s1 + $0x110] sm:$0xff]  }
  0x10   :  { %1628 = vmatpush3.bf16.msra.mxu0 %v1811_v14  ;;  %v1832_v43 = vld [vmem:[%s2386_s1 + $0x180] sm:$0xff]   ;;  %v1836_v47 = vld [vmem:[%s2386_s1 + $0x188] sm:$0xff]   ;;  %v1840_v51 = vld [vmem:[%s2386_s1 + $0x190] sm:$0xff]  }
  0x11   :  { %1650 = vmatpush3.bf16.msra.mxu1 %v1812_v15  ;;  %1629 = vmatprep.subr.bf16.mxu0 %v1813_v16  ;;  %v1841_v52 = vld [vmem:[%s2386_s1 + $0x158] sm:$0xff]   ;;  %v1845_v56 = vld [vmem:[%s2386_s1 + $0x160] sm:$0xff]   ;;  %v1849_v60 = vld [vmem:[%s2386_s1 + $0x168] sm:$0xff]  }
  0x12   :  { %1651 = vmatprep.subr.bf16.mxu1 %v1814_v17  ;;  %v1842_v53 = vld [vmem:[%s2386_s1 + $0x1d8] sm:$0xff]   ;;  %v1846_v57 = vld [vmem:[%s2386_s1 + $0x1e0] sm:$0xff]   ;;  %v1850_v61 = vld [vmem:[%s2386_s1 + $0x1e8] sm:$0xff]  }
  0x13   :  { %v1843_v54 = vld [vmem:[%s2386_s1 + $0x118] sm:$0xff]   ;;  %v1847_v58 = vld [vmem:[%s2386_s1 + $0x120] sm:$0xff]   ;;  %v1851_v62 = vld [vmem:[%s2386_s1 + $0x128] sm:$0xff]  }
  0x14   :  { %1630 = vmatpush3.bf16.msra.mxu0 %v1815_v18  ;;  %v1844_v55 = vld [vmem:[%s2386_s1 + $0x198] sm:$0xff]   ;;  %v1848_v59 = vld [vmem:[%s2386_s1 + $0x1a0] sm:$0xff]   ;;  %v1852_v63 = vld [vmem:[%s2386_s1 + $0x1a8] sm:$0xff]  }
  0x15   :  { %1652 = vmatpush3.bf16.msra.mxu1 %v1816_v19  ;;  %1631 = vmatprep.subr.bf16.mxu0 %v1817_v20  ;;  %v1853_v0 = vld [vmem:[%s2386_s1 + $0x170] sm:$0xff]   ;;  %v1857_v4 = vld [vmem:[%s2386_s1 + $0x178] sm:$0xff]   ;;  %v1861_v16 = vld [vmem:[%s2386_s1 + $0x240] sm:$0xff]  }
  0x16   :  { %1653 = vmatprep.subr.bf16.mxu1 %v1818_v21  ;;  %v1854_v1 = vld [vmem:[%s2386_s1 + $0x1f0] sm:$0xff]   ;;  %v1858_v5 = vld [vmem:[%s2386_s1 + $0x1f8] sm:$0xff]   ;;  %v1862_v17 = vld [vmem:[%s2386_s1 + $0x2c0] sm:$0xff]  }
  0x17   :  { %v1855_v2 = vld [vmem:[%s2386_s1 + $0x130] sm:$0xff]   ;;  %v1859_v6 = vld [vmem:[%s2386_s1 + $0x138] sm:$0xff]   ;;  %v1863_v18 = vld [vmem:[%s2386_s1 + $0x200] sm:$0xff]  }
  0x18   :  { %1632 = vmatpush3.bf16.msra.mxu0 %v1819_v22  ;;  %v1856_v3 = vld [vmem:[%s2386_s1 + $0x1b0] sm:$0xff]   ;;  %v1860_v7 = vld [vmem:[%s2386_s1 + $0x1b8] sm:$0xff]   ;;  %v1864_v19 = vld [vmem:[%s2386_s1 + $0x280] sm:$0xff]  }
  0x19   :  { %1654 = vmatpush3.bf16.msra.mxu1 %v1820_v23  ;;  %1633 = vmatprep.subr.bf16.mxu0 %v1821_v24  ;;  %v17_v8 = vld [vmem:[%s2387_s0 + $0x10] sm:$0xff]  ;;  %v18_v12 = vld [vmem:[%s2387_s0 + $0x18] sm:$0xff]  ;;  %v1865_v20 = vld [vmem:[%s2386_s1 + $0x248] sm:$0xff]  }
  0x1a   :  { %1655 = vmatprep.subr.bf16.mxu1 %v1822_v25  ;;  %v25_v9 = vld [vmem:[%s2387_s0 + $0x50] sm:$0xff]  ;;  %v26_v13 = vld [vmem:[%s2387_s0 + $0x58] sm:$0xff]  ;;  %v1866_v21 = vld [vmem:[%s2386_s1 + $0x2c8] sm:$0xff]  }
  0x1b   :  { %v1481_v10 = vcombine.low %v17_v8, %v25_v9  ;;  %v1482_v11 = vcombine.high %v17_v8, %v25_v9  ;;  %v1483_v14 = vcombine.low %v18_v12, %v26_v13  ;;  %v1484_v15 = vcombine.high %v18_v12, %v26_v13  ;;  %v1867_v22 = vld [vmem:[%s2386_s1 + $0x208] sm:$0xff]   ;;  %v1869_v24 = vld [vmem:[%s2386_s1 + $0x250] sm:$0xff]   ;;  %v1877_v32 = vld [vmem:[%s2386_s1 + $0x260] sm:$0xff]  }
  0x1c   :  { %1634 = vmatpush3.bf16.msra.mxu0 %v1823_v26  ;;  %v1868_v23 = vld [vmem:[%s2386_s1 + $0x288] sm:$0xff]   ;;  %v1870_v25 = vld [vmem:[%s2386_s1 + $0x2d0] sm:$0xff]   ;;  %v1878_v33 = vld [vmem:[%s2386_s1 + $0x2e0] sm:$0xff]  }
  0x1d   :  { %1656 = vmatpush3.bf16.msra.mxu1 %v1824_v27  ;;  %1635 = vmatprep.subr.bf16.mxu0 %v1825_v28  ;;  %v1871_v26 = vld [vmem:[%s2386_s1 + $0x210] sm:$0xff]   ;;  %v1873_v28 = vld [vmem:[%s2386_s1 + $0x258] sm:$0xff]   ;;  %v1879_v34 = vld [vmem:[%s2386_s1 + $0x220] sm:$0xff]  }
  0x1e   :  { %1657 = vmatprep.subr.bf16.mxu1 %v1826_v29  ;;  %v1872_v27 = vld [vmem:[%s2386_s1 + $0x290] sm:$0xff]   ;;  %v1874_v29 = vld [vmem:[%s2386_s1 + $0x2d8] sm:$0xff]   ;;  %v1881_v36 = vld [vmem:[%s2386_s1 + $0x268] sm:$0xff]  }
  0x1f   :  { %v1882_v37 = vld [vmem:[%s2386_s1 + $0x2e8] sm:$0xff]   ;;  %v1909_v8 = vld [vmem:[%s2386_s1 + $0x360] sm:$0xff]  }
  0x20   :  { %1636 = vmatpush3.bf16.msra.mxu0 %v1827_v30  ;;  %v1875_v30 = vld [vmem:[%s2386_s1 + $0x218] sm:$0xff]   ;;  %v1884_v39 = vld [vmem:[%s2386_s1 + $0x2a8] sm:$0xff]   ;;  %v1910_v9 = vld [vmem:[%s2386_s1 + $0x3e0] sm:$0xff]  }
  0x21   :  { %1658 = vmatpush3.bf16.msra.mxu1 %v1828_v31  ;;  %1665 = vmatprep.subr.bf16.mxu0 %v1829_v40  ;;  %v1876_v31 = vld [vmem:[%s2386_s1 + $0x298] sm:$0xff]   ;;  %v1885_v40 = vld [vmem:[%s2386_s1 + $0x270] sm:$0xff]   ;;  %v1913_v12 = vld [vmem:[%s2386_s1 + $0x368] sm:$0xff]  }
  0x22   :  { %1687 = vmatprep.subr.bf16.mxu1 %v1830_v41  ;;  %v1886_v41 = vld [vmem:[%s2386_s1 + $0x2f0] sm:$0xff]   ;;  %v1914_v13 = vld [vmem:[%s2386_s1 + $0x3e8] sm:$0xff]  }
  0x23   :  { %1175 = vmatmul.mubr.bf16.vlgmr.msra.gmra.mrb[0].mxu0 %v1477_v35  ;;  %v1880_v35 = vld [vmem:[%s2386_s1 + $0x2a0] sm:$0xff]  }
  0x24   :  { %1216 = vmatmul.mubr.bf16.vlgmr.msra.gmra.mrb[0].mxu1 %v1479_v38  ;;  %1666 = vmatpush3.bf16.msra.mxu0 %v1831_v42  ;;  %v1883_v38 = vld [vmem:[%s2386_s1 + $0x228] sm:$0xff]   ;;  %v1887_v42 = vld [vmem:[%s2386_s1 + $0x230] sm:$0xff]  }
  0x25   :  { %1688 = vmatpush3.bf16.msra.mxu1 %v1832_v43  ;;  %1667 = vmatprep.subr.bf16.mxu0 %v1833_v44  ;;  %v1888_v43 = vld [vmem:[%s2386_s1 + $0x2b0] sm:$0xff]   ;;  %v1889_v44 = vld [vmem:[%s2386_s1 + $0x278] sm:$0xff]  }
  0x26   :  { %1689 = vmatprep.subr.bf16.mxu1 %v1834_v45  ;;  %1256 = vmatprep.mubr.bf16.mxu0 %v1482_v11  ;;  %v1890_v45 = vld [vmem:[%s2386_s1 + $0x2f8] sm:$0xff]   ;;  %v1912_v11 = vld [vmem:[%s2386_s1 + $0x3a0] sm:$0xff]  }
  0x27   :  { %1297 = vmatprep.mubr.bf16.mxu1 %v1484_v15  ;;  %v1916_v15 = vld [vmem:[%s2386_s1 + $0x3a8] sm:$0xff]  }
  0x28   :  { %1668 = vmatpush3.bf16.msra.mxu0 %v1835_v46  ;;  %v1891_v46 = vld [vmem:[%s2386_s1 + $0x238] sm:$0xff]  }
  0x29   :  { %1690 = vmatpush3.bf16.msra.mxu1 %v1836_v47  ;;  %1669 = vmatprep.subr.bf16.mxu0 %v1837_v48  ;;  %v1892_v47 = vld [vmem:[%s2386_s1 + $0x2b8] sm:$0xff]   ;;  %v19_v48 = vld [vmem:[%s2387_s0 + $0x20] sm:$0xff] }
  0x2a   :  { %1691 = vmatprep.subr.bf16.mxu1 %v1838_v49  ;;  %v27_v49 = vld [vmem:[%s2387_s0 + $0x60] sm:$0xff] }
  0x2c   :  { %1670 = vmatpush3.bf16.msra.mxu0 %v1839_v50  ;;  %v20_v50 = vld [vmem:[%s2387_s0 + $0x28] sm:$0xff] }
  0x2d   :  { %1692 = vmatpush3.bf16.msra.mxu1 %v1840_v51  ;;  %1671 = vmatprep.subr.bf16.mxu0 %v1841_v52  ;;  %v28_v51 = vld [vmem:[%s2387_s0 + $0x68] sm:$0xff]  ;;  %v1485_v52 = vcombine.low %v19_v48, %v27_v49 }
  0x2e   :  { %1693 = vmatprep.subr.bf16.mxu1 %v1842_v53  ;;  %v1486_v53 = vcombine.high %v19_v48, %v27_v49 }
  0x30   :  { %1672 = vmatpush3.bf16.msra.mxu0 %v1843_v54  ;;  %v1487_v54 = vcombine.low %v20_v50, %v28_v51 }
  0x31   :  { %1694 = vmatpush3.bf16.msra.mxu1 %v1844_v55  ;;  %1673 = vmatprep.subr.bf16.mxu0 %v1845_v56  ;;  %v1488_v55 = vcombine.high %v20_v50, %v28_v51  ;;  %v1893_v56 = vld [vmem:[%s2386_s1 + $0x340] sm:$0xff]  }
  0x32   :  { %1695 = vmatprep.subr.bf16.mxu1 %v1846_v57  ;;  %v1894_v57 = vld [vmem:[%s2386_s1 + $0x3c0] sm:$0xff]  }
  0x34   :  { %1674 = vmatpush3.bf16.msra.mxu0 %v1847_v58  ;;  %v1895_v58 = vld [vmem:[%s2386_s1 + $0x300] sm:$0xff]  }
  0x35   :  { %1696 = vmatpush3.bf16.msra.mxu1 %v1848_v59  ;;  %1675 = vmatprep.subr.bf16.mxu0 %v1849_v60  ;;  %v1896_v59 = vld [vmem:[%s2386_s1 + $0x380] sm:$0xff]   ;;  %v1897_v60 = vld [vmem:[%s2386_s1 + $0x348] sm:$0xff]  }
  0x36   :  { %1697 = vmatprep.subr.bf16.mxu1 %v1850_v61  ;;  %v1898_v61 = vld [vmem:[%s2386_s1 + $0x3c8] sm:$0xff]  }
  0x38   :  { %1676 = vmatpush3.bf16.msra.mxu0 %v1851_v62  ;;  %v1899_v62 = vld [vmem:[%s2386_s1 + $0x308] sm:$0xff]  }
  0x39   :  { %1698 = vmatpush3.bf16.msra.mxu1 %v1852_v63  ;;  %1677 = vmatprep.subr.bf16.mxu0 %v1853_v0  ;;  %v1900_v63 = vld [vmem:[%s2386_s1 + $0x388] sm:$0xff]   ;;  %v1901_v0 = vld [vmem:[%s2386_s1 + $0x350] sm:$0xff]  }
  0x3a   :  { %1699 = vmatprep.subr.bf16.mxu1 %v1854_v1  ;;  %v1902_v1 = vld [vmem:[%s2386_s1 + $0x3d0] sm:$0xff]  }
  0x3c   :  { %1678 = vmatpush3.bf16.msra.mxu0 %v1855_v2  ;;  %v1903_v2 = vld [vmem:[%s2386_s1 + $0x310] sm:$0xff]  }
  0x3d   :  { %1700 = vmatpush3.bf16.msra.mxu1 %v1856_v3  ;;  %1679 = vmatprep.subr.bf16.mxu0 %v1857_v4  ;;  %v1904_v3 = vld [vmem:[%s2386_s1 + $0x390] sm:$0xff]   ;;  %v1905_v4 = vld [vmem:[%s2386_s1 + $0x358] sm:$0xff]  }
  0x3e   :  { %1701 = vmatprep.subr.bf16.mxu1 %v1858_v5  ;;  %v1906_v5 = vld [vmem:[%s2386_s1 + $0x3d8] sm:$0xff]  }
  0x40   :  { %1680 = vmatpush3.bf16.msra.mxu0 %v1859_v6  ;;  %v1907_v6 = vld [vmem:[%s2386_s1 + $0x318] sm:$0xff]  }
  0x41   :  { %1702 = vmatpush3.bf16.msra.mxu1 %v1860_v7  ;;  %1709 = vmatprep.subr.bf16.mxu0 %v1861_v16  ;;  %v1908_v7 = vld [vmem:[%s2386_s1 + $0x398] sm:$0xff]   ;;  %v1917_v16 = vld [vmem:[%s2386_s1 + $0x370] sm:$0xff]  }
  0x42   :  { %1731 = vmatprep.subr.bf16.mxu1 %v1862_v17  ;;  %v1918_v17 = vld [vmem:[%s2386_s1 + $0x3f0] sm:$0xff]  }
  0x43   :  { %1257 = vmatmul.mubr.bf16.vlgmr.msra.gmra.mrb[4].mxu0 %v1481_v10  ;;  %v1911_v10 = vld [vmem:[%s2386_s1 + $0x320] sm:$0xff]  }
  0x44   :  { %1298 = vmatmul.mubr.bf16.vlgmr.msra.gmra.mrb[4].mxu1 %v1483_v14  ;;  %1710 = vmatpush3.bf16.msra.mxu0 %v1863_v18  ;;  %v1915_v14 = vld [vmem:[%s2386_s1 + $0x328] sm:$0xff]   ;;  %v1919_v18 = vld [vmem:[%s2386_s1 + $0x330] sm:$0xff]  }
  0x45   :  { %1732 = vmatpush3.bf16.msra.mxu1 %v1864_v19  ;;  %1711 = vmatprep.subr.bf16.mxu0 %v1865_v20  ;;  %v1920_v19 = vld [vmem:[%s2386_s1 + $0x3b0] sm:$0xff]   ;;  %v1921_v20 = vld [vmem:[%s2386_s1 + $0x378] sm:$0xff]  }
  0x46   :  { %1733 = vmatprep.subr.bf16.mxu1 %v1866_v21  ;;  %1338 = vmatprep.mubr.bf16.mxu0 %v1486_v53  ;;  %v1922_v21 = vld [vmem:[%s2386_s1 + $0x3f8] sm:$0xff]  }
  0x47   :  { %1379 = vmatprep.mubr.bf16.mxu1 %v1488_v55 }
  0x48   :  { %1712 = vmatpush3.bf16.msra.mxu0 %v1867_v22  ;;  %v1923_v22 = vld [vmem:[%s2386_s1 + $0x338] sm:$0xff]  }
  0x49   :  { %1734 = vmatpush3.bf16.msra.mxu1 %v1868_v23  ;;  %1713 = vmatprep.subr.bf16.mxu0 %v1869_v24  ;;  %v1924_v23 = vld [vmem:[%s2386_s1 + $0x3b8] sm:$0xff]   ;;  %v21_v24 = vld [vmem:[%s2387_s0 + $0x30] sm:$0xff] }
  0x4a   :  { %1735 = vmatprep.subr.bf16.mxu1 %v1870_v25  ;;  %v29_v25 = vld [vmem:[%s2387_s0 + $0x70] sm:$0xff] }
  0x4c   :  { %1714 = vmatpush3.bf16.msra.mxu0 %v1871_v26  ;;  %v22_v26 = vld [vmem:[%s2387_s0 + $0x38] sm:$0xff] }
  0x4d   :  { %1736 = vmatpush3.bf16.msra.mxu1 %v1872_v27  ;;  %1715 = vmatprep.subr.bf16.mxu0 %v1873_v28  ;;  %v1489_v27 = vcombine.low %v21_v24, %v29_v25  ;;  %v1490_v28 = vcombine.high %v21_v24, %v29_v25 }
  0x4e   :  { %1737 = vmatprep.subr.bf16.mxu1 %v1874_v29  ;;  %v30_v29 = vld [vmem:[%s2387_s0 + $0x78] sm:$0xff] }
  0x50   :  { %1716 = vmatpush3.bf16.msra.mxu0 %v1875_v30  ;;  %v1491_v30 = vcombine.low %v22_v26, %v30_v29 }
  0x51   :  { %1738 = vmatpush3.bf16.msra.mxu1 %v1876_v31  ;;  %1717 = vmatprep.subr.bf16.mxu0 %v1877_v32  ;;  %v1492_v31 = vcombine.high %v22_v26, %v30_v29 }
  0x52   :  { %1739 = vmatprep.subr.bf16.mxu1 %v1878_v33 }
  0x54   :  { %1718 = vmatpush3.bf16.msra.mxu0 %v1879_v34  ;;  %v1476_v34 = vld [vmem:[%s2388_s2] ss:$0 sm:$0xff] }
  0x55   :  { %1740 = vmatpush3.bf16.msra.mxu1 %v1880_v35  ;;  %1719 = vmatprep.subr.bf16.mxu0 %v1881_v36 }
  0x56   :  { %1741 = vmatprep.subr.bf16.mxu1 %v1882_v37 }
  0x58   :  { %1720 = vmatpush3.bf16.msra.mxu0 %v1883_v38 }
  0x59   :  { %1742 = vmatpush3.bf16.msra.mxu1 %v1884_v39  ;;  %1721 = vmatprep.subr.bf16.mxu0 %v1885_v40 }
  0x5a   :  { %1743 = vmatprep.subr.bf16.mxu1 %v1886_v41 }
  0x5c   :  { %1722 = vmatpush3.bf16.msra.mxu0 %v1887_v42 }
  0x5d   :  { %1744 = vmatpush3.bf16.msra.mxu1 %v1888_v43  ;;  %1723 = vmatprep.subr.bf16.mxu0 %v1889_v44 }
  0x5e   :  { %1745 = vmatprep.subr.bf16.mxu1 %v1890_v45 }
  0x60   :  { %1724 = vmatpush3.bf16.msra.mxu0 %v1891_v46 }
  0x61   :  { %1746 = vmatpush3.bf16.msra.mxu1 %v1892_v47  ;;  %1753 = vmatprep.subr.bf16.mxu0 %v1893_v56 }
  0x62   :  { %1775 = vmatprep.subr.bf16.mxu1 %v1894_v57 }
  0x63   :  { %1339 = vmatmul.mubr.bf16.vlgmr.msra.gmra.mrb[8].mxu0 %v1485_v52 }
  0x64   :  { %1380 = vmatmul.mubr.bf16.vlgmr.msra.gmra.mrb[8].mxu1 %v1487_v54  ;;  %1754 = vmatpush3.bf16.msra.mxu0 %v1895_v58 }
  0x65   :  { %1776 = vmatpush3.bf16.msra.mxu1 %v1896_v59  ;;  %1755 = vmatprep.subr.bf16.mxu0 %v1897_v60 }
  0x66   :  { %1777 = vmatprep.subr.bf16.mxu1 %v1898_v61  ;;  %1420 = vmatprep.mubr.bf16.mxu0 %v1490_v28 }
  0x67   :  { %1461 = vmatprep.mubr.bf16.mxu1 %v1492_v31 }
  0x68   :  { %1756 = vmatpush3.bf16.msra.mxu0 %v1899_v62 }
  0x69   :  { %1778 = vmatpush3.bf16.msra.mxu1 %v1900_v63  ;;  %1757 = vmatprep.subr.bf16.mxu0 %v1901_v0 }
  0x6a   :  { %1779 = vmatprep.subr.bf16.mxu1 %v1902_v1 }
  0x6c   :  { %1758 = vmatpush3.bf16.msra.mxu0 %v1903_v2 }
  0x6d   :  { %1780 = vmatpush3.bf16.msra.mxu1 %v1904_v3  ;;  %1759 = vmatprep.subr.bf16.mxu0 %v1905_v4 }
  0x6e   :  { %1781 = vmatprep.subr.bf16.mxu1 %v1906_v5 }
  0x70   :  { %1760 = vmatpush3.bf16.msra.mxu0 %v1907_v6 }
  0x71   :  { %1782 = vmatpush3.bf16.msra.mxu1 %v1908_v7  ;;  %1761 = vmatprep.subr.bf16.mxu0 %v1909_v8 }
  0x72   :  { %1783 = vmatprep.subr.bf16.mxu1 %v1910_v9 }
  0x74   :  { %1762 = vmatpush3.bf16.msra.mxu0 %v1911_v10 }
  0x75   :  { %1784 = vmatpush3.bf16.msra.mxu1 %v1912_v11  ;;  %1763 = vmatprep.subr.bf16.mxu0 %v1913_v12 }
  0x76   :  { %1785 = vmatprep.subr.bf16.mxu1 %v1914_v13 }
  0x78   :  { %1764 = vmatpush3.bf16.msra.mxu0 %v1915_v14 }
  0x79   :  { %1786 = vmatpush3.bf16.msra.mxu1 %v1916_v15  ;;  %1765 = vmatprep.subr.bf16.mxu0 %v1917_v16 }
  0x7a   :  { %1787 = vmatprep.subr.bf16.mxu1 %v1918_v17 }
  0x7c   :  { %1766 = vmatpush3.bf16.msra.mxu0 %v1919_v18 }
  0x7d   :  { %1788 = vmatpush3.bf16.msra.mxu1 %v1920_v19  ;;  %1767 = vmatprep.subr.bf16.mxu0 %v1921_v20 }
  0x7e   :  { %1789 = vmatprep.subr.bf16.mxu1 %v1922_v21 }
  0x80   :  { %1768 = vmatpush3.bf16.msra.mxu0 %v1923_v22 }
  0x81   :  { %1790 = vmatpush3.bf16.msra.mxu1 %v1924_v23 }
  0x83   :  { %1421 = vmatmul.mubr.bf16.vlgmr.msra.gmra.mrb[12].mxu0 %v1489_v27 }
  0x84   :  { %1462 = vmatmul.mubr.bf16.vlgmr.msra.gmra.mrb[12].mxu1 %v1491_v30 }
  0xf6   :  { %v1637_v32 = vpop.f32.mrb[0].mxu0 }
  0xf7   :  { %v1659_v33 = vpop.f32.mrb[0].mxu1  ;;  %v1638_v35 = vpop.f32.mrb[1].mxu0 }
  0xf8   :  { %v1639_v36 = vadd.f32 %v1638_v35, %v1637_v32  ;;  %v1660_v37 = vpop.f32.mrb[1].mxu1  ;;  %v1640_v38 = vpop.f32.mrb[2].mxu0 }
  0xf9   :  { %v1661_v39 = vadd.f32 %v1660_v37, %v1659_v33  ;;  %v1662_v40 = vpop.f32.mrb[2].mxu1  ;;  %v1641_v41 = vpop.f32.mrb[3].mxu0 }
  0xfa   :  { %v1177_v42 = vadd.f32 %v1639_v36, %v1476_v34  ;;  %v1642_v43 = vadd.f32 %v1641_v41, %v1640_v38  ;;  %v1663_v44 = vpop.f32.mrb[3].mxu1 }
  0xfb   :  { %v1664_v45 = vadd.f32 %v1663_v44, %v1662_v40 }
  0xfc   :  { %v1218_v46 = vadd.f32 %v1661_v39, %v1177_v42  ;;  %v1180_v47 = vadd.f32 %v1642_v43, %v1476_v34 }
  0xfe   :  { %v1221_v48 = vadd.f32 %v1664_v45, %v1180_v47 }
 0x116   :  { %v1681_v49 = vpop.f32.mrb[4].mxu0 }
 0x117   :  { %v1703_v50 = vpop.f32.mrb[4].mxu1  ;;  %v1682_v51 = vpop.f32.mrb[5].mxu0 }
 0x118   :  { %v1683_v52 = vadd.f32 %v1682_v51, %v1681_v49  ;;  %v1704_v53 = vpop.f32.mrb[5].mxu1  ;;  %v1684_v54 = vpop.f32.mrb[6].mxu0 }
 0x119   :  { %v1705_v55 = vadd.f32 %v1704_v53, %v1703_v50  ;;  %v1706_v56 = vpop.f32.mrb[6].mxu1  ;;  %v1685_v57 = vpop.f32.mrb[7].mxu0 }
 0x11a   :  { %v1259_v58 = vadd.f32 %v1683_v52, %v1218_v46  ;;  %v1686_v59 = vadd.f32 %v1685_v57, %v1684_v54  ;;  %v1707_v60 = vpop.f32.mrb[7].mxu1 }
 0x11b   :  { %v1708_v61 = vadd.f32 %v1707_v60, %v1706_v56 }
 0x11c   :  { %v1300_v62 = vadd.f32 %v1705_v55, %v1259_v58  ;;  %v1262_v63 = vadd.f32 %v1686_v59, %v1221_v48 }
 0x11e   :  { %v1303_v0 = vadd.f32 %v1708_v61, %v1262_v63 }
 0x136   :  { %v1725_v1 = vpop.f32.mrb[8].mxu0 }
 0x137   :  { %v1747_v2 = vpop.f32.mrb[8].mxu1  ;;  %v1726_v3 = vpop.f32.mrb[9].mxu0 }
 0x138   :  { %v1748_v4 = vpop.f32.mrb[9].mxu1  ;;  %v1727_v5 = vadd.f32 %v1726_v3, %v1725_v1  ;;  %v1728_v7 = vpop.f32.mrb[10].mxu0 }
 0x139   :  { %v1749_v6 = vadd.f32 %v1748_v4, %v1747_v2  ;;  %v1750_v8 = vpop.f32.mrb[10].mxu1  ;;  %v1729_v9 = vpop.f32.mrb[11].mxu0 }
 0x13a   :  { %v1751_v10 = vpop.f32.mrb[11].mxu1  ;;  %v1341_v11 = vadd.f32 %v1727_v5, %v1300_v62  ;;  %v1730_v12 = vadd.f32 %v1729_v9, %v1728_v7 }
 0x13b   :  { %v1752_v13 = vadd.f32 %v1751_v10, %v1750_v8 }
 0x13c   :  { %v1382_v14 = vadd.f32 %v1749_v6, %v1341_v11  ;;  %v1344_v15 = vadd.f32 %v1730_v12, %v1303_v0 }
 0x13e   :  { %v1385_v16 = vadd.f32 %v1752_v13, %v1344_v15 }
 0x156   :  { %v1769_v17 = vpop.f32.mrb[12].mxu0 }
 0x157   :  { %v1791_v18 = vpop.f32.mrb[12].mxu1  ;;  %v1770_v19 = vpop.f32.mrb[13].mxu0 }
 0x158   :  { %v1771_v20 = vadd.f32 %v1770_v19, %v1769_v17  ;;  %v1792_v21 = vpop.f32.mrb[13].mxu1  ;;  %v1772_v22 = vpop.f32.mrb[14].mxu0 }
 0x159   :  { %v1793_v23 = vadd.f32 %v1792_v21, %v1791_v18  ;;  %v1794_v24 = vpop.f32.mrb[14].mxu1  ;;  %v1773_v25 = vpop.f32.mrb[15].mxu0 }
 0x15a   :  { %v1423_v26 = vadd.f32 %v1771_v20, %v1382_v14  ;;  %v1774_v27 = vadd.f32 %v1773_v25, %v1772_v22  ;;  %v1795_v28 = vpop.f32.mrb[15].mxu1 }
 0x15b   :  { %v1796_v29 = vadd.f32 %v1795_v28, %v1794_v24 }
 0x15c   :  { %v1464_v30 = vadd.f32 %v1793_v23, %v1423_v26  ;;  %v1426_v31 = vadd.f32 %v1774_v27, %v1385_v16 }
 0x15e   :  { %1470 = vst [vmem:[%s2389_s3] sm:$0xff] %v1464_v30  ;;  %v1467_v32 = vadd.f32 %v1796_v29, %v1426_v31 }
 0x160   :  { %1471 = vst [vmem:[%s2389_s3 + $0x8] sm:$0xff] %v1467_v32 }

// kernel: encoder_forward.4
= control target key start
LH: loop header
LB: loop body
LE: loop exit
PB: predicated region body
PF: predicated region fallthrough
CT: control target
= control target key end

     0   :  { %s7701_s12 = smov 0   ;;  %s9764_s0 = inlined_call_operand.vmem [shape: bf16[2,18,18,16], index: 0, kind: input, shape index: {}]   ;;  %s9765_s1 = inlined_call_operand.vmem [shape: bf16[3,3,16,32], index: 1, kind: input, shape index: {}]   ;;  %s9766_s2 = inlined_call_operand.vmem [shape: f32[1,32], index: 2, kind: input, shape index: {}]   ;;  %s9767_s3 = inlined_call_operand.vmem [shape: bf16[2,64,32], index: 3, kind: output, shape index: {}]  }
   0x1 LB: > { %s6072_s13 = sadd.s32 4294967295, %s7678_s12   ;;  %p6076_p0 = scmp.ge.s32.totalorder %s7678_s12, 1  ;;  %s7678_s12 = sphi %s7701_s12, %s13_s12  }
   0x2   : > { %p137_p1 = scmp.lt.s32.totalorder %s7678_s12, 3 }
   0x4   : > { %p138_p2 = pnand %p6076_p0, %p137_p1 }
   0x6   : > { %141 = sbr.rel (%p138_p2) target bundleno = 694 (0x2b6), region = 32 }
   0xd   : > { %v7556_v0 = vld [vmem:[%s9765_s1 + $0x8] sm:$0xff]   ;;  %p161_p3 = scmp.lt.s32.totalorder %s6072_s13, 1  ;;  %v7557_v1 = vld [vmem:[%s9765_s1 + $0x20] sm:$0xff]   ;;  %vm222_vm0 = vsmask.f32 3328  ;;  %vm666_vm3 = vcmask 130048  }
   0xe   : > { %6982 = vmatprep.subr.bf16.mxu1 %v7556_v0  ;;  %v7720_v2 = vld [vmem:[%s9765_s1] sm:$0xff]   ;;  %7118 = vmatprep.subr.bf16.mxu0 %v7557_v1  ;;  %v7727_v3 = vld [vmem:[%s9765_s1 + $0x28] sm:$0xff]   ;;  %vm223_vm1 = vsmask.f32 7440  ;;  %vm1219_vm4 = vcmask 1042432   ;;  %vm1220_vm5 = vcmask 1046532  }
   0xf   : > { %s9847_s13 = smov (!%p161_p3, %s6072_s13), 1  ;;  %6983 = vmatpush3.bf16.msra.mxu1 %v7556_v0  ;;  %7119 = vmatpush3.bf16.msra.mxu0 %v7557_v1  ;;  %vm7751_vm2 = vmor %vm222_vm0, %vm223_vm1  ;;  %vm5874_vm7 = vcmask 1041409   ;;  %vm5877_vm8 = vcmask 1042434   ;;  %vm5880_vm9 = vcmask 1043459   ;;  %vm5883_vm10 = vcmask 1044484  }
  0x10   : > { %s7546_s20 = smul.u32 216, %s9847_s13  ;;  %7016 = vmatprep.subr.bf16.mxu1 %v7720_v2  ;;  %7152 = vmatprep.subr.bf16.mxu0 %v7727_v3  ;;  %vm7973_vm6 = vmor %vm1219_vm4, %vm1220_vm5  ;;  %vm5886_vm11 = vcmask 1045509   ;;  %vm5889_vm12 = vcmask 1046534   ;;  %vm5892_vm13 = vcmask 1047559   ;;  %vm6008_vm14 = vcmask 257024   ;;  %s6764_s17 = sshll.u32 %s9847_s13, 5 }
  0x11   : > { %s9492_s19 = scalar_lea.vmem %s9767_s3, %s6764_s17 }
  0x12   : > { %s7732_s25 = scalar_lea.vmem %s9764_s0, %s7546_s20 }
  0x13   : > { %v172_v4 = vld [vmem:[%s7732_s25] sm:$0xf]  ;;  %v173_v5 = vld [vmem:[%s7732_s25 + $0x4] sm:$0xf]  ;;  %v206_v6 = vld [vmem:[%s7732_s25 + $0x8] sm:$0x1] }
  0x14   : > { %v226_v7 = vshrl.u32 %v172_v4, 16  ;;  %v229_v8 = vshll.u32 %v172_v4, 16  ;;  %v235_v9 = vshll.u32 %v173_v5, 16  ;;  %v239_v10 = vshrl.u32 %v173_v5, 16  ;;  %v6266_v11 = vld [vmem:[%s7732_s25 + $0xc] sm:$0xf] }
  0x15   : > { %v245_v12 = vshll.u32 %v206_v6, 16  ;;  %v7740_v13 = vld [vmem:[%s7732_s25 + $0x10] sm:$0xf]  ;;  %v7743_v14 = vld [vmem:[%s7732_s25 + $0x14] sm:$0x1]  ;;  %v2044_v20 = vshrl.u32 %v6266_v11, 16 }
  0x16   : > { %v228_v15 = vrot.slane %v226_v7, 4  ;;  %v231_v16 = vrot.slane %v229_v8, 5  ;;  %v237_v17 = vrot.slane %v235_v9, 5  ;;  %v241_v18 = vrot.slane %v239_v10, 4  ;;  %v174_v27 = vld [vmem:[%s7732_s25 + $0xc] sm:$0xf] }
  0x17   : > { %v247_v19 = vrot.slane %v245_v12, 5  ;;  %v2047_v21 = vshll.u32 %v6266_v11, 16  ;;  %v2053_v22 = vshll.u32 %v7740_v13, 16  ;;  %v2057_v25 = vshrl.u32 %v7740_v13, 16  ;;  %v175_v32 = vld [vmem:[%s7732_s25 + $0x10] sm:$0xf] }
  0x18   : > { %v232_v23 = vor.u32 %v231_v16, %v228_v15  ;;  %v242_v24 = vor.u32 %v241_v18, %v237_v17  ;;  %v2063_v26 = vshll.u32 %v7743_v14, 16  ;;  %v2046_v29 = vrot.slane %v2044_v20, 4  ;;  %v207_v38 = vld [vmem:[%s7732_s25 + $0x14] sm:$0x1]  ;;  %v6269_v49 = vld [vmem:[%s7732_s25 + $0x18] sm:$0xf] }
  0x19   : > { %v2049_v30 = vrot.slane %v2047_v21, 5  ;;  %v2055_v31 = vrot.slane %v2053_v22, 5  ;;  %v2059_v35 = vrot.slane %v2057_v25, 4  ;;  %v250_v39 = vshrl.u32 %v174_v27, 16  ;;  %v7763_v54 = vld [vmem:[%s7732_s25 + $0x1c] sm:$0xf] }
  0x1a   : > { %v233_v33 = vrot.slane %v232_v23, 4  ;;  %v243_v34 = vrot.slane %v242_v24, 4  ;;  %v2065_v37 = vrot.slane %v2063_v26, 5  ;;  %v253_v40 = vshll.u32 %v174_v27, 16  ;;  %v7771_v59 = vld [vmem:[%s7732_s25 + $0x20] sm:$0x1] }
  0x1b   : > { %v2050_v36 = vor.u32 %v2049_v30, %v2046_v29  ;;  %v2060_v43 = vor.u32 %v2059_v35, %v2055_v31  ;;  %v259_v44 = vshll.u32 %v175_v32, 16  ;;  %v252_v47 = vrot.slane %v250_v39, 4  ;;  %v176_v10 = vld [vmem:[%s7732_s25 + $0x18] sm:$0xf]  ;;  %v208_v24 = vld [vmem:[%s7732_s25 + $0x20] sm:$0x1] }
  0x1c   : > { %v238_v41 = vsel %vm7751_vm2, %v233_v33, %v237_v17  ;;  %v248_v42 = vsel %vm7751_vm2, %v243_v34, %v247_v19  ;;  %v255_v48 = vrot.slane %v253_v40, 5  ;;  %v263_v52 = vshrl.u32 %v175_v32, 16  ;;  %v177_v17 = vld [vmem:[%s7732_s25 + $0x1c] sm:$0xf]  ;;  %v6272_v32 = vld [vmem:[%s7732_s25 + $0x24] sm:$0xf] }
  0x1d   : > { %v6082_v45 = vcombine.low %v238_v41, %v248_v42  ;;  %v2051_v46 = vrot.slane %v2050_v36, 4  ;;  %v2061_v50 = vrot.slane %v2060_v43, 4  ;;  %v261_v51 = vrot.slane %v259_v44, 5 }
  0x1e   : > { %v269_v53 = vshll.u32 %v207_v38, 16  ;;  %v2791_v56 = vrot.slane %v7740_v13, 5  ;;  %v2794_v57 = vrot.slane %v7743_v14, 5  ;;  %v256_v58 = vor.u32 %v255_v48, %v252_v47  ;;  %v7562_v38 = vld [vmem:[%s9765_s1 + $0x10] sm:$0xff]   ;;  %v8006_v14 = vld [vmem:[%s7732_s25 + $0x7c] sm:$0xf] }
  0x1f   : > { %6984 = vmatprep.mubr.msk.bf16.mxu1 %vm666_vm3, %v6082_v45  ;;  %v2056_v55 = vsel %vm7751_vm2, %v2051_v46, %v2055_v31  ;;  %v2066_v60 = vsel %vm7751_vm2, %v2061_v50, %v2065_v37  ;;  %v265_v61 = vrot.slane %v263_v52, 4  ;;  %v2068_v63 = vshrl.u32 %v6269_v49, 16  ;;  %v7794_v37 = vld [vmem:[%s7732_s25 + $0x28] sm:$0xf]  ;;  %v7803_v45 = vld [vmem:[%s7732_s25 + $0x2c] sm:$0x1] }
  0x20   : > { %v271_v62 = vrot.slane %v269_v53, 5  ;;  %v6316_v0 = vcombine.low %v2056_v55, %v2066_v60  ;;  %v257_v1 = vrot.slane %v256_v58, 4  ;;  %v2071_v4 = vshll.u32 %v6269_v49, 16  ;;  %v178_v52 = vld [vmem:[%s7732_s25 + $0x24] sm:$0xf] }
  0x21   : > { %v2077_v5 = vshll.u32 %v7763_v54, 16  ;;  %v266_v6 = vor.u32 %v265_v61, %v261_v51  ;;  %v2070_v7 = vrot.slane %v2068_v63, 4  ;;  %v2081_v8 = vshrl.u32 %v7763_v54, 16  ;;  %v179_v61 = vld [vmem:[%s7732_s25 + $0x28] sm:$0xf] }
  0x22   : > { %v2087_v9 = vshll.u32 %v7771_v59, 16  ;;  %7120 = vmatprep.mubr.msk.bf16.mxu0 %vm666_vm3, %v6316_v0  ;;  %v262_v11 = vsel %vm7751_vm2, %v257_v1, %v261_v51  ;;  %v2073_v12 = vrot.slane %v2071_v4, 5  ;;  %v2798_v16 = vrot.slane %v7763_v54, 5 }
  0x23   : > { %v2079_v15 = vrot.slane %v2077_v5, 5  ;;  %v267_v18 = vrot.slane %v266_v6, 4  ;;  %v2083_v19 = vrot.slane %v2081_v8, 4  ;;  %v2801_v21 = vrot.slane %v7771_v59, 5  ;;  %v209_v6 = vld [vmem:[%s7732_s25 + $0x2c] sm:$0x1] }
  0x24   : > { %v2089_v20 = vrot.slane %v2087_v9, 5  ;;  %v2074_v22 = vor.u32 %v2073_v12, %v2070_v7  ;;  %v7787_v23 = vrot.slane %v2798_v16, 4  ;;  %v274_v25 = vshrl.u32 %v176_v10, 16 }
  0x25   : > { %v277_v26 = vshll.u32 %v176_v10, 16  ;;  %v272_v27 = vsel %vm7751_vm2, %v267_v18, %v271_v62  ;;  %v2084_v29 = vor.u32 %v2083_v19, %v2079_v15  ;;  %v283_v30 = vshll.u32 %v177_v17, 16  ;;  %v7814_v62 = vld [vmem:[%s9765_s1 + $0x30] sm:$0xff]  }
  0x26   : > { %v287_v31 = vshrl.u32 %v177_v17, 16  ;;  %v6083_v33 = vcombine.low %v262_v11, %v272_v27  ;;  %v2075_v34 = vrot.slane %v2074_v22, 4  ;;  %v276_v35 = vrot.slane %v274_v25, 4  ;;  %v7827_v22 = vld [vmem:[%s7732_s25 + $0x34] sm:$0xf] }
  0x27   : > { %v279_v36 = vrot.slane %v277_v26, 5  ;;  %v2085_v39 = vrot.slane %v2084_v29, 4  ;;  %v285_v40 = vrot.slane %v283_v30, 5  ;;  %v293_v42 = vshll.u32 %v208_v24, 16  ;;  %v7834_v30 = vld [vmem:[%s7732_s25 + $0x38] sm:$0x1] }
  0x28   : > { %v289_v41 = vrot.slane %v287_v31, 4  ;;  %6985 = vmatmul.mubr.msk.bf16.vlgmr.msra.gmra.mrb[0].mxu1 %vm666_vm3, %v6083_v33  ;;  %v2080_v43 = vsel %vm7751_vm2, %v2075_v34, %v2079_v15  ;;  %v2092_v46 = vshrl.u32 %v6272_v32, 16  ;;  %v2095_v47 = vshll.u32 %v6272_v32, 16  ;;  %v6275_v15 = vld [vmem:[%s7732_s25 + $0x30] sm:$0xf] }
  0x29   : > { %v280_v44 = vor.u32 %v279_v36, %v276_v35  ;;  %7017 = vmatpush3.bf16.msra.mxu1 %v7720_v2  ;;  %v2090_v48 = vsel %vm7751_vm2, %v2085_v39, %v2089_v20  ;;  %v295_v50 = vrot.slane %v293_v42, 5  ;;  %v2101_v51 = vshll.u32 %v7794_v37, 16  ;;  %v180_v42 = vld [vmem:[%s7732_s25 + $0x30] sm:$0xf] }
  0x2a   : > { %v290_v49 = vor.u32 %v289_v41, %v285_v40  ;;  %v6317_v53 = vcombine.low %v2080_v43, %v2090_v48  ;;  %v2094_v58 = vrot.slane %v2092_v46, 4  ;;  %v2097_v60 = vrot.slane %v2095_v47, 5  ;;  %7050 = vmatprep.subr.bf16.mxu1 %v7562_v38  ;;  %v181_v48 = vld [vmem:[%s7732_s25 + $0x34] sm:$0xf] }
  0x2b   : > { %v281_v55 = vrot.slane %v280_v44, 4  ;;  %v2103_v63 = vrot.slane %v2101_v51, 5  ;;  %v2105_v0 = vshrl.u32 %v7794_v37, 16  ;;  %v2111_v1 = vshll.u32 %v7803_v45, 16 }
  0x2c   : > { %v291_v2 = vrot.slane %v290_v49, 4  ;;  %7121 = vmatmul.mubr.msk.bf16.vlgmr.msra.gmra.mrb[0].mxu0 %vm666_vm3, %v6317_v53  ;;  %v2098_v5 = vor.u32 %v2097_v60, %v2094_v58  ;;  %v298_v7 = vshrl.u32 %v178_v52, 16  ;;  %v301_v8 = vshll.u32 %v178_v52, 16  ;;  %v210_v53 = vld [vmem:[%s7732_s25 + $0x38] sm:$0x1] }
  0x2d   : > { %v286_v4 = vsel %vm7751_vm2, %v281_v55, %v285_v40  ;;  %7153 = vmatpush3.bf16.msra.mxu0 %v7727_v3  ;;  %v2107_v10 = vrot.slane %v2105_v0, 4  ;;  %v2113_v11 = vrot.slane %v2111_v1, 5  ;;  %v307_v12 = vshll.u32 %v179_v61, 16 }
  0x2e   : > { %v296_v9 = vsel %vm7751_vm2, %v291_v2, %v295_v50  ;;  %v2099_v18 = vrot.slane %v2098_v5, 4  ;;  %v300_v19 = vrot.slane %v298_v7, 4  ;;  %v303_v20 = vrot.slane %v301_v8, 5  ;;  %7186 = vmatprep.subr.bf16.mxu0 %v7814_v62 }
  0x2f   : > { %v6084_v17 = vcombine.low %v286_v4, %v296_v9  ;;  %v2108_v24 = vor.u32 %v2107_v10, %v2103_v63  ;;  %v309_v25 = vrot.slane %v307_v12, 5  ;;  %v311_v26 = vshrl.u32 %v179_v61, 16  ;;  %v6278_v4 = vld [vmem:[%s7732_s25 + $0x3c] sm:$0xf]  ;;  %v7851_v9 = vld [vmem:[%s7732_s25 + $0x40] sm:$0xf] }
  0x30   : > { %v317_v3 = vshll.u32 %v209_v6, 16  ;;  %v2104_v27 = vsel %vm7751_vm2, %v2099_v18, %v2103_v63  ;;  %v304_v29 = vor.u32 %v303_v20, %v300_v19  ;;  %v2116_v31 = vshrl.u32 %v6275_v15, 16  ;;  %v7856_v20 = vld [vmem:[%s7732_s25 + $0x44] sm:$0x1] }
  0x31   : > { %6988 = vmatprep.mubr.msk.bf16.mxu1 %vm666_vm3, %v6084_v17  ;;  %v2119_v32 = vshll.u32 %v6275_v15, 16  ;;  %v2109_v33 = vrot.slane %v2108_v24, 4  ;;  %v313_v34 = vrot.slane %v311_v26, 4  ;;  %v2125_v36 = vshll.u32 %v7827_v22, 16 }
  0x32   : > { %v319_v35 = vrot.slane %v317_v3, 5  ;;  %v305_v38 = vrot.slane %v304_v29, 4  ;;  %v2118_v39 = vrot.slane %v2116_v31, 4  ;;  %v2129_v41 = vshrl.u32 %v7827_v22, 16  ;;  %v182_v29 = vld [vmem:[%s7732_s25 + $0x3c] sm:$0xf] }
  0x33   : > { %v2121_v40 = vrot.slane %v2119_v32, 5  ;;  %v2114_v43 = vsel %vm7751_vm2, %v2109_v33, %v2113_v11  ;;  %v314_v44 = vor.u32 %v313_v34, %v309_v25  ;;  %v2127_v46 = vrot.slane %v2125_v36, 5 }
  0x34   : > { %v2135_v47 = vshll.u32 %v7834_v30, 16  ;;  %v6318_v49 = vcombine.low %v2104_v27, %v2114_v43  ;;  %v310_v50 = vsel %vm7751_vm2, %v305_v38, %v309_v25  ;;  %v2131_v52 = vrot.slane %v2129_v41, 4 }
  0x35   : > { %v2122_v51 = vor.u32 %v2121_v40, %v2118_v39  ;;  %v315_v55 = vrot.slane %v314_v44, 4  ;;  %v322_v60 = vshrl.u32 %v180_v42, 16  ;;  %v325_v61 = vshll.u32 %v180_v42, 16 }
  0x36   : > { %v2137_v58 = vrot.slane %v2135_v47, 5  ;;  %7124 = vmatprep.mubr.msk.bf16.mxu0 %vm666_vm3, %v6318_v49  ;;  %v2132_v63 = vor.u32 %v2131_v52, %v2127_v46  ;;  %v331_v0 = vshll.u32 %v181_v48, 16  ;;  %v335_v1 = vshrl.u32 %v181_v48, 16  ;;  %v211_v49 = vld [vmem:[%s7732_s25 + $0x44] sm:$0x1] }
  0x37   : > { %v2123_v2 = vrot.slane %v2122_v51, 4  ;;  %v320_v5 = vsel %vm7751_vm2, %v315_v55, %v319_v35  ;;  %v324_v6 = vrot.slane %v322_v60, 4  ;;  %v327_v7 = vrot.slane %v325_v61, 5  ;;  %v183_v35 = vld [vmem:[%s7732_s25 + $0x40] sm:$0xf] }
  0x38   : > { %v341_v8 = vshll.u32 %v210_v53, 16  ;;  %v6085_v10 = vcombine.low %v310_v50, %v320_v5  ;;  %v2133_v12 = vrot.slane %v2132_v63, 4  ;;  %v333_v15 = vrot.slane %v331_v0, 5  ;;  %v6281_v51 = vld [vmem:[%s7732_s25 + $0x48] sm:$0xf] }
  0x39   : > { %v2128_v11 = vsel %vm7751_vm2, %v2123_v2, %v2127_v46  ;;  %v328_v17 = vor.u32 %v327_v7, %v324_v6  ;;  %v337_v18 = vrot.slane %v335_v1, 4  ;;  %v2140_v24 = vshrl.u32 %v6278_v4, 16  ;;  %v7874_v60 = vld [vmem:[%s7732_s25 + $0x4c] sm:$0xf] }
  0x3a   : > { %v343_v19 = vrot.slane %v341_v8, 5  ;;  %6989 = vmatmul.mubr.msk.bf16.gmra.mrb[4].mxu1 %vm666_vm3, %v6085_v10  ;;  %v2138_v25 = vsel %vm7751_vm2, %v2133_v12, %v2137_v58  ;;  %v2143_v26 = vshll.u32 %v6278_v4, 16  ;;  %v2149_v3 = vshll.u32 %v7851_v9, 16  ;;  %v7882_v10 = vld [vmem:[%s7732_s25 + $0x50] sm:$0x1] }
  0x3b   : > { %v2153_v27 = vshrl.u32 %v7851_v9, 16  ;;  %v6319_v31 = vcombine.low %v2128_v11, %v2138_v25  ;;  %v329_v32 = vrot.slane %v328_v17, 4  ;;  %v338_v33 = vor.u32 %v337_v18, %v333_v15  ;;  %v7889_v25 = vld [vmem:[%s7732_s25 + $0x4c] sm:$0xf] }
  0x3c   : > { %v2142_v34 = vrot.slane %v2140_v24, 4  ;;  %v2145_v36 = vrot.slane %v2143_v26, 5  ;;  %v2151_v38 = vrot.slane %v2149_v3, 5  ;;  %v2159_v40 = vshll.u32 %v7856_v20, 16 }
  0x3d   : > { %v2155_v39 = vrot.slane %v2153_v27, 4  ;;  %7125 = vmatmul.mubr.msk.bf16.gmra.mrb[4].mxu0 %vm666_vm3, %v6319_v31  ;;  %v334_v41 = vsel %vm7751_vm2, %v329_v32, %v333_v15  ;;  %v339_v42 = vrot.slane %v338_v33, 4  ;;  %v346_v43 = vshrl.u32 %v182_v29, 16  ;;  %v7886_v15 = vld [vmem:[%s7732_s25 + $0x48] sm:$0xf] }
  0x3e   : > { %v349_v44 = vshll.u32 %v182_v29, 16  ;;  %v2146_v46 = vor.u32 %v2145_v36, %v2142_v34  ;;  %v2161_v48 = vrot.slane %v2159_v40, 5  ;;  %v355_v50 = vshll.u32 %v183_v35, 16  ;;  %v212_v34 = vld [vmem:[%s7732_s25 + $0x50] sm:$0x1] }
  0x3f   : > { %v2156_v47 = vor.u32 %v2155_v39, %v2151_v38  ;;  %v344_v52 = vsel %vm7751_vm2, %v339_v42, %v343_v19  ;;  %v348_v53 = vrot.slane %v346_v43, 4  ;;  %v359_v58 = vshrl.u32 %v183_v35, 16 }
  0x40   : > { %v351_v55 = vrot.slane %v349_v44, 5  ;;  %v6086_v61 = vcombine.low %v334_v41, %v344_v52  ;;  %v2147_v2 = vrot.slane %v2146_v46, 4  ;;  %v357_v0 = vrot.slane %v355_v50, 5  ;;  %v6284_v41 = vld [vmem:[%s7732_s25 + $0x54] sm:$0xf] }
  0x41   : > { %v2157_v63 = vrot.slane %v2156_v47, 4  ;;  %v361_v4 = vrot.slane %v359_v58, 4  ;;  %v365_v5 = vshll.u32 %v211_v49, 16  ;;  %v2164_v6 = vshrl.u32 %v6281_v51, 16 }
  0x42   : > { %v352_v1 = vor.u32 %v351_v55, %v348_v53  ;;  %6992 = vmatprep.mubr.msk.bf16.mxu1 %vm666_vm3, %v6086_v61  ;;  %v2152_v7 = vsel %vm7751_vm2, %v2147_v2, %v2151_v38  ;;  %v2167_v11 = vshll.u32 %v6281_v51, 16  ;;  %v2173_v12 = vshll.u32 %v7874_v60, 16  ;;  %v7905_v51 = vld [vmem:[%s7732_s25 + $0x58] sm:$0xf] }
  0x43   : > { %v2162_v8 = vsel %vm7751_vm2, %v2157_v63, %v2161_v48  ;;  %v362_v19 = vor.u32 %v361_v4, %v357_v0  ;;  %v367_v24 = vrot.slane %v365_v5, 5  ;;  %v2166_v26 = vrot.slane %v2164_v6, 4 }
  0x44   : > { %v6320_v17 = vcombine.low %v2152_v7, %v2162_v8  ;;  %v353_v18 = vrot.slane %v352_v1, 4  ;;  %v2169_v3 = vrot.slane %v2167_v11, 5  ;;  %v2175_v27 = vrot.slane %v2173_v12, 5  ;;  %v7915_v8 = vld [vmem:[%s7732_s25 + $0x54] sm:$0xf] }
  0x45   : > { %v2177_v29 = vshrl.u32 %v7874_v60, 16  ;;  %v363_v32 = vrot.slane %v362_v19, 4  ;;  %v2183_v33 = vshll.u32 %v7882_v10, 16  ;;  %v370_v35 = vshrl.u32 %v7886_v15, 16  ;;  %v7921_v19 = vld [vmem:[%s7732_s25 + $0x58] sm:$0xf] }
  0x46   : > { %7128 = vmatprep.mubr.msk.bf16.mxu0 %vm666_vm3, %v6320_v17  ;;  %v358_v31 = vsel %vm7751_vm2, %v353_v18, %v357_v0  ;;  %v2170_v36 = vor.u32 %v2169_v3, %v2166_v26  ;;  %v373_v39 = vshll.u32 %v7886_v15, 16  ;;  %v379_v40 = vshll.u32 %v7889_v25, 16  ;;  %v7911_v0 = vld [vmem:[%s7732_s25 + $0x5c] sm:$0x1] }
  0x47   : > { %v2179_v38 = vrot.slane %v2177_v29, 4  ;;  %v368_v42 = vsel %vm7751_vm2, %v363_v32, %v367_v24  ;;  %v2185_v43 = vrot.slane %v2183_v33, 5  ;;  %v372_v44 = vrot.slane %v370_v35, 4  ;;  %v213_v33 = vld [vmem:[%s7732_s25 + $0x5c] sm:$0x1] }
  0x48   : > { %v383_v46 = vshrl.u32 %v7889_v25, 16  ;;  %v6087_v47 = vcombine.low %v358_v31, %v368_v42  ;;  %v2171_v48 = vrot.slane %v2170_v36, 4  ;;  %v375_v50 = vrot.slane %v373_v39, 5 }
  0x49   : > { %v2180_v49 = vor.u32 %v2179_v38, %v2175_v27  ;;  %v381_v52 = vrot.slane %v379_v40, 5  ;;  %v389_v55 = vshll.u32 %v212_v34, 16  ;;  %v2188_v58 = vshrl.u32 %v6284_v41, 16  ;;  %v6287_v40 = vld [vmem:[%s7732_s25 + $0x60] sm:$0xf] }
  0x4a   : > { %v385_v53 = vrot.slane %v383_v46, 4  ;;  %6993 = vmatmul.mubr.msk.bf16.gmra.mrb[8].mxu1 %vm666_vm3, %v6087_v47  ;;  %v2176_v61 = vsel %vm7751_vm2, %v2171_v48, %v2175_v27  ;;  %v376_v63 = vor.u32 %v375_v50, %v372_v44  ;;  %v2191_v1 = vshll.u32 %v6284_v41, 16  ;;  %v7935_v46 = vld [vmem:[%s7732_s25 + $0x64] sm:$0xf] }
  0x4b   : > { %v2181_v2 = vrot.slane %v2180_v49, 4  ;;  %v391_v5 = vrot.slane %v389_v55, 5  ;;  %v2190_v6 = vrot.slane %v2188_v58, 4  ;;  %v2197_v7 = vshll.u32 %v7905_v51, 16  ;;  %v7942_v55 = vld [vmem:[%s7732_s25 + $0x68] sm:$0x1] }
  0x4c   : > { %v386_v4 = vor.u32 %v385_v53, %v381_v52  ;;  %v377_v12 = vrot.slane %v376_v63, 4  ;;  %v2193_v17 = vrot.slane %v2191_v1, 5  ;;  %v2201_v18 = vshrl.u32 %v7905_v51, 16 }
  0x4d   : > { %v2186_v11 = vsel %vm7751_vm2, %v2181_v2, %v2185_v43  ;;  %v2199_v3 = vrot.slane %v2197_v7, 5  ;;  %v2207_v27 = vshll.u32 %v7911_v0, 16  ;;  %v394_v34 = vshrl.u32 %v7915_v8, 16 }
  0x4e   : > { %v6321_v24 = vcombine.low %v2176_v61, %v2186_v11  ;;  %v387_v26 = vrot.slane %v386_v4, 4  ;;  %v382_v29 = vsel %vm7751_vm2, %v377_v12, %v381_v52  ;;  %v2194_v31 = vor.u32 %v2193_v17, %v2190_v6  ;;  %v7952_v17 = vld [vmem:[%s7732_s25 + $0x64] sm:$0xf] }
  0x4f   : > { %v2203_v32 = vrot.slane %v2201_v18, 4  ;;  %v2209_v36 = vrot.slane %v2207_v27, 5  ;;  %v397_v38 = vshll.u32 %v7915_v8, 16  ;;  %v403_v39 = vshll.u32 %v7921_v19, 16 }
  0x50   : > { %7129 = vmatmul.mubr.msk.bf16.gmra.mrb[8].mxu0 %vm666_vm3, %v6321_v24  ;;  %v392_v35 = vsel %vm7751_vm2, %v387_v26, %v391_v5  ;;  %v2195_v42 = vrot.slane %v2194_v31, 4  ;;  %v396_v44 = vrot.slane %v394_v34, 4  ;;  %v407_v49 = vshrl.u32 %v7921_v19, 16  ;;  %v7946_v5 = vld [vmem:[%s7732_s25 + $0x60] sm:$0xf] }
  0x51   : > { %v6088_v41 = vcombine.low %v382_v29, %v392_v35  ;;  %v2204_v43 = vor.u32 %v2203_v32, %v2199_v3  ;;  %v399_v47 = vrot.slane %v397_v38, 5  ;;  %v405_v48 = vrot.slane %v403_v39, 5  ;;  %v214_v35 = vld [vmem:[%s7732_s25 + $0x68] sm:$0x1] }
  0x52   : > { %v413_v50 = vshll.u32 %v213_v33, 16  ;;  %v2200_v52 = vsel %vm7751_vm2, %v2195_v42, %v2199_v3  ;;  %v2212_v58 = vshrl.u32 %v6287_v40, 16  ;;  %v2215_v61 = vshll.u32 %v6287_v40, 16 }
  0x53   : > { %6996 = vmatprep.mubr.msk.bf16.mxu1 %vm666_vm3, %v6088_v41  ;;  %v2205_v53 = vrot.slane %v2204_v43, 4  ;;  %v400_v2 = vor.u32 %v399_v47, %v396_v44  ;;  %v409_v63 = vrot.slane %v407_v49, 4  ;;  %v2221_v4 = vshll.u32 %v7935_v46, 16  ;;  %v6349_v43 = vld [vmem:[%s7732_s25 + $0xc] sm:$0xe] }
  0x54   : > { %v415_v1 = vrot.slane %v413_v50, 5  ;;  %v2214_v7 = vrot.slane %v2212_v58, 4  ;;  %v2217_v11 = vrot.slane %v2215_v61, 5  ;;  %v2225_v12 = vshrl.u32 %v7935_v46, 16 }
  0x55   : > { %v2210_v6 = vsel %vm7751_vm2, %v2205_v53, %v2209_v36  ;;  %v401_v24 = vrot.slane %v400_v2, 4  ;;  %v410_v26 = vor.u32 %v409_v63, %v405_v48  ;;  %v2223_v3 = vrot.slane %v2221_v4, 5 }
  0x56   : > { %v6322_v18 = vcombine.low %v2200_v52, %v2210_v6  ;;  %v2218_v27 = vor.u32 %v2217_v11, %v2214_v7  ;;  %v2227_v29 = vrot.slane %v2225_v12, 4  ;;  %v2231_v31 = vshll.u32 %v7942_v55, 16  ;;  %v7980_v7 = vld [vmem:[%s7732_s25 + $0x70] sm:$0xf] }
  0x57   : > { %v418_v32 = vshrl.u32 %v7946_v5, 16  ;;  %v406_v33 = vsel %vm7751_vm2, %v401_v24, %v405_v48  ;;  %v411_v34 = vrot.slane %v410_v26, 4  ;;  %v421_v36 = vshll.u32 %v7946_v5, 16  ;;  %v7967_v48 = vld [vmem:[%s7732_s25 + $0x6c] sm:$0xf] }
  0x58   : > { %7132 = vmatprep.mubr.msk.bf16.mxu0 %vm666_vm3, %v6322_v18  ;;  %v427_v38 = vshll.u32 %v7952_v17, 16  ;;  %v2219_v39 = vrot.slane %v2218_v27, 4  ;;  %v2228_v40 = vor.u32 %v2227_v29, %v2223_v3  ;;  %v2233_v41 = vrot.slane %v2231_v31, 5  ;;  %v215_v31 = vld [vmem:[%s7732_s25 + $0x74] sm:$0x1] }
  0x59   : > { %v420_v42 = vrot.slane %v418_v32, 4  ;;  %v416_v44 = vsel %vm7751_vm2, %v411_v34, %v415_v1  ;;  %v423_v47 = vrot.slane %v421_v36, 5  ;;  %v431_v50 = vshrl.u32 %v7952_v17, 16  ;;  %v6350_v32 = vld [vmem:[%s7732_s25 + $0x18] sm:$0xe] }
  0x5a   : > { %v429_v49 = vrot.slane %v427_v38, 5  ;;  %v6089_v52 = vcombine.low %v406_v33, %v416_v44  ;;  %v2224_v53 = vsel %vm7751_vm2, %v2219_v39, %v2223_v3  ;;  %v2229_v58 = vrot.slane %v2228_v40, 4  ;;  %v7999_v38 = vld [vmem:[%s7732_s25 + $0x78] sm:$0xf] }
  0x5b   : > { %v437_v61 = vshll.u32 %v214_v35, 16  ;;  %v424_v63 = vor.u32 %v423_v47, %v420_v42  ;;  %v433_v1 = vrot.slane %v431_v50, 4  ;;  %v6365_v4 = vrot.slane %v6349_v43, 9  ;;  %v6351_v47 = vld [vmem:[%s7732_s25 + $0x24] sm:$0xe] }
  0x5c   : > { %v2793_v6 = vrot.slane %v2791_v56, 4  ;;  %6997 = vmatmul.mubr.msk.bf16.gmra.mrb[12].mxu1 %vm666_vm3, %v6089_v52  ;;  %v2234_v11 = vsel %vm7751_vm2, %v2229_v58, %v2233_v41  ;;  %v442_v18 = vshrl.u32 %v7967_v48, 16  ;;  %v445_v24 = vshll.u32 %v7967_v48, 16  ;;  %v216_v41 = vld [vmem:[%s7732_s25 + $0x80] sm:$0x1] }
  0x5d   : > { %v439_v12 = vrot.slane %v437_v61, 5  ;;  %v6323_v26 = vcombine.low %v2224_v53, %v2234_v11  ;;  %v425_v3 = vrot.slane %v424_v63, 4  ;;  %v434_v27 = vor.u32 %v433_v1, %v429_v49 }
  0x5e   : > { %v2792_v29 = vsel %vm7973_vm6, %v6365_v4, %v2791_v56  ;;  %v2795_v33 = vsel %vm7973_vm6, %v2793_v6, %v2794_v57  ;;  %v444_v34 = vrot.slane %v442_v18, 4  ;;  %v447_v35 = vrot.slane %v445_v24, 5  ;;  %v8033_v24 = vld [vmem:[%s7732_s25 + $0x88] sm:$0xf] }
  0x5f   : > { %v451_v36 = vshll.u32 %v7980_v7, 16  ;;  %7133 = vmatmul.mubr.msk.bf16.gmra.mrb[12].mxu0 %vm666_vm3, %v6323_v26  ;;  %v430_v13 = vsel %vm7751_vm2, %v425_v3, %v429_v49  ;;  %v435_v56 = vrot.slane %v434_v27, 4  ;;  %v6383_v39 = vcombine.low %v2792_v29, %v2795_v33 }
  0x60   : > { %v455_v40 = vshrl.u32 %v7980_v7, 16  ;;  %v448_v57 = vor.u32 %v447_v35, %v444_v34  ;;  %v461_v43 = vshll.u32 %v215_v31, 16  ;;  %v6366_v44 = vrot.slane %v6350_v32, 9  ;;  %v217_v35 = vld [vmem:[%s7732_s25 + $0x8c] sm:$0x1] }
  0x61   : > { %v453_v42 = vrot.slane %v451_v36, 5  ;;  %v440_v50 = vsel %vm7751_vm2, %v435_v56, %v439_v12  ;;  %7154 = vmatprep.mubr.msk.bf16.mxu0 %vm666_vm3, %v6383_v39  ;;  %v2802_v49 = vsel %vm7973_vm6, %v7787_v23, %v2801_v21  ;;  %v466_v53 = vshrl.u32 %v7999_v38, 16  ;;  %v8025_v12 = vld [vmem:[%s7732_s25 + $0x84] sm:$0xf] }
  0x62   : > { %v457_v52 = vrot.slane %v455_v40, 4  ;;  %v6090_v58 = vcombine.low %v430_v13, %v440_v50  ;;  %v449_v61 = vrot.slane %v448_v57, 4  ;;  %v463_v63 = vrot.slane %v461_v43, 5  ;;  %v6352_v40 = vld [vmem:[%s7732_s25 + $0x30] sm:$0xe] }
  0x63   : > { %v2799_v1 = vsel %vm7973_vm6, %v6366_v44, %v2798_v16  ;;  %v468_v11 = vrot.slane %v466_v53, 4  ;;  %v469_v59 = vshll.u32 %v7999_v38, 16  ;;  %v475_v23 = vshll.u32 %v8006_v14, 16  ;;  %v8038_v16 = vld [vmem:[%s9765_s1 + $0x38] sm:$0xff]   ;;  %v8057_v50 = vld [vmem:[%s7732_s25 + $0x90] sm:$0xf] }
  0x64   : > { %v458_v4 = vor.u32 %v457_v52, %v453_v42  ;;  %v6384_v6 = vcombine.low %v2799_v1, %v2802_v49  ;;  %7000 = vmatprep.mubr.msk.bf16.mxu1 %vm666_vm3, %v6090_v58  ;;  %v454_v21 = vsel %vm7751_vm2, %v449_v61, %v453_v42  ;;  %v479_v54 = vshrl.u32 %v8006_v14, 16  ;;  %v8062_v58 = vld [vmem:[%s7732_s25 + $0x94] sm:$0xf] }
  0x65   : > { %v485_v18 = vshll.u32 %v216_v41, 16  ;;  %v471_v3 = vrot.slane %v469_v59, 5  ;;  %v6367_v27 = vrot.slane %v6351_v47, 9  ;;  %v2805_v29 = vrot.slane %v7794_v37, 5 }
  0x66   : > { %v459_v26 = vrot.slane %v458_v4, 4  ;;  %v477_v31 = vrot.slane %v475_v23, 5  ;;  %v481_v32 = vrot.slane %v479_v54, 4  ;;  %v2808_v34 = vrot.slane %v7803_v45, 5  ;;  %v218_v23 = vld [vmem:[%s7732_s25 + $0x98] sm:$0x1] }
  0x67   : > { %v487_v33 = vrot.slane %v485_v18, 5  ;;  %7155 = vmatmul.mubr.msk.bf16.vlgmr.msra.gmra.mrb[0].mxu0 %vm666_vm3, %v6384_v6  ;;  %v472_v13 = vor.u32 %v471_v3, %v468_v11  ;;  %v2806_v56 = vsel %vm7973_vm6, %v6367_v27, %v2805_v29  ;;  %v2807_v39 = vrot.slane %v2805_v29, 4  ;;  %v6353_v27 = vld [vmem:[%s7732_s25 + $0x3c] sm:$0xe] }
  0x68   : > { %v464_v36 = vsel %vm7751_vm2, %v459_v26, %v463_v63  ;;  %7187 = vmatpush3.bf16.msra.mxu0 %v7814_v62  ;;  %v482_v37 = vor.u32 %v481_v32, %v477_v31  ;;  %v490_v45 = vshrl.u32 %v8025_v12, 16  ;;  %v493_v57 = vshll.u32 %v8025_v12, 16 }
  0x69   : > { %v6091_v41 = vcombine.low %v454_v21, %v464_v36  ;;  %v473_v42 = vrot.slane %v472_v13, 4  ;;  %v2809_v43 = vsel %vm7973_vm6, %v2807_v39, %v2808_v34  ;;  %v499_v44 = vshll.u32 %v8033_v24, 16  ;;  %7220 = vmatprep.subr.bf16.mxu0 %v8038_v16 }
  0x6a   : > { %v503_v47 = vshrl.u32 %v8033_v24, 16  ;;  %v483_v62 = vrot.slane %v482_v37, 4  ;;  %v6385_v52 = vcombine.low %v2806_v56, %v2809_v43  ;;  %v492_v49 = vrot.slane %v490_v45, 4 }
  0x6b   : > { %7001 = vmatmul.mubr.msk.bf16.gmra.mrb[16].mxu1 %vm666_vm3, %v6091_v41  ;;  %v495_v53 = vrot.slane %v493_v57, 5  ;;  %v478_v61 = vsel %vm7751_vm2, %v473_v42, %v477_v31  ;;  %v501_v63 = vrot.slane %v499_v44, 5  ;;  %v509_v4 = vshll.u32 %v217_v35, 16  ;;  %v8090_v42 = vld [vmem:[%s7732_s25 + $0xa0] sm:$0xf] }
  0x6c   : > { %v505_v1 = vrot.slane %v503_v47, 4  ;;  %v488_v6 = vsel %vm7751_vm2, %v483_v62, %v487_v33  ;;  %7158 = vmatprep.mubr.msk.bf16.mxu0 %vm666_vm3, %v6385_v52  ;;  %v6368_v59 = vrot.slane %v6352_v40, 9  ;;  %v2812_v21 = vrot.slane %v7827_v22, 5  ;;  %v8085_v40 = vld [vmem:[%s7732_s25 + $0x9c] sm:$0xf] }
  0x6d   : > { %v496_v11 = vor.u32 %v495_v53, %v492_v49  ;;  %v6092_v54 = vcombine.low %v478_v61, %v488_v6  ;;  %v511_v26 = vrot.slane %v509_v4, 5  ;;  %v2815_v3 = vrot.slane %v7834_v30, 5  ;;  %v219_v52 = vld [vmem:[%s7732_s25 + $0xa4] sm:$0x1] }
  0x6e   : > { %v506_v18 = vor.u32 %v505_v1, %v501_v63  ;;  %v2813_v31 = vsel %vm7973_vm6, %v6368_v59, %v2812_v21  ;;  %v2814_v32 = vrot.slane %v2812_v21, 4  ;;  %v514_v33 = vshrl.u32 %v8057_v50, 16  ;;  %v6354_v59 = vld [vmem:[%s7732_s25 + $0x48] sm:$0xe] }
  0x6f   : > { %v497_v29 = vrot.slane %v496_v11, 4  ;;  %7004 = vmatprep.mubr.msk.bf16.mxu1 %vm666_vm3, %v6092_v54  ;;  %v517_v22 = vshll.u32 %v8057_v50, 16  ;;  %v523_v35 = vshll.u32 %v8062_v58, 16  ;;  %v527_v36 = vshrl.u32 %v8062_v58, 16 }
  0x70   : > { %v507_v34 = vrot.slane %v506_v18, 4  ;;  %v2816_v13 = vsel %vm7973_vm6, %v2814_v32, %v2815_v3  ;;  %v516_v56 = vrot.slane %v514_v33, 4  ;;  %v533_v39 = vshll.u32 %v218_v23, 16  ;;  %v8109_v33 = vld [vmem:[%s7732_s25 + $0xa8] sm:$0xf] }
  0x71   : > { %v502_v30 = vsel %vm7751_vm2, %v497_v29, %v501_v63  ;;  %v6386_v37 = vcombine.low %v2813_v31, %v2816_v13  ;;  %v519_v45 = vrot.slane %v517_v22, 5  ;;  %v525_v57 = vrot.slane %v523_v35, 5 }
  0x72   : > { %v512_v41 = vsel %vm7751_vm2, %v507_v34, %v511_v26  ;;  %v529_v44 = vrot.slane %v527_v36, 4  ;;  %v535_v47 = vrot.slane %v533_v39, 5  ;;  %v6369_v62 = vrot.slane %v6353_v27, 9 }
  0x73   : > { %v6093_v43 = vcombine.low %v502_v30, %v512_v41  ;;  %7159 = vmatmul.mubr.msk.bf16.gmra.mrb[4].mxu0 %vm666_vm3, %v6386_v37  ;;  %v520_v49 = vor.u32 %v519_v45, %v516_v56  ;;  %v2819_v53 = vrot.slane %v7851_v9, 5  ;;  %v2822_v61 = vrot.slane %v7856_v20, 5  ;;  %v8114_v30 = vld [vmem:[%s7732_s25 + $0xac] sm:$0xf]  ;;  %v220_v37 = vld [vmem:[%s7732_s25 + $0xb0] sm:$0x1] }
  0x74   : > { %v538_v63 = vshrl.u32 %v8085_v40, 16  ;;  %v530_v1 = vor.u32 %v529_v44, %v525_v57  ;;  %v541_v4 = vshll.u32 %v8085_v40, 16  ;;  %v547_v6 = vshll.u32 %v8090_v42, 16  ;;  %v6355_v45 = vld [vmem:[%s7732_s25 + $0x54] sm:$0xe] }
  0x75   : > { %7005 = vmatmul.mubr.msk.bf16.gmra.mrb[20].mxu1 %vm666_vm3, %v6093_v43  ;;  %v551_v11 = vshrl.u32 %v8090_v42, 16  ;;  %v521_v21 = vrot.slane %v520_v49, 4  ;;  %v2820_v23 = vsel %vm7973_vm6, %v6369_v62, %v2819_v53  ;;  %v2821_v9 = vrot.slane %v2819_v53, 4  ;;  %v8124_v62 = vld [vmem:[%s7732_s25 + $0xb4] sm:$0xf] }
  0x76   : > { %v540_v20 = vrot.slane %v538_v63, 4  ;;  %v531_v54 = vrot.slane %v530_v1, 4  ;;  %v543_v18 = vrot.slane %v541_v4, 5  ;;  %v549_v26 = vrot.slane %v547_v6, 5  ;;  %v8136_v4 = vld [vmem:[%s7732_s25 + $0xb8] sm:$0xf] }
  0x77   : > { %v553_v3 = vrot.slane %v551_v11, 4  ;;  %v526_v27 = vsel %vm7751_vm2, %v521_v21, %v525_v57  ;;  %v2823_v29 = vsel %vm7973_vm6, %v2821_v9, %v2822_v61  ;;  %v557_v31 = vshll.u32 %v219_v52, 16 }
  0x78   : > { %v6370_v32 = vrot.slane %v6354_v59, 9  ;;  %v536_v34 = vsel %vm7751_vm2, %v531_v54, %v535_v47  ;;  %v6387_v22 = vcombine.low %v2820_v23, %v2823_v29  ;;  %v544_v35 = vor.u32 %v543_v18, %v540_v20  ;;  %v221_v18 = vld [vmem:[%s7732_s25 + $0xbc] sm:$0x1] }
  0x79   : > { %v554_v36 = vor.u32 %v553_v3, %v549_v26  ;;  %v6094_v13 = vcombine.low %v526_v27, %v536_v34  ;;  %v559_v56 = vrot.slane %v557_v31, 5  ;;  %v2826_v39 = vrot.slane %v7874_v60, 5  ;;  %v6356_v31 = vld [vmem:[%s7732_s25 + $0x60] sm:$0xe] }
  0x7a   : > { %v2829_v41 = vrot.slane %v7882_v10, 5  ;;  %7162 = vmatprep.mubr.msk.bf16.mxu0 %vm666_vm3, %v6387_v22  ;;  %v545_v57 = vrot.slane %v544_v35, 4  ;;  %v562_v44 = vshrl.u32 %v8109_v33, 16  ;;  %v565_v47 = vshll.u32 %v8109_v33, 16 }
  0x7b   : > { %v555_v43 = vrot.slane %v554_v36, 4  ;;  %7008 = vmatprep.mubr.msk.bf16.mxu1 %vm666_vm3, %v6094_v13  ;;  %v2827_v60 = vsel %vm7973_vm6, %v6370_v32, %v2826_v39  ;;  %v2828_v52 = vrot.slane %v2826_v39, 4  ;;  %v571_v10 = vshll.u32 %v8114_v30, 16  ;;  %v6357_v36 = vld [vmem:[%s7732_s25 + $0x6c] sm:$0xe] }
  0x7c   : > { %v575_v49 = vshrl.u32 %v8114_v30, 16  ;;  %v550_v53 = vsel %vm7751_vm2, %v545_v57, %v549_v26  ;;  %v564_v63 = vrot.slane %v562_v44, 4  ;;  %v567_v1 = vrot.slane %v565_v47, 5 }
  0x7d   : > { %v560_v61 = vsel %vm7751_vm2, %v555_v43, %v559_v56  ;;  %v2830_v11 = vsel %vm7973_vm6, %v2828_v52, %v2829_v41  ;;  %v573_v59 = vrot.slane %v571_v10, 5  ;;  %v581_v20 = vshll.u32 %v220_v37, 16  ;;  %v6292_v52 = vld [vmem:[%s7732_s25 + $0x74] sm:$0x1] }
  0x7e   : > { %v6095_v6 = vcombine.low %v550_v53, %v560_v61  ;;  %v577_v21 = vrot.slane %v575_v49, 4  ;;  %v6388_v23 = vcombine.low %v2827_v60, %v2830_v11  ;;  %v568_v9 = vor.u32 %v567_v1, %v564_v63  ;;  %v6291_v60 = vld [vmem:[%s7732_s25 + $0x70] sm:$0xf] }
  0x7f   : > { %v6371_v54 = vrot.slane %v6355_v45, 9  ;;  %v2833_v3 = vrot.slane %v7905_v51, 5  ;;  %v2836_v27 = vrot.slane %v7911_v0, 5  ;;  %v586_v29 = vshrl.u32 %v8124_v62, 16 }
  0x80   : > { %7009 = vmatmul.mubr.msk.bf16.gmra.mrb[24].mxu1 %vm666_vm3, %v6095_v6  ;;  %v578_v26 = vor.u32 %v577_v21, %v573_v59  ;;  %7163 = vmatmul.mubr.msk.bf16.gmra.mrb[8].mxu0 %vm666_vm3, %v6388_v23  ;;  %v569_v32 = vrot.slane %v568_v9, 4  ;;  %v583_v34 = vrot.slane %v581_v20, 5  ;;  %v589_v22 = vshll.u32 %v8124_v62, 16 }
  0x81   : > { %v595_v35 = vshll.u32 %v8136_v4, 16  ;;  %v2834_v51 = vsel %vm7973_vm6, %v6371_v54, %v2833_v3  ;;  %v2835_v56 = vrot.slane %v2833_v3, 4  ;;  %v588_v0 = vrot.slane %v586_v29, 4  ;;  %v6358_v54 = vld [vmem:[%s7732_s25 + $0x78] sm:$0xe] }
  0x82   : > { %v579_v13 = vrot.slane %v578_v26, 4  ;;  %v574_v39 = vsel %vm7751_vm2, %v569_v32, %v573_v59  ;;  %v591_v41 = vrot.slane %v589_v22, 5  ;;  %v599_v45 = vshrl.u32 %v8136_v4, 16  ;;  %v7613_v29 = vld [vmem:[%s7732_s25] sm:$0xf] }
  0x83   : > { %v597_v37 = vrot.slane %v595_v35, 5  ;;  %v2837_v43 = vsel %vm7973_vm6, %v2835_v56, %v2836_v27  ;;  %v605_v44 = vshll.u32 %v221_v18, 16  ;;  %v6372_v47 = vrot.slane %v6356_v31, 9  ;;  %v8176_v31 = vld [vmem:[%s7732_s25 + $0x4] sm:$0xf] }
  0x84   : > { %v584_v57 = vsel %vm7751_vm2, %v579_v13, %v583_v34  ;;  %v6389_v49 = vcombine.low %v2834_v51, %v2837_v43  ;;  %v592_v53 = vor.u32 %v591_v41, %v588_v0  ;;  %v601_v61 = vrot.slane %v599_v45, 4  ;;  %v8180_v34 = vld [vmem:[%s7732_s25 + $0x7c] sm:$0xf]  ;;  %v8183_v22 = vld [vmem:[%s7732_s25 + $0x80] sm:$0x1] }
  0x85   : > { %v6096_v10 = vcombine.low %v574_v39, %v584_v57  ;;  %v607_v63 = vrot.slane %v605_v44, 5  ;;  %v2840_v1 = vrot.slane %v7935_v46, 5  ;;  %v2843_v6 = vrot.slane %v7942_v55, 5  ;;  %v6359_v35 = vld [vmem:[%s7732_s25 + $0x84] sm:$0xe] }
  0x86   : > { %v6373_v11 = vrot.slane %v6357_v36, 9  ;;  %7166 = vmatprep.mubr.msk.bf16.mxu0 %vm666_vm3, %v6389_v49  ;;  %v593_v59 = vrot.slane %v592_v53, 4  ;;  %v602_v21 = vor.u32 %v601_v61, %v597_v37  ;;  %v2847_v23 = vrot.slane %v6291_v60, 5  ;;  %v6297_v0 = vld [vmem:[%s7732_s25 + $0x88] sm:$0xf] }
  0x87   : > { %7012 = vmatprep.mubr.msk.bf16.mxu1 %vm666_vm3, %v6096_v10  ;;  %v2850_v9 = vrot.slane %v6292_v52, 5  ;;  %v2841_v20 = vsel %vm7973_vm6, %v6372_v47, %v2840_v1  ;;  %v2842_v46 = vrot.slane %v2840_v1, 4  ;;  %v6115_v32 = vcombine.low %v7613_v29, %v8176_v31  ;;  %v6298_v39 = vld [vmem:[%s7732_s25 + $0x8c] sm:$0x1]  ;;  %v6300_v45 = vld [vmem:[%s7732_s25 + $0x94] sm:$0xf] }
  0x88   : > { %v598_v55 = vsel %vm7751_vm2, %v593_v59, %v597_v37  ;;  %v603_v18 = vrot.slane %v602_v21, 4  ;;  %v2848_v26 = vsel %vm7973_vm6, %v6373_v11, %v2847_v23  ;;  %v2849_v3 = vrot.slane %v2847_v23, 4  ;;  %v6301_v52 = vld [vmem:[%s7732_s25 + $0x98] sm:$0x1]  ;;  %v6360_v10 = vld [vmem:[%s7732_s25 + $0x90] sm:$0xe] }
  0x89   : > { %v2844_v27 = vsel %vm7973_vm6, %v2842_v46, %v2843_v6  ;;  %v6374_v56 = vrot.slane %v6358_v54, 9  ;;  %v2854_v57 = vrot.slane %v8180_v34, 5  ;;  %v2857_v43 = vrot.slane %v8183_v22, 5  ;;  %v6304_v11 = vld [vmem:[%s7732_s25 + $0xa4] sm:$0x1] }
  0x8a   : > { %v608_v36 = vsel %vm7751_vm2, %v603_v18, %v607_v63  ;;  %v6390_v13 = vcombine.low %v2841_v20, %v2844_v27  ;;  %v2851_v51 = vsel %vm7973_vm6, %v2849_v3, %v2850_v9  ;;  %v6375_v44 = vrot.slane %v6359_v35, 9  ;;  %v6303_v63 = vld [vmem:[%s7732_s25 + $0xa0] sm:$0xf]  ;;  %v6361_v59 = vld [vmem:[%s7732_s25 + $0x9c] sm:$0xe] }
  0x8b   : > { %v6097_v41 = vcombine.low %v598_v55, %v608_v36  ;;  %v6391_v37 = vcombine.low %v2848_v26, %v2851_v51  ;;  %v2861_v47 = vrot.slane %v6297_v0, 5  ;;  %v2864_v60 = vrot.slane %v6298_v39, 5  ;;  %v7615_v21 = vld [vmem:[%s7732_s25 + $0xc] sm:$0xf]  ;;  %v8210_v23 = vld [vmem:[%s7732_s25 + $0x10] sm:$0xf] }
  0x8c   : > { %7167 = vmatmul.mubr.msk.bf16.gmra.mrb[12].mxu0 %vm666_vm3, %v6390_v13  ;;  %v2855_v49 = vsel %vm7973_vm6, %v6374_v56, %v2854_v57  ;;  %v2856_v53 = vrot.slane %v2854_v57, 4  ;;  %v2868_v61 = vrot.slane %v6300_v45, 5  ;;  %v6116_v9 = vcombine.low %v7615_v21, %v8210_v23  ;;  %v7617_v27 = vld [vmem:[%s7732_s25 + $0x18] sm:$0xf]  ;;  %v8219_v29 = vld [vmem:[%s7732_s25 + $0x1c] sm:$0xf] }
  0x8d   : > { %7013 = vmatmul.mubr.msk.bf16.gmra.mrb[28].mxu1 %vm666_vm3, %v6097_v41  ;;  %7170 = vmatprep.mubr.msk.bf16.mxu0 %vm666_vm3, %v6391_v37  ;;  %v2862_v1 = vsel %vm7973_vm6, %v6375_v44, %v2861_v47  ;;  %v2863_v6 = vrot.slane %v2861_v47, 4  ;;  %v6376_v46 = vrot.slane %v6360_v10, 9  ;;  %v2871_v54 = vrot.slane %v6301_v52, 5  ;;  %v6306_v51 = vld [vmem:[%s7732_s25 + $0xac] sm:$0xf]  ;;  %v8227_v39 = vld [vmem:[%s9765_s1 + $0x18] sm:$0xff]  }
  0x8e   : > { %7018 = vmatprep.mubr.msk.bf16.mxu1 %vm666_vm3, %v6115_v32  ;;  %v2858_v20 = vsel %vm7973_vm6, %v2856_v53, %v2857_v43  ;;  %v2870_v26 = vrot.slane %v2868_v61, 4  ;;  %v2875_v3 = vrot.slane %v6303_v63, 5  ;;  %v6117_v32 = vcombine.low %v7617_v27, %v8219_v29  ;;  %v6309_v0 = vld [vmem:[%s7732_s25 + $0xb8] sm:$0xf]  ;;  %v7619_v57 = vld [vmem:[%s9765_s1 + $0x10] sm:$0xff]  }
  0x8f   : > { %v6392_v55 = vcombine.low %v2855_v49, %v2858_v20  ;;  %v2865_v18 = vsel %vm7973_vm6, %v2863_v6, %v2864_v60  ;;  %v6377_v36 = vrot.slane %v6361_v59, 9  ;;  %v2878_v13 = vrot.slane %v6304_v11, 5  ;;  %v6307_v47 = vld [vmem:[%s7732_s25 + $0xb0] sm:$0x1]  ;;  %v6362_v60 = vld [vmem:[%s7732_s25 + $0xa8] sm:$0xe] }
  0x90   : > { %v6393_v35 = vcombine.low %v2862_v1, %v2865_v18  ;;  %v2877_v56 = vrot.slane %v2875_v3, 4  ;;  %v2869_v41 = vsel %vm7973_vm6, %v6376_v46, %v2868_v61  ;;  %v2872_v37 = vsel %vm7973_vm6, %v2870_v26, %v2871_v54  ;;  %v6310_v10 = vld [vmem:[%s7732_s25 + $0xbc] sm:$0x1]  ;;  %v6363_v49 = vld [vmem:[%s7732_s25 + $0xb4] sm:$0xe] }
  0x91   : > { %v2882_v45 = vrot.slane %v6306_v51, 5  ;;  %v2876_v43 = vsel %vm7973_vm6, %v6377_v36, %v2875_v3  ;;  %v2889_v52 = vrot.slane %v6309_v0, 5  ;;  %v7620_v53 = vld [vmem:[%s7732_s25 + $0x24] sm:$0xf]  ;;  %v8251_v61 = vld [vmem:[%s7732_s25 + $0x28] sm:$0xf]  ;;  %v6394_v1 = vcombine.low %v2869_v41, %v2872_v37 }
  0x92   : > { %v2879_v44 = vsel %vm7973_vm6, %v2877_v56, %v2878_v13  ;;  %v6118_v63 = vcombine.low %v7620_v53, %v8251_v61  ;;  %v6312_v6 = vld [vmem:[%s7732_s25 + $0xc4] sm:$0xf]  ;;  %v6378_v59 = vrot.slane %v6362_v60, 9  ;;  %v7622_v20 = vld [vmem:[%s7732_s25 + $0x30] sm:$0xf]  ;;  %v2892_v26 = vrot.slane %v6310_v10, 5 }
  0x93   : > { %v6395_v11 = vcombine.low %v2876_v43, %v2879_v44  ;;  %v2884_v21 = vrot.slane %v2882_v45, 4  ;;  %v8257_v46 = vld [vmem:[%s7732_s25 + $0x34] sm:$0xf]  ;;  %v2891_v18 = vrot.slane %v2889_v52, 4  ;;  %v6313_v13 = vld [vmem:[%s7732_s25 + $0xc8] sm:$0x1] }
  0x94   : > { %7171 = vmatmul.mubr.msk.bf16.gmra.mrb[16].mxu0 %vm666_vm3, %v6392_v55  ;;  %v6119_v54 = vcombine.low %v7622_v20, %v8257_v46  ;;  %v6379_v55 = vrot.slane %v6363_v49, 9  ;;  %v2883_v3 = vsel %vm7973_vm6, %v6378_v59, %v2882_v45  ;;  %v6364_v51 = vld [vmem:[%s7732_s25 + $0xc0] sm:$0xe]  ;;  %v7624_v56 = vld [vmem:[%s7732_s25 + $0x3c] sm:$0xf]  ;;  %v2899_v44 = vrot.slane %v6313_v13, 5 }
  0x95   : > { %7019 = vmatmul.mubr.msk.bf16.vlgmr.msra.gmra.mrb[0].mxu1 %vm666_vm3, %v6116_v9  ;;  %7174 = vmatprep.mubr.msk.bf16.mxu0 %vm666_vm3, %v6393_v35  ;;  %v2885_v9 = vrot.slane %v6307_v47, 5  ;;  %v2893_v36 = vsel %vm7973_vm6, %v2891_v18, %v2892_v26  ;;  %v8276_v0 = vld [vmem:[%s7732_s25 + $0x40] sm:$0xf]  ;;  %v6121_v47 = vcombine.low %v7886_v15, %v7889_v25  ;;  %v2269_v10 = vshll.u32 %v8180_v34, 16  ;;  %v7571_v53 = vld [vmem:[%s7732_s25 + $0x18] sm:$0xff]  }
  0x96   : > { %7051 = vmatpush3.bf16.msra.mxu1 %v7619_v57  ;;  %7022 = vmatprep.mubr.msk.bf16.mxu1 %vm666_vm3, %v6117_v32  ;;  %v2896_v32 = vrot.slane %v6312_v6, 5  ;;  %v2890_v35 = vsel %vm7973_vm6, %v6379_v55, %v2889_v52  ;;  %v6120_v41 = vcombine.low %v7624_v56, %v8276_v0  ;;  %v6380_v57 = vrot.slane %v6364_v51, 9 }
  0x97   : > { %7084 = vmatprep.subr.bf16.mxu1 %v8227_v39  ;;  %v2886_v27 = vsel %vm7973_vm6, %v2884_v21, %v2885_v9  ;;  %v6397_v45 = vcombine.low %v2890_v35, %v2893_v36  ;;  %v2273_v15 = vshrl.u32 %v8180_v34, 16  ;;  %v6122_v49 = vcombine.low %v7915_v8, %v7921_v19  ;;  %v1171_v8 = vld [vmem:[%s7732_s25] sm:$0xe]  ;;  %v1172_v19 = vld [vmem:[%s7732_s25 + $0xc] sm:$0xe] }
  0x98   : > { %v6396_v37 = vcombine.low %v2883_v3, %v2886_v27  ;;  %v2898_v43 = vrot.slane %v2896_v32, 4  ;;  %v2897_v60 = vsel %vm7973_vm6, %v6380_v57, %v2896_v32  ;;  %v1231_v21 = vrot.slane %v8210_v23, 5  ;;  %v1173_v34 = vld [vmem:[%s7732_s25 + $0x18] sm:$0xe]  ;;  %v7574_v27 = vld [vmem:[%s7732_s25 + $0x24] sm:$0xff]   ;;  %v7576_v32 = vld [vmem:[%s7732_s25 + $0x30] sm:$0xff]  }
  0x99   : > { %v2275_v6 = vrot.slane %v2273_v15, 4  ;;  %v2279_v9 = vshll.u32 %v8183_v22, 16  ;;  %v1224_v23 = vrot.slane %v8176_v31, 5  ;;  %v1238_v20 = vrot.slane %v8219_v29, 5  ;;  %v1175_v36 = vld [vmem:[%s7732_s25 + $0x30] sm:$0xe] }
  0x9a   : > { %v2900_v52 = vsel %vm7973_vm6, %v2898_v43, %v2899_v44  ;;  %v6124_v18 = vcombine.low %v7967_v48, %v7980_v7  ;;  %v1245_v26 = vrot.slane %v8251_v61, 5  ;;  %v1252_v3 = vrot.slane %v8257_v46, 5  ;;  %v7628_v48 = vld [vmem:[%s7732_s25 + $0x20] sm:$0x1]  ;;  %v7629_v57 = vld [vmem:[%s7732_s25 + $0x2c] sm:$0x1] }
  0x9b   : > { %v6398_v25 = vcombine.low %v2897_v60, %v2900_v52  ;;  %v6125_v22 = vcombine.low %v7999_v38, %v8006_v14  ;;  %v6126_v31 = vcombine.low %v8025_v12, %v8033_v24  ;;  %v6148_v29 = vrot.slane %v1171_v8, 9  ;;  %v8328_v46 = vld [vmem:[%s9765_s1 + $0x40] sm:$0xff]  }
  0x9c   : > { %7175 = vmatmul.mubr.msk.bf16.gmra.mrb[20].mxu0 %vm666_vm3, %v6394_v1  ;;  %v8296_v1 = vrot.slane %v2269_v10, 5  ;;  %v6149_v35 = vrot.slane %v1172_v19, 9  ;;  %v1233_v13 = vrot.slane %v1231_v21, 4  ;;  %v6150_v51 = vrot.slane %v1173_v34, 9  ;;  %v7630_v10 = vld [vmem:[%s7732_s25 + $0x38] sm:$0x1] }
  0x9d   : > { %7023 = vmatmul.mubr.msk.bf16.gmra.mrb[4].mxu1 %vm666_vm3, %v6118_v63  ;;  %7178 = vmatprep.mubr.msk.bf16.mxu0 %vm666_vm3, %v6395_v11  ;;  %v6123_v63 = vcombine.low %v7946_v5, %v7952_v17  ;;  %v7626_v11 = vld [vmem:[%s7732_s25 + $0x8] sm:$0x1]  ;;  %v7627_v5 = vld [vmem:[%s7732_s25 + $0x14] sm:$0x1]  ;;  %v1241_v7 = vrot.slane %v7628_v48, 5  ;;  %v6127_v38 = vcombine.low %v8057_v50, %v8062_v58  ;;  %v6128_v14 = vcombine.low %v8085_v40, %v8090_v42 }
  0x9e   : > { %7026 = vmatprep.mubr.msk.bf16.mxu1 %vm666_vm3, %v6119_v54  ;;  %9784 = vst [vmem:[#allocation2_spill] sm:$0xff] %v8296_v1  ;;  %v1227_v59 = vrot.slane %v7626_v11, 5  ;;  %v1234_v17 = vrot.slane %v7627_v5, 5  ;;  %v1174_v54 = vld [vmem:[%s7732_s25 + $0x24] sm:$0xe]  ;;  %v2276_v55 = vor.u32 %v2275_v6, %v8296_v1  ;;  %v1226_v56 = vrot.slane %v1224_v23, 4 }
  0x9f   : > { %v6151_v61 = vrot.slane %v1174_v54, 9  ;;  %v1248_v43 = vrot.slane %v7629_v57, 5  ;;  %v6152_v44 = vrot.slane %v1175_v36, 9  ;;  %v6129_v60 = vcombine.low %v8109_v33, %v8114_v30  ;;  %v1177_v6 = vld [vmem:[%s7732_s25 + $0x48] sm:$0xe]  ;;  %v7582_v58 = vld [vmem:[%s7732_s25 + $0x54] sm:$0xff]  }
  0xa0   : > { %v8341_v52 = vsel %vm7973_vm6, %v6148_v29, %v1224_v23  ;;  %v1255_v15 = vrot.slane %v7630_v10, 5  ;;  %v8362_v11 = vrot.slane %v2276_v55, 4  ;;  %v6483_v34 = vld [vmem:[%s7732_s25 + $0x18] sm:$0xf]  ;;  %v7580_v5 = vld [vmem:[%s7732_s25 + $0x48] sm:$0xff]  }
  0xa1   : > { %v8377_v19 = vsel %vm7973_vm6, %v6151_v61, %v1245_v26  ;;  %v7631_v23 = vld [vmem:[%s7732_s25 + $0x44] sm:$0x1]  ;;  %v1178_v55 = vld [vmem:[%s7732_s25 + $0x54] sm:$0xe]  ;;  %v3614_v48 = vshll.u32 %v6483_v34, 16 }
  0xa2   : > { %9786 = vst [vmem:[#allocation4_spill] sm:$0xff] %v8362_v11  ;;  %v6155_v10 = vrot.slane %v1178_v55, 9  ;;  %v6489_v55 = vld [vmem:[%s7732_s25 + $0x30] sm:$0xf]  ;;  %v6490_v50 = vld [vmem:[%s7732_s25 + $0x34] sm:$0xf] }
  0xa3   : > { %v3616_v24 = vrot.slane %v3614_v48, 5 }
  0xa4   : > { %7179 = vmatmul.mubr.msk.bf16.gmra.mrb[24].mxu0 %vm666_vm3, %v6396_v37  ;;  %v1176_v37 = vld [vmem:[%s7732_s25 + $0x3c] sm:$0xe] }
  0xa5   : > { %7027 = vmatmul.mubr.msk.bf16.gmra.mrb[8].mxu1 %vm666_vm3, %v6120_v41  ;;  %7182 = vmatprep.mubr.msk.bf16.mxu0 %vm666_vm3, %v6397_v45  ;;  %v1240_v41 = vrot.slane %v1238_v20, 4  ;;  %v1247_v45 = vrot.slane %v1245_v26, 4 }
  0xa6   : > { %7030 = vmatprep.mubr.msk.bf16.mxu1 %vm666_vm3, %v6121_v47  ;;  %v1254_v47 = vrot.slane %v1252_v3, 4 }
  0xa7   : > { %v8373_v8 = vsel %vm7973_vm6, %v1240_v41, %v1241_v7  ;;  %v8392_v26 = vsel %vm7973_vm6, %v1247_v45, %v1248_v43  ;;  %v7633_v45 = vld [vmem:[%s7732_s25 + $0x50] sm:$0x1]  ;;  %v3668_v41 = vshll.u32 %v6490_v50, 16 }
  0xa8   : > { %v1269_v57 = vrot.slane %v7633_v45, 5  ;;  %v9794_v11 = vcombine.low %v8377_v19, %v8392_v26 }
  0xac   : > { %7183 = vmatmul.mubr.msk.bf16.gmra.mrb[28].mxu0 %vm666_vm3, %v6398_v25  ;;  %v1259_v25 = vrot.slane %v8276_v0, 5  ;;  %v8359_v0 = vsel %vm7973_vm6, %v6150_v51, %v1238_v20  ;;  %v1262_v20 = vrot.slane %v7631_v23, 5  ;;  %v3611_v51 = vshrl.u32 %v6483_v34, 16  ;;  %v8436_v34 = vld [vmem:[%s7732_s25 + $0x5c] sm:$0x1] }
  0xad   : > { %7031 = vmatmul.mubr.msk.bf16.gmra.mrb[12].mxu1 %vm666_vm3, %v6122_v49  ;;  %7188 = vmatprep.mubr.msk.bf16.mxu0 %vm666_vm3, %v7571_v53  ;;  %v8345_v49 = vrot.slane %v2279_v9, 5  ;;  %v8351_v53 = vsel %vm7973_vm6, %v6149_v35, %v1231_v21  ;;  %v8369_v21 = vsel %vm7973_vm6, %v1226_v56, %v1227_v59  ;;  %v6153_v9 = vrot.slane %v1176_v37, 9  ;;  %v7632_v59 = vld [vmem:[%s7732_s25 + $0x4c] sm:$0xf] }
  0xae   : > { %7034 = vmatprep.mubr.msk.bf16.mxu1 %vm666_vm3, %v6123_v63  ;;  %v8355_v63 = vsel %vm7973_vm6, %v1233_v13, %v1234_v17  ;;  %v8383_v17 = vsel %vm7973_vm6, %v6152_v44, %v1252_v3  ;;  %v1266_v54 = vrot.slane %v7632_v59, 5  ;;  %v1261_v3 = vrot.slane %v1259_v25, 4  ;;  %v8407_v13 = vld [vmem:[%s7732_s25 + $0x60] sm:$0xe] }
  0xaf   : > { %9785 = vst [vmem:[#allocation3_spill] sm:$0xff] %v8345_v49  ;;  %v8417_v43 = vsel %vm7973_vm6, %v6153_v9, %v1259_v25  ;;  %v7634_v25 = vld [vmem:[%s7732_s25 + $0x58] sm:$0xf]  ;;  %v1276_v9 = vrot.slane %v8436_v34, 5  ;;  %v6156_v23 = vrot.slane %v8407_v13, 9  ;;  %v3613_v12 = vrot.slane %v3611_v51, 4 }
  0xb0   : > { %v1268_v37 = vrot.slane %v1266_v54, 4  ;;  %v8421_v44 = vsel %vm7973_vm6, %v1261_v3, %v1262_v20  ;;  %v7636_v20 = vld [vmem:[%s7732_s25 + $0x64] sm:$0xf]  ;;  %v7637_v34 = vld [vmem:[%s7732_s25 + $0x70] sm:$0xf]  ;;  %v3672_v56 = vshrl.u32 %v6490_v50, 16 }
  0xb1   : > { %v1280_v59 = vrot.slane %v7636_v20, 5  ;;  %v1287_v20 = vrot.slane %v7637_v34, 5  ;;  %v6488_v34 = vld [vmem:[%s7732_s25 + $0x2c] sm:$0x1] }
  0xb2   : > { %v8453_v3 = vsel %vm7973_vm6, %v1268_v37, %v1269_v57  ;;  %v3659_v37 = vshrl.u32 %v6489_v55, 16  ;;  %v3662_v57 = vshll.u32 %v6489_v55, 16 }
  0xb3   : > { %v1282_v36 = vrot.slane %v1280_v59, 4 }
  0xb4   : > { %7189 = vmatmul.mubr.msk.bf16.vlgmr.msra.gmra.mrb[0].mxu0 %vm666_vm3, %v7574_v27  ;;  %v8396_v27 = vsel %vm7973_vm6, %v1254_v47, %v1255_v15  ;;  %v6485_v15 = vld [vmem:[%s7732_s25 + $0x20] sm:$0x1]  ;;  %v3664_v50 = vrot.slane %v3662_v57, 5  ;;  %v7588_v57 = vld [vmem:[%s7732_s25 + $0x78] sm:$0xff]  }
  0xb5   : > { %7035 = vmatmul.mubr.msk.bf16.gmra.mrb[16].mxu1 %vm666_vm3, %v6124_v18  ;;  %7221 = vmatpush3.bf16.msra.mxu0 %v8038_v16  ;;  %v7578_v16 = vld [vmem:[%s7732_s25 + $0x3c] sm:$0xff]   ;;  %v3630_v48 = vshll.u32 %v6485_v15, 16 }
  0xb6   : > { %7038 = vmatprep.mubr.msk.bf16.mxu1 %vm666_vm3, %v6125_v22  ;;  %7192 = vmatprep.mubr.msk.bf16.mxu0 %vm666_vm3, %v7576_v32  ;;  %v6484_v18 = vld [vmem:[%s7732_s25 + $0x1c] sm:$0xf]  ;;  %v6154_v22 = vrot.slane %v1177_v6, 9  ;;  %v6486_v6 = vld [vmem:[%s7732_s25 + $0x24] sm:$0xf] }
  0xb7   : > { %7254 = vmatprep.subr.bf16.mxu0 %v8328_v46  ;;  %v3620_v7 = vshll.u32 %v6484_v18, 16  ;;  %v3624_v61 = vshrl.u32 %v6484_v18, 16  ;;  %v3638_v13 = vshll.u32 %v6486_v6, 16  ;;  %v3617_v18 = vor.u32 %v3616_v24, %v3613_v12 }
  0xb8   : > { %v8425_v47 = vsel %vm7973_vm6, %v6154_v22, %v1266_v54  ;;  %v6487_v54 = vld [vmem:[%s7732_s25 + $0x28] sm:$0xf]  ;;  %v3635_v22 = vshrl.u32 %v6486_v6, 16  ;;  %v1289_v24 = vrot.slane %v1287_v20, 4 }
  0xb9   : > { %v3640_v29 = vrot.slane %v3638_v13, 5  ;;  %v3661_v13 = vrot.slane %v3659_v37, 4  ;;  %v3618_v40 = vrot.slane %v3617_v18, 4 }
  0xba   : > { %v3637_v15 = vrot.slane %v3635_v22, 4  ;;  %v6491_v22 = vld [vmem:[%s7732_s25 + $0x38] sm:$0x1] }
  0xbb   : > { %v3678_v37 = vshll.u32 %v6491_v22, 16 }
  0xbc   : > { %7193 = vmatmul.mubr.msk.bf16.gmra.mrb[4].mxu0 %vm666_vm3, %v7578_v16  ;;  %v1273_v16 = vrot.slane %v7634_v25, 5  ;;  %v1180_v25 = vld [vmem:[%s7732_s25 + $0x6c] sm:$0xe] }
  0xbd   : > { %7039 = vmatmul.mubr.msk.bf16.gmra.mrb[20].mxu1 %vm666_vm3, %v6126_v31  ;;  %7196 = vmatprep.mubr.msk.bf16.mxu0 %vm666_vm3, %v7580_v5  ;;  %v8446_v31 = vrot.slane %v3620_v7, 5  ;;  %v3626_v5 = vrot.slane %v3624_v61, 4  ;;  %v3644_v7 = vshll.u32 %v6487_v54, 16  ;;  %v3648_v61 = vshrl.u32 %v6487_v54, 16 }
  0xbe   : > { %7042 = vmatprep.mubr.msk.bf16.mxu1 %vm666_vm3, %v6127_v38  ;;  %v7584_v38 = vld [vmem:[%s7732_s25 + $0x60] sm:$0xff]   ;;  %v8460_v51 = vsel %vm7973_vm6, %v6155_v10, %v1273_v16  ;;  %v1275_v45 = vrot.slane %v1273_v16, 4  ;;  %v7638_v10 = vld [vmem:[%s7732_s25 + $0x68] sm:$0x1]  ;;  %v8467_v16 = vrot.slane %v3630_v48, 5  ;;  %v6157_v54 = vrot.slane %v1180_v25, 9 }
  0xbf   : > { %v3627_v6 = vor.u32 %v3626_v5, %v8446_v31  ;;  %v1283_v35 = vrot.slane %v7638_v10, 5  ;;  %v8470_v32 = vrot.slane %v3644_v7, 5  ;;  %v3650_v12 = vrot.slane %v3648_v61, 4  ;;  %v7639_v5 = vld [vmem:[%s7732_s25 + $0x74] sm:$0x1]  ;;  %v7586_v25 = vld [vmem:[%s7732_s25 + $0x6c] sm:$0xff]  }
  0xc0   : > { %v1290_v55 = vrot.slane %v7639_v5, 5  ;;  %v8489_v48 = vsel %vm7973_vm6, %v6156_v23, %v1280_v59  ;;  %v3641_v7 = vor.u32 %v3640_v29, %v3637_v15  ;;  %v3654_v61 = vshll.u32 %v6488_v34, 16  ;;  %v7641_v10 = vld [vmem:[%s7732_s25 + $0x88] sm:$0xf] }
  0xc1   : > { %v3628_v42 = vrot.slane %v3627_v6, 4  ;;  %v8494_v33 = vsel %vm7973_vm6, %v1275_v45, %v1276_v9  ;;  %v8502_v23 = vsel %vm7973_vm6, %v1282_v36, %v1283_v35  ;;  %v8506_v29 = vsel %vm7973_vm6, %v6157_v54, %v1287_v20  ;;  %v1182_v45 = vld [vmem:[%s7732_s25 + $0x84] sm:$0xe]  ;;  %v6492_v20 = vld [vmem:[%s7732_s25 + $0x3c] sm:$0xf] }
  0xc2   : > { %v8510_v9 = vsel %vm7973_vm6, %v1289_v24, %v1290_v55  ;;  %v3665_v59 = vor.u32 %v3664_v50, %v3661_v13  ;;  %v3623_v6 = vsel %vm7751_vm2, %v3618_v40, %v8446_v31  ;;  %v1301_v15 = vrot.slane %v7641_v10, 5  ;;  %v7642_v24 = vld [vmem:[%s7732_s25 + $0x80] sm:$0x1] }
  0xc3   : > { %v3633_v35 = vsel %vm7751_vm2, %v3628_v42, %v8467_v16  ;;  %v3642_v54 = vrot.slane %v3641_v7, 4  ;;  %v3656_v34 = vrot.slane %v3654_v61, 5  ;;  %v1297_v5 = vrot.slane %v7642_v24, 5  ;;  %v8524_v55 = vld [vmem:[%s7732_s25 + $0x40] sm:$0xf] }
  0xc4   : > { %7197 = vmatmul.mubr.msk.bf16.gmra.mrb[8].mxu0 %vm666_vm3, %v7582_v58  ;;  %v3674_v58 = vrot.slane %v3672_v56, 4  ;;  %v1181_v56 = vld [vmem:[%s7732_s25 + $0x78] sm:$0xe]  ;;  %9787 = vst [vmem:[#allocation5_spill] sm:$0xff] %v8524_v55  ;;  %v3680_v13 = vrot.slane %v3678_v37, 5  ;;  %v6159_v16 = vrot.slane %v1182_v45, 9  ;;  %v9788_v50 = vcombine.low %v8124_v62, %v8136_v4 }
  0xc5   : > { %7043 = vmatmul.mubr.msk.bf16.gmra.mrb[24].mxu1 %vm666_vm3, %v6128_v14  ;;  %7200 = vmatprep.mubr.msk.bf16.mxu0 %vm666_vm3, %v7584_v38  ;;  %v8483_v14 = vrot.slane %v3668_v41, 5  ;;  %v7640_v41 = vld [vmem:[%s7732_s25 + $0x7c] sm:$0xf]  ;;  %v3666_v40 = vrot.slane %v3665_v59, 4  ;;  %v7643_v42 = vld [vmem:[%s7732_s25 + $0x8c] sm:$0x1]  ;;  %v3647_v45 = vsel %vm7751_vm2, %v3642_v54, %v8470_v32 }
  0xc6   : > { %7046 = vmatprep.mubr.msk.bf16.mxu1 %vm666_vm3, %v6129_v60  ;;  %v3651_v60 = vor.u32 %v3650_v12, %v8470_v32  ;;  %v1294_v18 = vrot.slane %v7640_v41, 5  ;;  %v6158_v12 = vrot.slane %v1181_v56, 9  ;;  %v3683_v7 = vshrl.u32 %v6492_v20, 16  ;;  %v7589_v41 = vld [vmem:[%s7732_s25 + $0x84] sm:$0xff]   ;;  %v7590_v59 = vld [vmem:[%s7732_s25 + $0x90] sm:$0xff]  }
  0xc7   : > { %v3675_v36 = vor.u32 %v3674_v58, %v8483_v14  ;;  %v1304_v58 = vrot.slane %v7643_v42, 5  ;;  %v3686_v61 = vshll.u32 %v6492_v20, 16  ;;  %v1303_v56 = vrot.slane %v1301_v15, 4  ;;  %v8564_v20 = vld [vmem:[%s7732_s25 + $0x4c] sm:$0xf] }
  0xc8   : > { %v3652_v31 = vrot.slane %v3651_v60, 4  ;;  %v1296_v22 = vrot.slane %v1294_v18, 4  ;;  %v3692_v62 = vshll.u32 %v8524_v55, 16  ;;  %v3696_v4 = vshrl.u32 %v8524_v55, 16  ;;  %v8642_v37 = vld [vmem:[%s7732_s25 + $0x5c] sm:$0x1] }
  0xc9   : > { %v3676_v60 = vrot.slane %v3675_v36, 4  ;;  %v8556_v10 = vsel %vm7973_vm6, %v6158_v12, %v1294_v18  ;;  %v3671_v24 = vsel %vm7751_vm2, %v3666_v40, %v8483_v14  ;;  %v8571_v32 = vsel %vm7973_vm6, %v6159_v16, %v1301_v15  ;;  %v8575_v18 = vld [vmem:[%s7732_s25 + $0x58] sm:$0xf]  ;;  %v8589_v40 = vld [vmem:[%s7732_s25 + $0x90] sm:$0xe] }
  0xca   : > { %v3657_v36 = vsel %vm7751_vm2, %v3652_v31, %v3656_v34  ;;  %v3685_v54 = vrot.slane %v3683_v7, 4  ;;  %v3688_v34 = vrot.slane %v3686_v61, 5  ;;  %v6498_v31 = vld [vmem:[%s7732_s25 + $0x54] sm:$0xf]  ;;  %v3698_v14 = vrot.slane %v3696_v4, 4 }
  0xcb   : > { %v3681_v12 = vsel %vm7751_vm2, %v3676_v60, %v3680_v13  ;;  %v3716_v42 = vshll.u32 %v8564_v20, 16  ;;  %v3720_v7 = vshrl.u32 %v8564_v20, 16  ;;  %v3731_v13 = vshrl.u32 %v6498_v31, 16  ;;  %v1184_v38 = vld [vmem:[%s7732_s25 + $0x9c] sm:$0xe] }
  0xcc   : > { %7201 = vmatmul.mubr.msk.bf16.gmra.mrb[12].mxu0 %vm666_vm3, %v7586_v25  ;;  %v9789_v25 = vcombine.low %v8341_v52, %v8369_v21  ;;  %v8544_v52 = vcombine.low %v3623_v6, %v3633_v35  ;;  %v8560_v6 = vsel %vm7973_vm6, %v1296_v22, %v1297_v5  ;;  %v6495_v35 = vld [vmem:[%s7732_s25 + $0x48] sm:$0xf]  ;;  %v8581_v5 = vsel %vm7973_vm6, %v1303_v56, %v1304_v58  ;;  %v8584_v22 = vld [vmem:[%s7732_s25 + $0x44] sm:$0x1] }
  0xcd   : > { %7047 = vmatmul.mubr.msk.bf16.gmra.mrb[28].mxu1 %vm666_vm3, %v9788_v50  ;;  %7204 = vmatprep.mubr.msk.bf16.mxu0 %vm666_vm3, %v7588_v57  ;;  %9790 = vst [vmem:[#allocation6_spill] sm:$0xff] %v8584_v22  ;;  %v8586_v50 = vrot.slane %v3692_v62, 5  ;;  %v3707_v15 = vshrl.u32 %v6495_v35, 16  ;;  %v3710_v16 = vshll.u32 %v6495_v35, 16  ;;  %v3734_v61 = vshll.u32 %v6498_v31, 16 }
  0xce   : > { %7052 = vmatprep.mubr.msk.bf16.mxu1 %vm666_vm3, %v9789_v25  ;;  %v3740_v58 = vshll.u32 %v8575_v18, 16  ;;  %v3744_v25 = vshrl.u32 %v8575_v18, 16  ;;  %v9791_v60 = vcombine.low %v8351_v53, %v8355_v63  ;;  %v8601_v56 = vcombine.low %v3647_v45, %v3657_v36  ;;  %v8618_v35 = vld [vmem:[%s7732_s25 + $0x50] sm:$0x1]  ;;  %v7646_v62 = vld [vmem:[%s7732_s25 + $0x98] sm:$0x1] }
  0xcf   : > { %v8605_v4 = vcombine.low %v3671_v24, %v3681_v12  ;;  %v9792_v53 = vcombine.low %v8359_v0, %v8373_v8  ;;  %v3699_v45 = vor.u32 %v3698_v14, %v8586_v50  ;;  %v6501_v24 = vld [vmem:[%s7732_s25 + $0x60] sm:$0xf]  ;;  %v3709_v31 = vrot.slane %v3707_v15, 4  ;;  %v8624_v8 = vld [vmem:[%s7732_s25 + $0x64] sm:$0xf]  ;;  %v7592_v14 = vld [vmem:[%s7732_s25 + $0xa8] sm:$0xff]  }
  0xd0   : > { %v8621_v12 = vrot.slane %v3716_v42, 5  ;;  %v3722_v0 = vrot.slane %v3720_v7, 4  ;;  %v3736_v15 = vrot.slane %v3734_v61, 5  ;;  %v7645_v7 = vld [vmem:[%s7732_s25 + $0x94] sm:$0xf]  ;;  %v1311_v21 = vrot.slane %v7646_v62, 5 }
  0xd1   : > { %v1308_v63 = vrot.slane %v7645_v7, 5  ;;  %v3726_v57 = vshll.u32 %v8618_v35, 16  ;;  %v3755_v36 = vshrl.u32 %v6501_v24, 16  ;;  %v3768_v61 = vshrl.u32 %v8624_v8, 16  ;;  %v7647_v7 = vld [vmem:[%s7732_s25 + $0xa0] sm:$0xf] }
  0xd2   : > { %v1315_v55 = vrot.slane %v7647_v7, 5  ;;  %v3700_v62 = vrot.slane %v3699_v45, 4  ;;  %v1322_v45 = vrot.slane %v8114_v30, 5  ;;  %v8669_v7 = vld [vmem:[%s7732_s25 + $0x68] sm:$0x1]  ;;  %v7593_v30 = vld [vmem:[%s7732_s25 + $0xb4] sm:$0xff]  }
  0xd3   : > { %v3757_v19 = vrot.slane %v3755_v36, 4  ;;  %9796 = vst [vmem:[#allocation8_spill] sm:$0xff] %v8669_v7  ;;  %v7594_v36 = vld [vmem:[%s7732_s25 + $0xc0] sm:$0xff]  }
  0xd4   : > { %7205 = vmatmul.mubr.msk.bf16.gmra.mrb[16].mxu0 %vm666_vm3, %v7589_v41  ;;  %v3702_v41 = vshll.u32 %v8584_v22, 16  ;;  %v3758_v22 = vshll.u32 %v6501_v24, 16  ;;  %v3750_v24 = vshll.u32 %v8642_v37, 16 }
  0xd5   : > { %7053 = vmatmul.mubr.msk.bf16.vlgmr.msra.gmra.mrb[0].mxu1 %vm666_vm3, %v9791_v60  ;;  %7208 = vmatprep.mubr.msk.bf16.mxu0 %vm666_vm3, %v7590_v59  ;;  %v3689_v59 = vor.u32 %v3688_v34, %v3685_v54  ;;  %v8629_v54 = vld [vmem:[%s9765_s1 + $0x20] sm:$0xff]   ;;  %v3733_v60 = vrot.slane %v3731_v13, 4  ;;  %v3764_v13 = vshll.u32 %v8624_v8, 16 }
  0xd6   : > { %7085 = vmatpush3.bf16.msra.mxu1 %v8227_v39  ;;  %7056 = vmatprep.mubr.msk.bf16.mxu1 %vm666_vm3, %v9792_v53  ;;  %v3712_v39 = vrot.slane %v3710_v16, 5  ;;  %9793 = vst [vmem:[#allocation7_spill] sm:$0xff] %v8629_v54  ;;  %v7591_v34 = vld [vmem:[%s7732_s25 + $0x9c] sm:$0xff]   ;;  %v8634_v53 = vrot.slane %v3740_v58, 5  ;;  %v3746_v16 = vrot.slane %v3744_v25, 4  ;;  %v8636_v42 = vrot.slane %v3702_v41, 5 }
  0xd7   : > { %7288 = vmatprep.subr.bf16.mxu1 %v8629_v54  ;;  %v8647_v58 = vrot.slane %v3689_v59, 4  ;;  %v3723_v41 = vor.u32 %v3722_v0, %v8621_v12  ;;  %v3737_v54 = vor.u32 %v3736_v15, %v3733_v60  ;;  %v1310_v59 = vrot.slane %v1308_v63, 4  ;;  %v1185_v0 = vld [vmem:[%s7732_s25 + $0xa8] sm:$0xe] }
  0xd8   : > { %v3713_v25 = vor.u32 %v3712_v39, %v3709_v31  ;;  %v3747_v1 = vor.u32 %v3746_v16, %v8634_v53  ;;  %v3728_v31 = vrot.slane %v3726_v57, 5  ;;  %v6161_v39 = vrot.slane %v1184_v38, 9  ;;  %v7648_v57 = vld [vmem:[%s7732_s25 + $0xa4] sm:$0x1] }
  0xd9   : > { %v3760_v26 = vrot.slane %v3758_v22, 5  ;;  %v8665_v60 = vrot.slane %v3764_v13, 5  ;;  %v3724_v15 = vrot.slane %v3723_v41, 4  ;;  %v1317_v16 = vrot.slane %v1315_v55, 4  ;;  %v7649_v41 = vld [vmem:[%s7732_s25 + $0xb0] sm:$0x1] }
  0xda   : > { %v1318_v38 = vrot.slane %v7648_v57, 5  ;;  %v6162_v49 = vrot.slane %v1185_v0, 9  ;;  %v3695_v22 = vsel %vm7751_vm2, %v8647_v58, %v8586_v50  ;;  %v9797_v13 = vrot.slane %v8589_v40, 9  ;;  %v1186_v50 = vld [vmem:[%s7732_s25 + $0xb4] sm:$0xe] }
  0xdb   : > { %v1325_v57 = vrot.slane %v7649_v41, 5  ;;  %v3774_v0 = vshll.u32 %v8669_v7, 16  ;;  %v6504_v58 = vld [vmem:[%s7732_s25 + $0x6c] sm:$0xf]  ;;  %v8693_v40 = vsel %vm7973_vm6, %v1310_v59, %v1311_v21  ;;  %v9799_v59 = vcombine.low %v8417_v43, %v8421_v44 }
  0xdc   : > { %7209 = vmatmul.mubr.msk.bf16.gmra.mrb[20].mxu0 %vm666_vm3, %v7591_v34  ;;  %v9795_v34 = vcombine.low %v8383_v17, %v8396_v27  ;;  %v3738_v17 = vrot.slane %v3737_v54, 4  ;;  %v3748_v27 = vrot.slane %v3747_v1, 4  ;;  %v3705_v1 = vsel %vm7751_vm2, %v3700_v62, %v8636_v42 }
  0xdd   : > { %7057 = vmatmul.mubr.msk.bf16.gmra.mrb[4].mxu1 %vm666_vm3, %v9794_v11  ;;  %7212 = vmatprep.mubr.msk.bf16.mxu0 %vm666_vm3, %v7592_v14  ;;  %v3770_v11 = vrot.slane %v3768_v61, 4  ;;  %v3714_v14 = vrot.slane %v3713_v25, 4  ;;  %v8681_v61 = vsel %vm7973_vm6, %v9797_v13, %v1308_v63  ;;  %v1324_v25 = vrot.slane %v1322_v45, 4 }
  0xde   : > { %7060 = vmatprep.mubr.msk.bf16.mxu1 %vm666_vm3, %v9795_v34  ;;  %v3752_v34 = vrot.slane %v3750_v24, 5  ;;  %v3761_v54 = vor.u32 %v3760_v26, %v3757_v19  ;;  %v8700_v42 = vsel %vm7973_vm6, %v6161_v39, %v1315_v55  ;;  %v8704_v62 = vsel %vm7973_vm6, %v1317_v16, %v1318_v38  ;;  %v7650_v39 = vld [vmem:[%s7732_s25 + $0xb8] sm:$0xf] }
  0xdf   : > { %v3771_v24 = vor.u32 %v3770_v11, %v8665_v60  ;;  %v3719_v63 = vsel %vm7751_vm2, %v3714_v14, %v8621_v12  ;;  %v3729_v19 = vsel %vm7751_vm2, %v3724_v15, %v3728_v31  ;;  %v3743_v21 = vsel %vm7751_vm2, %v3738_v17, %v8634_v53  ;;  %v8753_v17 = vld [vmem:[%s7732_s25 + $0x7c] sm:$0xf] }
  0xe0   : > { %v3753_v12 = vsel %vm7751_vm2, %v3748_v27, %v3752_v34  ;;  %v8716_v55 = vsel %vm7973_vm6, %v6162_v49, %v1322_v45  ;;  %v8725_v31 = vsel %vm7973_vm6, %v1324_v25, %v1325_v57  ;;  %v6163_v53 = vrot.slane %v1186_v50, 9  ;;  %v8729_v49 = vld [vmem:[%s7732_s25 + $0x70] sm:$0xf]  ;;  %9803 = vst [vmem:[#allocation12_spill] sm:$0xff] %v8753_v17  ;;  %v6510_v27 = vld [vmem:[%s7732_s25 + $0x84] sm:$0xf] }
  0xe1   : > { %9798 = vst [vmem:[#allocation9_spill] sm:$0xff] %v8716_v55  ;;  %9800 = vst [vmem:[#allocation10_spill] sm:$0xff] %v8725_v31  ;;  %v1329_v26 = vrot.slane %v7650_v39, 5  ;;  %v3779_v45 = vshrl.u32 %v6504_v58, 16  ;;  %v9802_v43 = vcombine.low %v8425_v47, %v8453_v3  ;;  %v8735_v44 = vcombine.low %v3695_v22, %v3705_v1  ;;  %v6507_v3 = vld [vmem:[%s7732_s25 + $0x78] sm:$0xf] }
  0xe2   : > { %9801 = vst [vmem:[#allocation11_spill] sm:$0xff] %v8729_v49  ;;  %v8737_v11 = vrot.slane %v3761_v54, 4  ;;  %v8739_v14 = vrot.slane %v3771_v24, 4  ;;  %v8741_v15 = vrot.slane %v3774_v0, 5  ;;  %v8745_v38 = vcombine.low %v3719_v63, %v3729_v19  ;;  %v7595_v34 = vld [vmem:[%s7732_s25 + $0xcc] sm:$0xff]  }
  0xe3   : > { %v8749_v47 = vcombine.low %v3743_v21, %v3753_v12  ;;  %v8760_v22 = vld [vmem:[%s7732_s25 + $0xbc] sm:$0x1]  ;;  %v3782_v25 = vshll.u32 %v6504_v58, 16  ;;  %v3788_v41 = vshll.u32 %v8729_v49, 16  ;;  %v8765_v57 = vld [vmem:[%s7732_s25 + $0x88] sm:$0xf]  ;;  %v8769_v1 = vsel %vm7973_vm6, %v6163_v53, %v1329_v26 }
  0xe4   : > { %7213 = vmatmul.mubr.msk.bf16.gmra.mrb[24].mxu0 %vm666_vm3, %v7593_v30  ;;  %9804 = vst [vmem:[#allocation13_spill] sm:$0xff] %v8765_v57  ;;  %v8771_v54 = vrot.slane %v1329_v26, 4  ;;  %v8773_v24 = vrot.slane %v3779_v45, 4  ;;  %v3792_v0 = vshrl.u32 %v8729_v49, 16  ;;  %v6513_v50 = vld [vmem:[%s7732_s25 + $0x90] sm:$0xf]  ;;  %v9807_v58 = vcombine.low %v8460_v51, %v8494_v33 }
  0xe5   : > { %7061 = vmatmul.mubr.msk.bf16.gmra.mrb[8].mxu1 %vm666_vm3, %v9799_v59  ;;  %7216 = vmatprep.mubr.msk.bf16.mxu0 %vm666_vm3, %v7594_v36  ;;  %v3803_v19 = vshrl.u32 %v6507_v3, 16  ;;  %v3806_v21 = vshll.u32 %v6507_v3, 16  ;;  %v8786_v12 = vld [vmem:[%s7732_s25 + $0x94] sm:$0xf]  ;;  %v3812_v53 = vshll.u32 %v8753_v17, 16  ;;  %v3816_v39 = vshrl.u32 %v8753_v17, 16 }
  0xe6   : > { %7064 = vmatprep.mubr.msk.bf16.mxu1 %vm666_vm3, %v9802_v43  ;;  %9805 = vst [vmem:[#allocation14_spill] sm:$0xff] %v8786_v12  ;;  %v8789_v59 = vld [vmem:[%s7732_s25 + $0x74] sm:$0x1]  ;;  %v3827_v26 = vshrl.u32 %v6510_v27, 16  ;;  %v3830_v45 = vshll.u32 %v6510_v27, 16  ;;  %v3836_v43 = vshll.u32 %v8765_v57, 16 }
  0xe7   : > { %9806 = vst [vmem:[#allocation15_spill] sm:$0xff] %v8789_v59  ;;  %v3840_v36 = vshrl.u32 %v8765_v57, 16  ;;  %v3851_v30 = vshrl.u32 %v6513_v50, 16  ;;  %v3854_v3 = vshll.u32 %v6513_v50, 16  ;;  %v3784_v63 = vrot.slane %v3782_v25, 5 }
  0xe8   : > { %v8802_v27 = vrot.slane %v3788_v41, 5  ;;  %v3860_v16 = vshll.u32 %v8786_v12, 16  ;;  %v3864_v13 = vshrl.u32 %v8786_v12, 16  ;;  %v9808_v50 = vcombine.low %v8489_v48, %v8502_v23  ;;  %v6516_v41 = vld [vmem:[%s7732_s25 + $0x9c] sm:$0xf] }
  0xe9   : > { %v3794_v51 = vrot.slane %v3792_v0, 4  ;;  %v3798_v33 = vshll.u32 %v8789_v59, 16  ;;  %v3808_v25 = vrot.slane %v3806_v21, 5  ;;  %v3818_v57 = vrot.slane %v3816_v39, 4  ;;  %v8818_v17 = vld [vmem:[%s7732_s25 + $0x8c] sm:$0x1] }
  0xea   : > { %v3829_v49 = vrot.slane %v3827_v26, 4  ;;  %v3832_v12 = vrot.slane %v3830_v45, 5  ;;  %v8820_v31 = vrot.slane %v3836_v43, 5  ;;  %v3842_v48 = vrot.slane %v3840_v36, 4  ;;  %v8826_v0 = vld [vmem:[%s7732_s25 + $0x98] sm:$0x1] }
  0xeb   : > { %v3853_v23 = vrot.slane %v3851_v30, 4  ;;  %v3856_v55 = vrot.slane %v3854_v3, 5  ;;  %v8828_v59 = vrot.slane %v3860_v16, 5  ;;  %v3875_v21 = vshrl.u32 %v6516_v41, 16 }
  0xec   : > { %7217 = vmatmul.mubr.msk.bf16.gmra.mrb[28].mxu0 %vm666_vm3, %v7595_v34  ;;  %v8805_v34 = vld [vmem:[%s7732_s25 + $0x80] sm:$0x1]  ;;  %v3785_v39 = vor.u32 %v3784_v63, %v8773_v24  ;;  %v3795_v7 = vor.u32 %v3794_v51, %v8802_v27  ;;  %v3833_v30 = vor.u32 %v3832_v12, %v3829_v49  ;;  %v3843_v16 = vor.u32 %v3842_v48, %v8820_v31 }
  0xed   : > { %7065 = vmatmul.mubr.msk.bf16.gmra.mrb[12].mxu1 %vm666_vm3, %v9807_v58  ;;  %7222 = vmatprep.mubr.msk.bf16.mxu0 %vm666_vm3, %v8544_v52  ;;  %v3805_v52 = vrot.slane %v3803_v19, 4  ;;  %v8815_v58 = vrot.slane %v3812_v53, 5  ;;  %v3866_v19 = vrot.slane %v3864_v13, 4  ;;  %v3878_v53 = vshll.u32 %v6516_v41, 16 }
  0xee   : > { %7068 = vmatprep.mubr.msk.bf16.mxu1 %vm666_vm3, %v9808_v50  ;;  %v8823_v50 = vld [vmem:[%s7732_s25 + $0xa0] sm:$0xf]  ;;  %v3822_v45 = vshll.u32 %v8805_v34, 16  ;;  %v3846_v13 = vshll.u32 %v8818_v17, 16  ;;  %v3857_v24 = vor.u32 %v3856_v55, %v3853_v23  ;;  %v3870_v63 = vshll.u32 %v8826_v0, 16 }
  0xef   : > { %v3809_v26 = vor.u32 %v3808_v25, %v3805_v52  ;;  %v3819_v36 = vor.u32 %v3818_v57, %v8815_v58  ;;  %v3884_v43 = vshll.u32 %v8823_v50, 16  ;;  %v3888_v3 = vshrl.u32 %v8823_v50, 16 }
  0xf0   : > { %v9809_v51 = vcombine.low %v8506_v29, %v8510_v9  ;;  %v3800_v49 = vrot.slane %v3798_v33, 5  ;;  %v3867_v57 = vor.u32 %v3866_v19, %v8828_v59  ;;  %v3877_v12 = vrot.slane %v3875_v21, 4 }
  0xf1   : > { %v9810_v52 = vcombine.low %v8556_v10, %v8560_v6  ;;  %v3786_v55 = vrot.slane %v3785_v39, 4  ;;  %v3796_v29 = vrot.slane %v3795_v7, 4  ;;  %v3810_v9 = vrot.slane %v3809_v26, 4 }
  0xf2   : > { %v3824_v25 = vrot.slane %v3822_v45, 5  ;;  %v3820_v33 = vrot.slane %v3819_v36, 4  ;;  %v3834_v41 = vrot.slane %v3833_v30, 4  ;;  %v8854_v48 = vrot.slane %v3884_v43, 5 }
  0xf3   : > { %v3890_v23 = vrot.slane %v3888_v3, 4  ;;  %v3844_v19 = vrot.slane %v3843_v16, 4  ;;  %v3848_v21 = vrot.slane %v3846_v13, 5  ;;  %v3858_v10 = vrot.slane %v3857_v24, 4 }
  0xf4   : > { %7223 = vmatmul.mubr.msk.bf16.vlgmr.msra.gmra.mrb[0].mxu0 %vm666_vm3, %v8601_v56  ;;  %v3880_v56 = vrot.slane %v3878_v53, 5  ;;  %v3872_v6 = vrot.slane %v3870_v63, 5  ;;  %v8857_v53 = vld [vmem:[%s7732_s25 + $0xa4] sm:$0x1]  ;;  %v9811_v26 = vrot.slane %v8760_v22, 5  ;;  %v3791_v36 = vsel %vm7751_vm2, %v3786_v55, %v8802_v27 }
  0xf5   : > { %7069 = vmatmul.mubr.msk.bf16.gmra.mrb[16].mxu1 %vm666_vm3, %v9809_v51  ;;  %7255 = vmatpush3.bf16.msra.mxu0 %v8328_v46  ;;  %v6519_v46 = vld [vmem:[%s7732_s25 + $0xa8] sm:$0xf]  ;;  %v3868_v51 = vrot.slane %v3867_v57, 4  ;;  %v3801_v30 = vsel %vm7751_vm2, %v3796_v29, %v3800_v49  ;;  %v3815_v43 = vsel %vm7751_vm2, %v3810_v9, %v8815_v58  ;;  %v3825_v22 = vsel %vm7751_vm2, %v3820_v33, %v3824_v25 }
  0xf6   : > { %7072 = vmatprep.mubr.msk.bf16.mxu1 %vm666_vm3, %v9810_v52  ;;  %7226 = vmatprep.mubr.msk.bf16.mxu0 %vm666_vm3, %v8605_v4  ;;  %v3881_v52 = vor.u32 %v3880_v56, %v3877_v12  ;;  %v8860_v4 = vld [vmem:[%s7732_s25 + $0xac] sm:$0xf]  ;;  %v3899_v7 = vshrl.u32 %v6519_v46, 16  ;;  %v3902_v39 = vshll.u32 %v6519_v46, 16  ;;  %v8867_v45 = vsel %vm7973_vm6, %v8771_v54, %v9811_v26 }
  0xf7   : > { %v3839_v54 = vsel %vm7751_vm2, %v3834_v41, %v8820_v31  ;;  %v3891_v3 = vor.u32 %v3890_v23, %v8854_v48  ;;  %v3894_v16 = vshll.u32 %v8857_v53, 16  ;;  %v3849_v27 = vsel %vm7751_vm2, %v3844_v19, %v3848_v21  ;;  %v6570_v31 = vld [vmem:[%s7732_s25 + $0x48] sm:$0xe]  ;;  %v6573_v26 = vld [vmem:[%s7732_s25 + $0x6c] sm:$0xe] }
  0xf8   : > { %v3863_v58 = vsel %vm7751_vm2, %v3858_v10, %v8828_v59  ;;  %v3908_v13 = vshll.u32 %v8860_v4, 16  ;;  %v3912_v24 = vshrl.u32 %v8860_v4, 16  ;;  %v9812_v63 = vcombine.low %v8571_v32, %v8581_v5  ;;  %v8903_v59 = vld [vmem:[%s7732_s25 + $0xb0] sm:$0x1] }
  0xf9   : > { %v3882_v49 = vrot.slane %v3881_v52, 4  ;;  %v3901_v57 = vrot.slane %v3899_v7, 4  ;;  %v3904_v12 = vrot.slane %v3902_v39, 5  ;;  %v9813_v56 = vcombine.low %v8681_v61, %v8693_v40  ;;  %v6522_v40 = vld [vmem:[%s7732_s25 + $0xb4] sm:$0xf] }
  0xfa   : > { %v9814_v32 = vsel %vm7751_vm2, %v8739_v14, %v8741_v15  ;;  %v9815_v5 = vsel %vm7751_vm2, %v8737_v11, %v8665_v60  ;;  %v6181_v55 = vcombine.low %v8769_v1, %v8867_v45  ;;  %v8921_v29 = vcombine.low %v3791_v36, %v3801_v30  ;;  %v6571_v15 = vld [vmem:[%s7732_s25 + $0x54] sm:$0xe] }
  0xfb   : > { %v8923_v61 = vcombine.low %v3815_v43, %v3825_v22  ;;  %v8926_v9 = vcombine.low %v3839_v54, %v3849_v27  ;;  %v3892_v25 = vrot.slane %v3891_v3, 4  ;;  %v3896_v46 = vrot.slane %v3894_v16, 5  ;;  %v9817_v16 = vld [vmem:[#allocation8_spill] sm:$0xff] }
  0xfc   : > { %7227 = vmatmul.mubr.msk.bf16.gmra.mrb[4].mxu0 %vm666_vm3, %v8735_v44  ;;  %v3873_v44 = vsel %vm7751_vm2, %v3868_v51, %v3872_v6  ;;  %v6586_v14 = vrot.slane %v6570_v31, 9  ;;  %v8931_v60 = vrot.slane %v3908_v13, 5  ;;  %v3914_v11 = vrot.slane %v3912_v24, 4  ;;  %v6572_v6 = vld [vmem:[%s7732_s25 + $0x60] sm:$0xe]  ;;  %v9818_v13 = vld [vmem:[#allocation9_spill] sm:$0xff] }
  0xfd   : > { %7073 = vmatmul.mubr.msk.bf16.gmra.mrb[20].mxu1 %vm666_vm3, %v9812_v63  ;;  %7230 = vmatprep.mubr.msk.bf16.mxu0 %vm666_vm3, %v8745_v38  ;;  %v6539_v38 = vcombine.low %v9815_v5, %v9814_v32  ;;  %v8929_v33 = vcombine.low %v3863_v58, %v3873_v44  ;;  %v3918_v41 = vshll.u32 %v8903_v59, 16  ;;  %v3887_v23 = vsel %vm7751_vm2, %v3882_v49, %v8854_v48  ;;  %v9819_v24 = vld [vmem:[#allocation10_spill] sm:$0xff]  ;;  %v9821_v63 = vld [vmem:[#allocation11_spill] sm:$0xff] }
  0xfe   : > { %7076 = vmatprep.mubr.msk.bf16.mxu1 %vm666_vm3, %v9813_v56  ;;  %v3905_v19 = vor.u32 %v3904_v12, %v3901_v57  ;;  %v4386_v21 = vrot.slane %v8564_v20, 5  ;;  %v4389_v10 = vrot.slane %v8618_v35, 5  ;;  %v3923_v51 = vshrl.u32 %v6522_v40, 16  ;;  %v8953_v35 = vld [vmem:[%s7732_s25 + $0xb8] sm:$0xf]  ;;  %v9822_v49 = vld [vmem:[#allocation15_spill] sm:$0xff] }
  0xff   : > { %v6587_v52 = vrot.slane %v6571_v15, 9  ;;  %v4393_v7 = vrot.slane %v8575_v18, 5  ;;  %v4396_v39 = vrot.slane %v8642_v37, 5  ;;  %v3897_v36 = vsel %vm7751_vm2, %v3892_v25, %v3896_v46  ;;  %v6525_v12 = vld [vmem:[%s7732_s25 + $0xc0] sm:$0xf] }
 0x100   : > { %v3926_v30 = vshll.u32 %v6522_v40, 16  ;;  %v8947_v48 = vsel %vm7973_vm6, %v6586_v14, %v4386_v21  ;;  %v4388_v43 = vrot.slane %v4386_v21, 4  ;;  %v3915_v20 = vor.u32 %v3914_v11, %v8931_v60  ;;  %v6574_v14 = vld [vmem:[%s7732_s25 + $0x78] sm:$0xe] }
 0x101   : > { %v8957_v37 = vsel %vm7973_vm6, %v6587_v52, %v4393_v7  ;;  %v4395_v18 = vrot.slane %v4393_v7, 4  ;;  %v6588_v22 = vrot.slane %v6572_v6, 9  ;;  %v9816_v54 = vcombine.low %v8700_v42, %v8704_v62  ;;  %v7597_v6 = vld [vmem:[%s7732_s25 + $0xc] sm:$0xff]  }
 0x102   : > { %v4400_v3 = vrot.slane %v8624_v8, 5  ;;  %v4403_v27 = vrot.slane %v9817_v16, 5  ;;  %v6589_v58 = vrot.slane %v6573_v26, 9  ;;  %v9820_v31 = vcombine.low %v9818_v13, %v9819_v24  ;;  %v9824_v13 = vld [vmem:[#allocation3_spill] sm:$0xff]  ;;  %v9825_v24 = vld [vmem:[#allocation4_spill] sm:$0xff] }
 0x103   : > { %v8978_v62 = vsel %vm7973_vm6, %v4395_v18, %v4396_v39  ;;  %v4407_v44 = vrot.slane %v9821_v63, 5  ;;  %v4410_v8 = vrot.slane %v9822_v49, 5  ;;  %v3932_v57 = vshll.u32 %v8953_v35, 16  ;;  %v9015_v39 = vld [vmem:[%s7732_s25 + $0xc4] sm:$0xf]  ;;  %v9826_v49 = vld [vmem:[#allocation13_spill] sm:$0xff] }
 0x104   : > { %7231 = vmatmul.mubr.msk.bf16.gmra.mrb[8].mxu0 %vm666_vm3, %v8749_v47  ;;  %v8966_v47 = vsel %vm7973_vm6, %v4388_v43, %v4389_v10  ;;  %v6605_v56 = vcombine.low %v8957_v37, %v8978_v62  ;;  %v8988_v32 = vsel %vm7973_vm6, %v6588_v22, %v4400_v3  ;;  %v4402_v5 = vrot.slane %v4400_v3, 4  ;;  %v6293_v10 = vld [vmem:[%s7732_s25 + $0x78] sm:$0xf]  ;;  %v9823_v22 = vld [vmem:[#allocation12_spill] sm:$0xff]  ;;  %v7662_v62 = vld [vmem:[%s7732_s25 + $0xa0] sm:$0xf] }
 0x105   : > { %7077 = vmatmul.mubr.msk.bf16.gmra.mrb[24].mxu1 %vm666_vm3, %v9816_v54  ;;  %7234 = vmatprep.mubr.msk.bf16.mxu0 %vm666_vm3, %v6539_v38  ;;  %v6604_v42 = vcombine.low %v8947_v48, %v8966_v47  ;;  %v8990_v38 = vrot.slane %v3918_v41, 5  ;;  %v3936_v40 = vshrl.u32 %v8953_v35, 16  ;;  %v8995_v25 = vsel %vm7973_vm6, %v6589_v58, %v4407_v44 }
 0x106   : > { %7080 = vmatprep.mubr.msk.bf16.mxu1 %vm666_vm3, %v9820_v31  ;;  %v4409_v46 = vrot.slane %v4407_v44, 4  ;;  %v8998_v15 = vcombine.low %v3887_v23, %v3897_v36  ;;  %v9000_v11 = vrot.slane %v3905_v19, 4  ;;  %v9002_v21 = vrot.slane %v3923_v51, 4 }
 0x107   : > { %v9006_v41 = vsel %vm7973_vm6, %v4402_v5, %v4403_v27  ;;  %v9010_v52 = vrot.slane %v3915_v20, 4  ;;  %v9012_v7 = vrot.slane %v3926_v30, 5  ;;  %v9023_v51 = vrot.slane %v3932_v57, 5  ;;  %v6575_v20 = vld [vmem:[%s7732_s25 + $0x84] sm:$0xe] }
 0x108   : > { %v6606_v23 = vcombine.low %v8988_v32, %v9006_v41  ;;  %v9021_v19 = vsel %vm7973_vm6, %v4409_v46, %v4410_v8  ;;  %v3947_v26 = vshrl.u32 %v6525_v12, 16  ;;  %v6590_v43 = vrot.slane %v6574_v14, 9  ;;  %v9031_v30 = vld [vmem:[%s7732_s25 + $0xbc] sm:$0x1]  ;;  %v6528_v5 = vld [vmem:[%s7732_s25 + $0xcc] sm:$0xf] }
 0x109   : > { %v6607_v36 = vcombine.low %v8995_v25, %v9021_v19  ;;  %v3950_v18 = vshll.u32 %v6525_v12, 16  ;;  %v4414_v54 = vrot.slane %v9823_v22, 5  ;;  %v4417_v3 = vrot.slane %v8805_v34, 5  ;;  %v7598_v14 = vld [vmem:[%s7732_s25 + $0x18] sm:$0xff]   ;;  %v6576_v22 = vld [vmem:[%s7732_s25 + $0x90] sm:$0xe] }
 0x10a   : > { %v2260_v16 = vshrl.u32 %v6293_v10, 16  ;;  %v3956_v27 = vshll.u32 %v9015_v39, 16  ;;  %v2263_v58 = vshll.u32 %v6293_v10, 16  ;;  %v2282_v34 = vsel %vm7751_vm2, %v9825_v24, %v9824_v13  ;;  %v9827_v24 = vld [vmem:[#allocation14_spill] sm:$0xff]  ;;  %v7666_v19 = vld [vmem:[%s7732_s25 + $0xac] sm:$0xf] }
 0x10b   : > { %v9050_v1 = vsel %vm7973_vm6, %v6590_v43, %v4414_v54  ;;  %v4416_v45 = vrot.slane %v4414_v54, 4  ;;  %v3938_v31 = vrot.slane %v3936_v40, 4  ;;  %v3942_v63 = vshll.u32 %v9031_v30, 16 }
 0x10c   : > { %7235 = vmatmul.mubr.msk.bf16.gmra.mrb[12].mxu0 %vm666_vm3, %v8921_v29  ;;  %v3960_v29 = vshrl.u32 %v9015_v39, 16  ;;  %v2265_v44 = vrot.slane %v2263_v58, 5  ;;  %v4421_v8 = vrot.slane %v9826_v49, 5  ;;  %v3911_v57 = vsel %vm7751_vm2, %v9000_v11, %v8931_v60  ;;  %v7599_v60 = vld [vmem:[%s7732_s25 + $0x24] sm:$0xff]  }
 0x10d   : > { %7081 = vmatmul.mubr.msk.bf16.gmra.mrb[28].mxu1 %vm666_vm3, %v6181_v55  ;;  %7238 = vmatprep.mubr.msk.bf16.mxu0 %vm666_vm3, %v8923_v61  ;;  %v2262_v55 = vrot.slane %v2260_v16, 4  ;;  %v6591_v61 = vrot.slane %v6575_v20, 9  ;;  %v3929_v12 = vor.u32 %v9012_v7, %v9002_v21  ;;  %v9063_v46 = vsel %vm7973_vm6, %v4416_v45, %v4417_v3  ;;  %v9074_v7 = vld [vmem:[%s7732_s25 + $0xd0] sm:$0xf] }
 0x10e   : > { %7086 = vmatprep.mubr.msk.bf16.mxu1 %vm666_vm3, %v7597_v6  ;;  %v4424_v40 = vrot.slane %v8818_v17, 5  ;;  %v3949_v10 = vrot.slane %v3947_v26, 4  ;;  %v3952_v6 = vrot.slane %v3950_v18, 5  ;;  %v6608_v43 = vcombine.low %v9050_v1, %v9063_v46  ;;  %v9086_v18 = vld [vmem:[%s7732_s25 + $0xc8] sm:$0x1] }
 0x10f   : > { %v2266_v20 = vor.u32 %v2265_v44, %v2262_v55  ;;  %v9071_v11 = vrot.slane %v3956_v27, 5  ;;  %v3962_v21 = vrot.slane %v3960_v29, 4  ;;  %v9078_v54 = vsel %vm7973_vm6, %v6591_v61, %v4421_v8  ;;  %v9828_v55 = vld [vmem:[#allocation2_spill] sm:$0xff] }
 0x110   : > { %v4423_v3 = vrot.slane %v4421_v8, 4  ;;  %v3921_v17 = vsel %vm7751_vm2, %v9010_v52, %v8990_v38  ;;  %v3939_v26 = vor.u32 %v3938_v31, %v9023_v51  ;;  %v3971_v16 = vshrl.u32 %v6528_v5, 16  ;;  %v9829_v31 = vld [vmem:[#allocation7_spill] sm:$0xff] }
 0x111   : > { %v2267_v27 = vrot.slane %v2266_v20, 4  ;;  %v3974_v29 = vshll.u32 %v6528_v5, 16  ;;  %v6592_v13 = vrot.slane %v6576_v22, 9  ;;  %v4428_v45 = vrot.slane %v9827_v24, 5 }
 0x112   : > { %v9092_v58 = vsel %vm7973_vm6, %v4423_v3, %v4424_v40  ;;  %v3980_v38 = vshll.u32 %v9074_v7, 16  ;;  %v3984_v52 = vshrl.u32 %v9074_v7, 16  ;;  %v3953_v44 = vor.u32 %v3952_v6, %v3949_v10  ;;  %v6577_v10 = vld [vmem:[%s7732_s25 + $0x9c] sm:$0xe]  ;;  %v7600_v6 = vld [vmem:[%s7732_s25 + $0x30] sm:$0xff]  }
 0x113   : > { %v6609_v61 = vcombine.low %v9078_v54, %v9092_v58  ;;  %v3966_v49 = vshll.u32 %v9086_v18, 16  ;;  %v3944_v5 = vrot.slane %v3942_v63, 5  ;;  %v9113_v40 = vsel %vm7973_vm6, %v6592_v13, %v4428_v45  ;;  %v7601_v13 = vld [vmem:[%s7732_s25 + $0x3c] sm:$0xff]  }
 0x114   : > { %7239 = vmatmul.mubr.msk.bf16.gmra.mrb[16].mxu0 %vm666_vm3, %v8926_v9  ;;  %v2272_v9 = vsel %vm7751_vm2, %v2267_v27, %v9828_v55  ;;  %v4431_v20 = vrot.slane %v8826_v0, 5  ;;  %v6545_v22 = vcombine.low %v3911_v57, %v3921_v17  ;;  %v3930_v3 = vrot.slane %v3929_v12, 4 }
 0x115   : > { %7087 = vmatmul.mubr.msk.bf16.vlgmr.msra.gmra.mrb[0].mxu1 %vm666_vm3, %v7598_v14  ;;  %7242 = vmatprep.mubr.msk.bf16.mxu0 %vm666_vm3, %v8929_v33  ;;  %v3963_v33 = vor.u32 %v3962_v21, %v9071_v11  ;;  %v9109_v8 = vcombine.low %v2272_v9, %v2282_v34  ;;  %v4430_v14 = vrot.slane %v4428_v45, 4  ;;  %v3940_v27 = vrot.slane %v3939_v26, 4  ;;  %v9119_v21 = vld [vmem:[%s7732_s25 + $0xd4] sm:$0x1]  ;;  %v6566_v9 = vld [vmem:[%s7732_s25 + $0x18] sm:$0xe] }
 0x116   : > { %7289 = vmatpush3.bf16.msra.mxu1 %v9829_v31  ;;  %7090 = vmatprep.mubr.msk.bf16.mxu1 %vm666_vm3, %v7599_v60  ;;  %v3973_v60 = vrot.slane %v3971_v16, 4  ;;  %v3976_v24 = vrot.slane %v3974_v29, 5  ;;  %v9121_v34 = vrot.slane %v3980_v38, 5  ;;  %v3986_v55 = vrot.slane %v3984_v52, 4 }
 0x117   : > { %v9125_v63 = vsel %vm7973_vm6, %v4430_v14, %v4431_v20  ;;  %v3954_v45 = vrot.slane %v3953_v44, 4  ;;  %v3964_v0 = vrot.slane %v3963_v33, 4  ;;  %v3968_v57 = vrot.slane %v3966_v49, 5  ;;  %v7652_v33 = vld [vmem:[%s7732_s25 + $0x1c] sm:$0xf] }
 0x118   : > { %v6610_v12 = vcombine.low %v9113_v40, %v9125_v63  ;;  %v6593_v17 = vrot.slane %v6577_v10, 9  ;;  %v4435_v26 = vrot.slane %v8823_v50, 5  ;;  %v3935_v16 = vsel %vm7751_vm2, %v3930_v3, %v9023_v51  ;;  %v6578_v14 = vld [vmem:[%s7732_s25 + $0xa8] sm:$0xe] }
 0x119   : > { %v3945_v29 = vsel %vm7751_vm2, %v3940_v27, %v3944_v5  ;;  %v3990_v38 = vshll.u32 %v9119_v21, 16  ;;  %v4438_v52 = vrot.slane %v8857_v53, 5  ;;  %v3977_v50 = vor.u32 %v3976_v24, %v3973_v60  ;;  %v7602_v60 = vld [vmem:[%s7732_s25 + $0x48] sm:$0xff]   ;;  %v7653_v24 = vld [vmem:[%s7732_s25 + $0x20] sm:$0x1] }
 0x11a   : > { %v9146_v51 = vsel %vm7973_vm6, %v6593_v17, %v4435_v26  ;;  %v4437_v31 = vrot.slane %v4435_v26, 4  ;;  %v3959_v53 = vsel %vm7751_vm2, %v3954_v45, %v9071_v11  ;;  %v3969_v44 = vsel %vm7751_vm2, %v3964_v0, %v3968_v57  ;;  %v6579_v26 = vld [vmem:[%s7732_s25 + $0xb4] sm:$0xe] }
 0x11b   : > { %v4358_v49 = vrot.slane %v7652_v33, 5  ;;  %v6546_v20 = vcombine.low %v3935_v16, %v3945_v29  ;;  %v6582_v3 = vrot.slane %v6566_v9, 9  ;;  %v6547_v11 = vcombine.low %v3959_v53, %v3969_v44  ;;  %v6568_v33 = vld [vmem:[%s7732_s25 + $0x30] sm:$0xe] }
 0x11c   : > { %7243 = vmatmul.mubr.msk.bf16.gmra.mrb[20].mxu0 %vm666_vm3, %v8998_v15  ;;  %v3987_v15 = vor.u32 %v3986_v55, %v9121_v34  ;;  %v9157_v5 = vsel %vm7973_vm6, %v4437_v31, %v4438_v52  ;;  %v3978_v10 = vrot.slane %v3977_v50, 4  ;;  %v4361_v55 = vrot.slane %v7653_v24, 5  ;;  %v6567_v52 = vld [vmem:[%s7732_s25 + $0x24] sm:$0xe]  ;;  %v7654_v50 = vld [vmem:[%s7732_s25 + $0x28] sm:$0xf] }
 0x11d   : > { %7091 = vmatmul.mubr.msk.bf16.gmra.mrb[4].mxu1 %vm666_vm3, %v7600_v6  ;;  %7246 = vmatprep.mubr.msk.bf16.mxu0 %vm666_vm3, %v6545_v22  ;;  %v3992_v22 = vrot.slane %v3990_v38, 5  ;;  %v6611_v27 = vcombine.low %v9146_v51, %v9157_v5  ;;  %v4360_v45 = vrot.slane %v4358_v49, 4  ;;  %v6594_v0 = vrot.slane %v6578_v14, 9  ;;  %v7655_v31 = vld [vmem:[%s7732_s25 + $0x34] sm:$0xf] }
 0x11e   : > { %7094 = vmatprep.mubr.msk.bf16.mxu1 %vm666_vm3, %v7601_v13  ;;  %v3988_v6 = vrot.slane %v3987_v15, 4  ;;  %v7603_v13 = vld [vmem:[%s7732_s25 + $0x54] sm:$0xff]   ;;  %v4442_v57 = vrot.slane %v8860_v4, 5  ;;  %v4445_v17 = vrot.slane %v8903_v59, 5  ;;  %v3983_v4 = vsel %vm7751_vm2, %v3978_v10, %v9121_v34  ;;  %v7604_v10 = vld [vmem:[%s7732_s25 + $0x60] sm:$0xff]  }
 0x11f   : > { %v4359_v38 = vsel %vm7973_vm6, %v6582_v3, %v4358_v49  ;;  %v4365_v15 = vrot.slane %v7654_v50, 5  ;;  %v4362_v9 = vsel %vm7973_vm6, %v4360_v45, %v4361_v55  ;;  %v4372_v53 = vrot.slane %v7655_v31, 5  ;;  %v7656_v3 = vld [vmem:[%s7732_s25 + $0x2c] sm:$0x1]  ;;  %v7671_v51 = vld [vmem:[%s7732_s25 + $0xc8] sm:$0x1] }
 0x120   : > { %v9171_v16 = vsel %vm7973_vm6, %v6594_v0, %v4442_v57  ;;  %v4444_v29 = vrot.slane %v4442_v57, 4  ;;  %v3993_v59 = vsel %vm7751_vm2, %v3988_v6, %v3992_v22  ;;  %v6595_v44 = vrot.slane %v6579_v26, 9  ;;  %v7605_v45 = vld [vmem:[%s7732_s25 + $0x6c] sm:$0xff]   ;;  %v6580_v26 = vld [vmem:[%s7732_s25 + $0xc0] sm:$0xe] }
 0x121   : > { %v4449_v14 = vrot.slane %v8953_v35, 5  ;;  %v6583_v22 = vrot.slane %v6567_v52, 9  ;;  %v6600_v6 = vcombine.low %v4359_v38, %v4362_v9  ;;  %v4367_v24 = vrot.slane %v4365_v15, 4  ;;  %v7657_v35 = vld [vmem:[%s7732_s25 + $0x38] sm:$0x1] }
 0x122   : > { %v9190_v34 = vsel %vm7973_vm6, %v4444_v29, %v4445_v17  ;;  %v6584_v0 = vrot.slane %v6568_v33, 9  ;;  %v4374_v57 = vrot.slane %v4372_v53, 4  ;;  %v4375_v17 = vrot.slane %v7657_v35, 5  ;;  %v9830_v38 = vld [vmem:[#allocation5_spill] sm:$0xff] }
 0x123   : > { %v6612_v49 = vcombine.low %v9171_v16, %v9190_v34  ;;  %v9201_v55 = vsel %vm7973_vm6, %v6595_v44, %v4449_v14  ;;  %v4379_v52 = vrot.slane %v9830_v38, 5  ;;  %v6596_v50 = vrot.slane %v6580_v26, 9  ;;  %v6569_v44 = vld [vmem:[%s7732_s25 + $0x3c] sm:$0xe]  ;;  %v7658_v38 = vld [vmem:[%s7732_s25 + $0x70] sm:$0xf] }
 0x124   : > { %7247 = vmatmul.mubr.msk.bf16.gmra.mrb[24].mxu0 %vm666_vm3, %v6546_v20  ;;  %v6548_v20 = vcombine.low %v3983_v4, %v3993_v59  ;;  %v4366_v4 = vsel %vm7973_vm6, %v6583_v22, %v4365_v15  ;;  %v4373_v9 = vsel %vm7973_vm6, %v6584_v0, %v4372_v53  ;;  %v4376_v31 = vsel %vm7973_vm6, %v4374_v57, %v4375_v17  ;;  %v6290_v22 = vld [vmem:[%s7732_s25 + $0x6c] sm:$0xf] }
 0x125   : > { %7095 = vmatmul.mubr.msk.bf16.gmra.mrb[8].mxu1 %vm666_vm3, %v7602_v60  ;;  %7250 = vmatprep.mubr.msk.bf16.mxu0 %vm666_vm3, %v6547_v11  ;;  %v4368_v60 = vrot.slane %v7656_v3, 5  ;;  %v4452_v11 = vrot.slane %v9031_v30, 5  ;;  %v4456_v33 = vrot.slane %v9015_v39, 5  ;;  %v4459_v15 = vrot.slane %v9086_v18, 5 }
 0x126   : > { %7098 = vmatprep.mubr.msk.bf16.mxu1 %vm666_vm3, %v7603_v13  ;;  %v4451_v13 = vrot.slane %v4449_v14, 4  ;;  %v6581_v14 = vld [vmem:[%s7732_s25 + $0xcc] sm:$0xe]  ;;  %v4381_v53 = vrot.slane %v4379_v52, 4  ;;  %v2236_v0 = vshrl.u32 %v6290_v22, 16  ;;  %v2239_v57 = vshll.u32 %v6290_v22, 16 }
 0x127   : > { %v4369_v59 = vsel %vm7973_vm6, %v4367_v24, %v4368_v60  ;;  %v9232_v3 = vsel %vm7973_vm6, %v6596_v50, %v4456_v33  ;;  %v4458_v60 = vrot.slane %v4456_v33, 4  ;;  %v9831_v24 = vld [vmem:[#allocation6_spill] sm:$0xff]  ;;  %v6597_v18 = vrot.slane %v6581_v14, 9 }
 0x128   : > { %v9208_v29 = vsel %vm7973_vm6, %v4451_v13, %v4452_v11  ;;  %v7606_v11 = vld [vmem:[%s7732_s25 + $0x78] sm:$0xff]   ;;  %v4382_v13 = vrot.slane %v9831_v24, 5  ;;  %v4463_v17 = vrot.slane %v9074_v7, 5  ;;  %v4466_v26 = vrot.slane %v9119_v21, 5 }
 0x129   : > { %v6613_v30 = vcombine.low %v9201_v55, %v9208_v29  ;;  %v9239_v39 = vsel %vm7973_vm6, %v4458_v60, %v4459_v15  ;;  %v2245_v50 = vshll.u32 %v7658_v38, 16  ;;  %v7608_v15 = vld [vmem:[%s7732_s25 + $0x90] sm:$0xff]   ;;  %v7609_v60 = vld [vmem:[%s7732_s25 + $0x9c] sm:$0xff]   ;;  %v2423_v5 = vshll.u32 %v7671_v51, 16 }
 0x12a   : > { %v6614_v35 = vcombine.low %v9232_v3, %v9239_v39  ;;  %v9256_v7 = vsel %vm7973_vm6, %v6597_v18, %v4463_v17  ;;  %v4465_v21 = vrot.slane %v4463_v17, 4  ;;  %v6299_v17 = vld [vmem:[%s7732_s25 + $0x90] sm:$0xf] }
 0x12b   : > { %v2247_v14 = vrot.slane %v2245_v50, 5 }
 0x12c   : > { %7251 = vmatmul.mubr.msk.bf16.gmra.mrb[28].mxu0 %vm666_vm3, %v6548_v20  ;;  %v6601_v20 = vcombine.low %v4366_v4, %v4369_v59  ;;  %v4383_v59 = vsel %vm7973_vm6, %v4381_v53, %v4382_v13 }
 0x12d   : > { %7099 = vmatmul.mubr.msk.bf16.gmra.mrb[12].mxu1 %vm666_vm3, %v7604_v10  ;;  %7256 = vmatprep.mubr.msk.bf16.mxu0 %vm666_vm3, %v6600_v6  ;;  %v6602_v10 = vcombine.low %v4373_v9, %v4376_v31  ;;  %v6585_v6 = vrot.slane %v6569_v44, 9  ;;  %v2249_v9 = vshrl.u32 %v7658_v38, 16  ;;  %v2238_v31 = vrot.slane %v2236_v0, 4  ;;  %v7611_v38 = vld [vmem:[%s7732_s25 + $0xb4] sm:$0xff]  }
 0x12e   : > { %7102 = vmatprep.mubr.msk.bf16.mxu1 %vm666_vm3, %v7605_v45  ;;  %v7607_v45 = vld [vmem:[%s7732_s25 + $0x84] sm:$0xff]   ;;  %v2241_v44 = vrot.slane %v2239_v57, 5 }
 0x12f   : > { %v4380_v4 = vsel %vm7973_vm6, %v6585_v6, %v4379_v52  ;;  %v9260_v52 = vsel %vm7973_vm6, %v4465_v21, %v4466_v26  ;;  %v7659_v6 = vld [vmem:[%s7732_s25 + $0x74] sm:$0x1]  ;;  %v7610_v26 = vld [vmem:[%s7732_s25 + $0xa8] sm:$0xff]   ;;  %v2308_v21 = vshrl.u32 %v6299_v17, 16 }
 0x130   : > { %v6603_v33 = vcombine.low %v4380_v4, %v4383_v59  ;;  %v6615_v22 = vcombine.low %v9256_v7, %v9260_v52  ;;  %v2255_v53 = vshll.u32 %v7659_v6, 16  ;;  %v6302_v59 = vld [vmem:[%s7732_s25 + $0x9c] sm:$0xf]  ;;  %v7663_v6 = vld [vmem:[%s7732_s25 + $0x8c] sm:$0x1] }
 0x131   : > { %v7680_v52 = vmov 1983009808  }
 0x132   : > { %v2257_v48 = vrot.slane %v2255_v53, 5  ;;  %v2303_v53 = vshll.u32 %v7663_v6, 16 }
 0x134   : > { %7257 = vmatmul.mubr.msk.bf16.vlgmr.msra.gmra.mrb[0].mxu0 %vm666_vm3, %v6601_v20  ;;  %v2251_v20 = vrot.slane %v2249_v9, 4 }
 0x135   : > { %7103 = vmatmul.mubr.msk.bf16.gmra.mrb[16].mxu1 %vm666_vm3, %v7606_v11  ;;  %7260 = vmatprep.mubr.msk.bf16.mxu0 %vm666_vm3, %v6602_v10  ;;  %v6296_v11 = vld [vmem:[%s7732_s25 + $0x84] sm:$0xf]  ;;  %v2242_v10 = vor.u32 %v2241_v44, %v2238_v31  ;;  %v2311_v31 = vshll.u32 %v6299_v17, 16 }
 0x136   : > { %7106 = vmatprep.mubr.msk.bf16.mxu1 %vm666_vm3, %v7607_v45  ;;  %v2252_v2 = vor.u32 %v2251_v20, %v2247_v14  ;;  %v2284_v24 = vshrl.u32 %v6296_v11, 16  ;;  %v2287_v13 = vshll.u32 %v6296_v11, 16  ;;  %v7660_v45 = vld [vmem:[%s7732_s25 + $0x88] sm:$0xf]  ;;  %v2335_v11 = vshll.u32 %v6302_v59, 16 }
 0x137   : > { %v2293_v18 = vshll.u32 %v7660_v45, 16  ;;  %v2297_v0 = vshrl.u32 %v7660_v45, 16  ;;  %v2243_v57 = vrot.slane %v2242_v10, 4  ;;  %v2341_v10 = vshll.u32 %v7662_v62, 16 }
 0x138   : > { %v2253_v4 = vrot.slane %v2252_v2, 4  ;;  %v2286_v47 = vrot.slane %v2284_v24, 4  ;;  %v2310_v24 = vrot.slane %v2308_v21, 4  ;;  %v2313_v32 = vrot.slane %v2311_v31, 5  ;;  %v7665_v31 = vld [vmem:[%s7732_s25 + $0xa4] sm:$0x1] }
 0x139   : > { %v9280_v50 = vrot.slane %v2293_v18, 5  ;;  %v2299_v9 = vrot.slane %v2297_v0, 4  ;;  %v2248_v44 = vsel %vm7751_vm2, %v2243_v57, %v2247_v14  ;;  %v2337_v45 = vrot.slane %v2335_v11, 5  ;;  %v7612_v18 = vld [vmem:[%s7732_s25 + $0xc0] sm:$0xff]  }
 0x13a   : > { %v2258_v14 = vsel %vm7751_vm2, %v2253_v4, %v2257_v48  ;;  %v9303_v17 = vrot.slane %v2341_v10, 5  ;;  %v6305_v4 = vld [vmem:[%s7732_s25 + $0xa8] sm:$0xf] }
 0x13b   : > { %v2300_v2 = vor.u32 %v2299_v9, %v9280_v50  ;;  %v6324_v0 = vcombine.low %v2248_v44, %v2258_v14  ;;  %v2351_v44 = vshll.u32 %v7665_v31, 16  ;;  %v2359_v25 = vshll.u32 %v6305_v4, 16 }
 0x13c   : > { %7261 = vmatmul.mubr.msk.bf16.gmra.mrb[4].mxu0 %vm666_vm3, %v6603_v33  ;;  %v7661_v33 = vld [vmem:[%s7732_s25 + $0x94] sm:$0xf] }
 0x13d   : > { %7107 = vmatmul.mubr.msk.bf16.gmra.mrb[20].mxu1 %vm666_vm3, %v7608_v15  ;;  %7264 = vmatprep.mubr.msk.bf16.mxu0 %vm666_vm3, %v6604_v42  ;;  %v2289_v42 = vrot.slane %v2287_v13, 5  ;;  %v2317_v15 = vshll.u32 %v7661_v33, 16  ;;  %v2321_v20 = vshrl.u32 %v7661_v33, 16  ;;  %v2301_v48 = vrot.slane %v2300_v2, 4 }
 0x13e   : > { %7110 = vmatprep.mubr.msk.bf16.mxu1 %vm666_vm3, %v7609_v60  ;;  %v2332_v60 = vshrl.u32 %v6302_v59, 16  ;;  %v7664_v59 = vld [vmem:[%s7732_s25 + $0x98] sm:$0x1]  ;;  %v2356_v33 = vshrl.u32 %v6305_v4, 16  ;;  %v6311_v4 = vld [vmem:[%s7732_s25 + $0xc0] sm:$0xf] }
 0x13f   : > { %v2290_v37 = vor.u32 %v2289_v42, %v2286_v47  ;;  %v9300_v41 = vrot.slane %v2317_v15, 5  ;;  %v2305_v47 = vrot.slane %v2303_v53, 5  ;;  %v2314_v42 = vor.u32 %v2313_v32, %v2310_v24  ;;  %v6308_v15 = vld [vmem:[%s7732_s25 + $0xb4] sm:$0xf] }
 0x140   : > { %v2334_v13 = vrot.slane %v2332_v60, 4  ;;  %v2369_v60 = vshrl.u32 %v7666_v19, 16  ;;  %v2380_v1 = vshrl.u32 %v6308_v15, 16  ;;  %v2383_v46 = vshll.u32 %v6308_v15, 16 }
 0x141   : > { %v2291_v57 = vrot.slane %v2290_v37, 4  ;;  %v2306_v14 = vsel %vm7751_vm2, %v2301_v48, %v2305_v47  ;;  %v2315_v37 = vrot.slane %v2314_v42, 4  ;;  %v2353_v53 = vrot.slane %v2351_v44, 5 }
 0x142   : > { %v2338_v21 = vor.u32 %v2337_v45, %v2334_v13  ;;  %v2358_v24 = vrot.slane %v2356_v33, 4  ;;  %v2371_v45 = vrot.slane %v2369_v60, 4  ;;  %v7670_v33 = vld [vmem:[%s7732_s25 + $0xbc] sm:$0x1] }
 0x143   : > { %v2296_v11 = vsel %vm7751_vm2, %v2291_v57, %v9280_v50  ;;  %v2320_v48 = vsel %vm7751_vm2, %v2315_v37, %v9300_v41  ;;  %v2399_v40 = vshll.u32 %v7670_v33, 16 }
 0x144   : > { %7265 = vmatmul.mubr.msk.bf16.gmra.mrb[8].mxu0 %vm666_vm3, %v6605_v56  ;;  %v2345_v56 = vshrl.u32 %v7662_v62, 16  ;;  %v2339_v6 = vrot.slane %v2338_v21, 4  ;;  %v6326_v50 = vcombine.low %v2296_v11, %v2306_v14 }
 0x145   : > { %7111 = vmatmul.mubr.msk.bf16.gmra.mrb[24].mxu1 %vm666_vm3, %v7610_v26  ;;  %7268 = vmatprep.mubr.msk.bf16.mxu0 %vm666_vm3, %v6606_v23  ;;  %v2323_v23 = vrot.slane %v2321_v20, 4 }
 0x146   : > { %7114 = vmatprep.mubr.msk.bf16.mxu1 %vm666_vm3, %v7611_v38  ;;  %v2347_v26 = vrot.slane %v2345_v56, 4  ;;  %v2327_v38 = vshll.u32 %v7664_v59, 16  ;;  %v2344_v42 = vsel %vm7751_vm2, %v2339_v6, %v9303_v17  ;;  %v2425_v6 = vrot.slane %v2423_v5, 5 }
 0x147   : > { %v2324_v9 = vor.u32 %v2323_v23, %v9300_v41  ;;  %v2361_v23 = vrot.slane %v2359_v25, 5  ;;  %v7668_v41 = vld [vmem:[%s7732_s25 + $0xb0] sm:$0x1] }
 0x148   : > { %v2348_v20 = vor.u32 %v2347_v26, %v9303_v17  ;;  %v2329_v62 = vrot.slane %v2327_v38, 5  ;;  %v2375_v59 = vshll.u32 %v7668_v41, 16  ;;  %v2404_v38 = vshrl.u32 %v6311_v4, 16 }
 0x149   : > { %v2325_v2 = vrot.slane %v2324_v9, 4  ;;  %v2362_v58 = vor.u32 %v2361_v23, %v2358_v24  ;;  %v2407_v17 = vshll.u32 %v6311_v4, 16  ;;  %v7669_v9 = vld [vmem:[%s7732_s25 + $0xc4] sm:$0xf] }
 0x14a   : > { %v2349_v32 = vrot.slane %v2348_v20, 4  ;;  %v2413_v21 = vshll.u32 %v7669_v9, 16  ;;  %v2417_v31 = vshrl.u32 %v7669_v9, 16  ;;  %v2377_v25 = vrot.slane %v2375_v59, 5 }
 0x14b   : > { %v2330_v47 = vsel %vm7751_vm2, %v2325_v2, %v2329_v62  ;;  %v2363_v15 = vrot.slane %v2362_v58, 4  ;;  %v2401_v62 = vrot.slane %v2399_v40, 5 }
 0x14c   : > { %7269 = vmatmul.mubr.msk.bf16.gmra.mrb[12].mxu0 %vm666_vm3, %v6607_v36  ;;  %v2365_v36 = vshll.u32 %v7666_v19, 16  ;;  %v2354_v54 = vsel %vm7751_vm2, %v2349_v32, %v2353_v53  ;;  %v6327_v63 = vcombine.low %v2320_v48, %v2330_v47  ;;  %v2406_v19 = vrot.slane %v2404_v38, 4  ;;  %v6697_v48 = vld [vmem:[%s9766_s2] ss:$0 sm:$0xff] }
 0x14d   : > { %7115 = vmatmul.mubr.msk.bf16.gmra.mrb[28].mxu1 %vm666_vm3, %v7612_v18  ;;  %7272 = vmatprep.mubr.msk.bf16.mxu0 %vm666_vm3, %v6608_v43  ;;  %v7667_v43 = vld [vmem:[%s7732_s25 + $0xb8] sm:$0xf]  ;;  %v2382_v18 = vrot.slane %v2380_v1, 4  ;;  %v2415_v60 = vrot.slane %v2413_v21, 5  ;;  %v2419_v11 = vrot.slane %v2417_v31, 4  ;;  %v5396_v58 = vcombine.high %v6697_v48, %v6697_v48 }
 0x14e   : > { %7136 = vmatprep.mubr.msk.bf16.mxu1 %vm666_vm3, %v6324_v0  ;;  %v2389_v10 = vshll.u32 %v7667_v43, 16  ;;  %v2393_v56 = vshrl.u32 %v7667_v43, 16  ;;  %v2367_v13 = vrot.slane %v2365_v36, 5  ;;  %v2385_v0 = vrot.slane %v2383_v46, 5 }
 0x14f   : > { %v2409_v36 = vrot.slane %v2407_v17, 5 }
 0x150   : > { %v2391_v57 = vrot.slane %v2389_v10, 5  ;;  %v2395_v26 = vrot.slane %v2393_v56, 4  ;;  %v2368_v1 = vsel %vm7751_vm2, %v2363_v15, %v2367_v13  ;;  %v2420_v10 = vor.u32 %v2419_v11, %v2415_v60 }
 0x151   : > { %v2410_v43 = vor.u32 %v2409_v36, %v2406_v19 }
 0x152   : > { %v2396_v44 = vor.u32 %v2395_v26, %v2391_v57  ;;  %v2421_v2 = vrot.slane %v2420_v10, 4 }
 0x153   : > { %v2411_v56 = vrot.slane %v2410_v43, 4 }
 0x154   : > { %7273 = vmatmul.mubr.msk.bf16.gmra.mrb[16].mxu0 %vm666_vm3, %v6609_v61  ;;  %v2372_v61 = vor.u32 %v2371_v45, %v2367_v13  ;;  %v2397_v37 = vrot.slane %v2396_v44, 4  ;;  %v2426_v24 = vsel %vm7751_vm2, %v2421_v2, %v2425_v6 }
 0x155   : > { %7137 = vmatmul.mubr.msk.bf16.vlgmr.msra.gmra.mrb[16].mxu1 %vm666_vm3, %v9109_v8  ;;  %7276 = vmatprep.mubr.msk.bf16.mxu0 %vm666_vm3, %v6610_v12  ;;  %v2386_v8 = vor.u32 %v2385_v0, %v2382_v18  ;;  %v6328_v12 = vcombine.low %v2344_v42, %v2354_v54  ;;  %v2416_v53 = vsel %vm7751_vm2, %v2411_v56, %v2415_v60  ;;  %v4802_v18 = vlaneseq }
 0x156   : > { %7140 = vmatprep.mubr.msk.bf16.mxu1 %vm666_vm3, %v6326_v50  ;;  %v2373_v20 = vrot.slane %v2372_v61, 4  ;;  %v2402_v16 = vsel %vm7751_vm2, %v2397_v37, %v2401_v62  ;;  %v6331_v32 = vcombine.low %v2416_v53, %v2426_v24 }
 0x157   : > { %v2387_v14 = vrot.slane %v2386_v8, 4  ;;  %v4803_v26 = vshrl.u32 %v4802_v18, 7 }
 0x158   : > { %v2378_v46 = vsel %vm7751_vm2, %v2373_v20, %v2377_v25 }
 0x159   : > { %v6329_v34 = vcombine.low %v2368_v1, %v2378_v46 }
 0x15c   : > { %7277 = vmatmul.mubr.msk.bf16.gmra.mrb[20].mxu0 %vm666_vm3, %v6611_v27  ;;  %v2392_v27 = vsel %vm7751_vm2, %v2387_v14, %v2391_v57 }
 0x15d   : > { %7141 = vmatmul.mubr.msk.bf16.gmra.mrb[20].mxu1 %vm666_vm3, %v6327_v63  ;;  %7280 = vmatprep.mubr.msk.bf16.mxu0 %vm666_vm3, %v6612_v49  ;;  %v6330_v49 = vcombine.low %v2392_v27, %v2402_v16 }
 0x15e   : > { %7144 = vmatprep.mubr.msk.bf16.mxu1 %vm666_vm3, %v6328_v12 }
 0x164   : > { %7281 = vmatmul.mubr.msk.bf16.gmra.mrb[24].mxu0 %vm666_vm3, %v6613_v30 }
 0x165   : > { %7145 = vmatmul.mubr.msk.bf16.gmra.mrb[24].mxu1 %vm666_vm3, %v6329_v34  ;;  %7284 = vmatprep.mubr.msk.bf16.mxu0 %vm666_vm3, %v6614_v35 }
 0x166   : > { %7148 = vmatprep.mubr.msk.bf16.mxu1 %vm666_vm3, %v6330_v49 }
 0x16c   : > { %7285 = vmatmul.mubr.msk.bf16.gmra.mrb[28].mxu0 %vm666_vm3, %v6615_v22  ;;  %v4800_v22 = vunpack.c.l.s4 %v7680_v52 }
 0x16d   : > { %7149 = vmatmul.mubr.msk.bf16.gmra.mrb[28].mxu1 %vm666_vm3, %v6331_v32 }
 0x16e   : > { %v4801_v57 = vunpack.c.0.s8 %v4800_v22 }
 0x170   : > { %v9414_v54 = vsub.s32 %v4801_v57, %v4803_v26 }
 0x172   : > { %v9417_v61 = vrot.slane %v6697_v48, %v9414_v54  ;;  %v9420_v17 = vrot.slane %v5396_v58, %v9414_v54 }
 0x174   : > { %v9424_v31 = vcombine.high %v9417_v61, %v9417_v61  ;;  %v9428_v63 = vcombine.high %v9420_v17, %v9420_v17  ;;  %v9432_v25 = vrot.slane %v9417_v61, 1  ;;  %v9440_v1 = vrot.slane %v9420_v17, 1 }
 0x176   : > { %v9435_v19 = vrot.slane %v9424_v31, 1  ;;  %v9443_v46 = vrot.slane %v9428_v63, 1 }
 0x1e8   : > { %v7088_v55 = vpop.f32.mrb[0].mxu1 }
 0x1e9   : > { %v1836_v29 = vpop.f32.mrb[1].mxu1 }
 0x1ea   : > { %v7089_v30 = vpop.f32.mrb[2].mxu1 }
 0x1eb   : > { %v1839_v3 = vpop.f32.mrb[3].mxu1 }
 0x1f0   : > { %v7092_v39 = vpop.f32.mrb[4].mxu1 }
 0x1f1   : > { %v1852_v35 = vpop.f32.mrb[5].mxu1 }
 0x1f2   : > { %v9391_v23 = vpop.f32.mrb[6].mxu1 }
 0x1f3   : > { %v9393_v13 = vpop.f32.mrb[7].mxu1 }
 0x1f8   : > { %v9395_v28 = vpop.f32.mrb[8].mxu1 }
 0x1f9   : > { %v9397_v45 = vpop.f32.mrb[9].mxu1 }
 0x1fa   : > { %v9399_v50 = vpop.f32.mrb[10].mxu1 }
 0x1fb   : > { %v9401_v7 = vpop.f32.mrb[11].mxu1 }
 0x200   : > { %v9403_v0 = vpop.f32.mrb[12].mxu1 }
 0x201   : > { %v9405_v4 = vpop.f32.mrb[13].mxu1 }
 0x202   : > { %v9410_v47 = vpop.f32.mrb[14].mxu1 }
 0x203   : > { %v9412_v42 = vpop.f32.mrb[15].mxu1 }
 0x207   : > { %v7258_v41 = vpop.f32.mrb[0].mxu0 }
 0x208   : > { %v7290_v59 = vadd.f32 %v7258_v41, %v7088_v55  ;;  %v4607_v38 = vpop.f32.mrb[1].mxu0 }
 0x209   : > { %v7291_v9 = vadd.f32 %v4607_v38, %v1836_v29  ;;  %v7259_v21 = vpop.f32.mrb[2].mxu0 }
 0x20a   : > { %v7292_v8 = vadd.f32 %v7259_v21, %v7089_v30  ;;  %v4610_v44 = vpop.f32.mrb[3].mxu0 }
 0x20b   : > { %v4766_v33 = vmax.f32 %v7291_v9, %v7290_v59  ;;  %v7293_v40 = vadd.f32 %v4610_v44, %v1839_v3 }
 0x20d   : > { %v4798_v12 = vcombine.high %v4766_v33, %v4766_v33  ;;  %v4805_v15 = vrot.slane %v4766_v33, %v9414_v54  ;;  %v4767_v20 = vmax.f32 %v7293_v40, %v7292_v8 }
 0x20f   : > { %v4812_v36 = vrot.slane %v4798_v12, %v9414_v54  ;;  %v4813_v60 = vcombine.high %v4805_v15, %v4805_v15  ;;  %v6633_v11 = vrot.slane %v4805_v15, 9  ;;  %v4815_v14 = vcombine.high %v4767_v20, %v4767_v20  ;;  %v7262_v37 = vpop.f32.mrb[4].mxu0 }
 0x210   : > { %v4822_v62 = vrot.slane %v4767_v20, %v9414_v54  ;;  %v7294_v43 = vadd.f32 %v7262_v37, %v7092_v39  ;;  %v4623_v10 = vpop.f32.mrb[5].mxu0 }
 0x211   : > { %v4814_v51 = vcombine.high %v4812_v36, %v4812_v36  ;;  %v6634_v5 = vrot.slane %v4813_v60, 9  ;;  %v6635_v27 = vrot.slane %v4812_v36, 9  ;;  %v5326_v16 = vmax.f32 %v4805_v15, %v6633_v11  ;;  %v9445_v34 = vpop.f32.mrb[6].mxu0 }
 0x212   : > { %v4829_v49 = vrot.slane %v4815_v14, %v9414_v54  ;;  %v4830_v56 = vcombine.high %v4822_v62, %v4822_v62  ;;  %v6637_v2 = vrot.slane %v4822_v62, 9  ;;  %v7295_v6 = vadd.f32 %v4623_v10, %v1852_v35  ;;  %v9448_v53 = vpop.f32.mrb[7].mxu0 }
 0x213   : > { %v6636_v24 = vrot.slane %v4814_v51, 9  ;;  %v5327_v32 = vmax.f32 %v4813_v60, %v6634_v5  ;;  %v5328_v55 = vmax.f32 %v4812_v36, %v6635_v27  ;;  %v5425_v29 = vadd.f32 %v9417_v61, %v5326_v16 }
 0x214   : > { %v4831_v30 = vcombine.high %v4829_v49, %v4829_v49  ;;  %v6638_v3 = vrot.slane %v4830_v56, 9  ;;  %v6639_v39 = vrot.slane %v4829_v49, 9  ;;  %v5330_v52 = vmax.f32 %v4822_v62, %v6637_v2 }
 0x215   : > { %v5329_v22 = vmax.f32 %v4814_v51, %v6636_v24  ;;  %v5426_v18 = vadd.f32 %v9432_v25, %v5327_v32  ;;  %v5427_v57 = vadd.f32 %v9424_v31, %v5328_v55  ;;  %v5489_v26 = vmax.f32 %v5425_v29, 0.0 }
 0x216   : > { %v6640_v35 = vrot.slane %v4831_v30, 9  ;;  %v5331_v48 = vmax.f32 %v4830_v56, %v6638_v3  ;;  %v5332_v58 = vmax.f32 %v4829_v49, %v6639_v39  ;;  %v5429_v41 = vadd.f32 %v9420_v17, %v5330_v52 }
 0x217   : > { %v5428_v59 = vadd.f32 %v9435_v19, %v5329_v22  ;;  %v5490_v38 = vmax.f32 %v5426_v18, 0.0  ;;  %v5491_v9 = vmax.f32 %v5427_v57, 0.0  ;;  %v6765_v21 = vpack.c.bf16 %v5489_v26, %v5489_v26  ;;  %v9455_v8 = vpop.f32.mrb[8].mxu0 }
 0x218   : > { %v5333_v44 = vmax.f32 %v4831_v30, %v6640_v35  ;;  %v5430_v33 = vadd.f32 %v9440_v1, %v5331_v48  ;;  %v5431_v40 = vadd.f32 %v9428_v63, %v5332_v58  ;;  %v5493_v12 = vmax.f32 %v5429_v41, 0.0  ;;  %v9459_v15 = vpop.f32.mrb[9].mxu0 }
 0x219   : > { %v5492_v20 = vmax.f32 %v5428_v59, 0.0  ;;  %v6766_v36 = vpack.c.bf16 %v5490_v38, %v5490_v38  ;;  %v6767_v60 = vpack.c.bf16 %v5491_v9, %v5491_v9  ;;  %v5809_v11 = vunpack.c.l.b16 %v6765_v21  ;;  %v9461_v14 = vpop.f32.mrb[10].mxu0 }
 0x21a   : > { %v5432_v37 = vadd.f32 %v9443_v46, %v5333_v44  ;;  %v5494_v62 = vmax.f32 %v5430_v33, 0.0  ;;  %v5495_v10 = vmax.f32 %v5431_v40, 0.0  ;;  %v6769_v51 = vpack.c.bf16 %v5493_v12, %v5493_v12  ;;  %v9464_v5 = vpop.f32.mrb[11].mxu0 }
 0x21b   : > { %v6768_v27 = vpack.c.bf16 %v5492_v20, %v5492_v20  ;;  %v5810_v16 = vunpack.c.l.b16 %v6766_v36  ;;  %v5811_v49 = vunpack.c.l.b16 %v6767_v60  ;;  %v4768_v56 = vmax.f32 %v7295_v6, %v7294_v43 }
 0x21c   : > { %v5496_v2 = vmax.f32 %v5432_v37, 0.0  ;;  %v6770_v24 = vpack.c.bf16 %v5494_v62, %v5494_v62  ;;  %v6771_v32 = vpack.c.bf16 %v5495_v10, %v5495_v10  ;;  %v5813_v55 = vunpack.c.l.b16 %v6769_v51 }
 0x21d   : > { %v5812_v29 = vunpack.c.l.b16 %v6768_v27  ;;  %v5873_v30 = vrot.slane %v5810_v16, 7  ;;  %v5876_v3 = vrot.slane %v5811_v49, 6  ;;  %v4832_v39 = vcombine.high %v4768_v56, %v4768_v56 }
 0x21e   : > { %v6772_v52 = vpack.c.bf16 %v5496_v2, %v5496_v2  ;;  %v5814_v22 = vunpack.c.l.b16 %v6770_v24  ;;  %v5815_v18 = vunpack.c.l.b16 %v6771_v32  ;;  %v5882_v57 = vrot.slane %v5813_v55, 4 }
 0x21f   : > { %v5875_v26 = vsel %vm5874_vm7, %v5873_v30, %v5809_v11  ;;  %v5879_v35 = vrot.slane %v5812_v29, 5  ;;  %v4839_v48 = vrot.slane %v4768_v56, %v9414_v54  ;;  %v4846_v43 = vrot.slane %v4832_v39, %v9414_v54  ;;  %v9469_v6 = vpop.f32.mrb[12].mxu0 }
 0x220   : > { %v5878_v58 = vsel %vm5877_vm8, %v5876_v3, %v5875_v26  ;;  %v5816_v41 = vunpack.c.l.b16 %v6772_v52  ;;  %v5885_v59 = vrot.slane %v5814_v22, 3  ;;  %v5888_v38 = vrot.slane %v5815_v18, 2  ;;  %v9472_v9 = vpop.f32.mrb[13].mxu0 }
 0x221   : > { %v5881_v21 = vsel %vm5880_vm9, %v5879_v35, %v5878_v58  ;;  %v4847_v44 = vcombine.high %v4839_v48, %v4839_v48  ;;  %v4848_v33 = vcombine.high %v4846_v43, %v4846_v43  ;;  %v6641_v40 = vrot.slane %v4839_v48, 9  ;;  %v9475_v12 = vpop.f32.mrb[14].mxu0 }
 0x222   : > { %v5884_v20 = vsel %vm5883_vm10, %v5882_v57, %v5881_v21  ;;  %v5891_v36 = vrot.slane %v5816_v41, 1  ;;  %v6643_v60 = vrot.slane %v4846_v43, 9  ;;  %v7296_v11 = vadd.f32 %v9445_v34, %v9391_v23  ;;  %v9481_v37 = vpop.f32.mrb[15].mxu0 }
 0x223   : > { %v5887_v62 = vsel %vm5886_vm11, %v5885_v59, %v5884_v20  ;;  %v6642_v10 = vrot.slane %v4847_v44, 9  ;;  %v6644_v51 = vrot.slane %v4848_v33, 9  ;;  %v5334_v27 = vmax.f32 %v4839_v48, %v6641_v40 }
 0x224   : > { %v5890_v16 = vsel %vm5889_vm12, %v5888_v38, %v5887_v62  ;;  %v5336_v49 = vmax.f32 %v4846_v43, %v6643_v60  ;;  %v7297_v56 = vadd.f32 %v9448_v53, %v9393_v13  ;;  %v7298_v2 = vadd.f32 %v9455_v8, %v9395_v28 }
 0x225   : > { %v5893_v23 = vsel %vm5892_vm13, %v5891_v36, %v5890_v16  ;;  %v5335_v34 = vmax.f32 %v4847_v44, %v6642_v10  ;;  %v5337_v24 = vmax.f32 %v4848_v33, %v6644_v51  ;;  %v5433_v32 = vadd.f32 %v9417_v61, %v5334_v27 }
 0x226   : > { %v5992_v55 = vpack.c.b16 %v5893_v23, %v5893_v23  ;;  %v5435_v29 = vadd.f32 %v9424_v31, %v5336_v49  ;;  %v4769_v30 = vmax.f32 %v7297_v56, %v7296_v11  ;;  %v7299_v13 = vadd.f32 %v9459_v15, %v9397_v45 }
 0x227   : > { %v5434_v28 = vadd.f32 %v9432_v25, %v5335_v34  ;;  %v5436_v53 = vadd.f32 %v9435_v19, %v5337_v24  ;;  %v5497_v8 = vmax.f32 %v5433_v32, 0.0  ;;  %v9503_v3 = vadd.f32 %v9461_v14, %v9399_v50  ;;  %v9505_v39 = vpop.f32.mrb[16].mxu0 }
 0x228   : > { %6009 = vst.msk [vmem:[%s9492_s19] sm:$0xf] %vm6008_vm14, %v5992_v55  ;;  %v5499_v52 = vmax.f32 %v5435_v29, 0.0  ;;  %v4849_v22 = vcombine.high %v4769_v30, %v4769_v30  ;;  %v4856_v18 = vrot.slane %v4769_v30, %v9414_v54  ;;  %v4770_v57 = vmax.f32 %v7299_v13, %v7298_v2  ;;  %v9510_v26 = vpop.f32.mrb[16].mxu1  ;;  %v9512_v45 = vpop.f32.mrb[17].mxu0 }
 0x229   : > { %v5498_v15 = vmax.f32 %v5434_v28, 0.0  ;;  %v5500_v35 = vmax.f32 %v5436_v53, 0.0  ;;  %v6773_v48 = vpack.c.bf16 %v5497_v8, %v5497_v8  ;;  %v9516_v50 = vadd.f32 %v9464_v5, %v9401_v7  ;;  %v9518_v14 = vpop.f32.mrb[17].mxu1  ;;  %v9520_v43 = vpop.f32.mrb[18].mxu0 }
 0x22a   : > { %v6775_v58 = vpack.c.bf16 %v5499_v52, %v5499_v52  ;;  %v4863_v41 = vrot.slane %v4849_v22, %v9414_v54  ;;  %v4864_v59 = vcombine.high %v4856_v18, %v4856_v18  ;;  %v6645_v38 = vrot.slane %v4856_v18, 9  ;;  %v9523_v21 = vpop.f32.mrb[18].mxu1  ;;  %v9525_v44 = vpop.f32.mrb[19].mxu0 }
 0x22b   : > { %v6774_v33 = vpack.c.bf16 %v5498_v15, %v5498_v15  ;;  %v6776_v40 = vpack.c.bf16 %v5500_v35, %v5500_v35  ;;  %v5817_v20 = vunpack.c.l.b16 %v6773_v48  ;;  %v4866_v36 = vcombine.high %v4770_v57, %v4770_v57  ;;  %v9527_v60 = vpop.f32.mrb[19].mxu1 }
 0x22c   : > { %v5819_v7 = vunpack.c.l.b16 %v6775_v58  ;;  %v4865_v5 = vcombine.high %v4863_v41, %v4863_v41  ;;  %v6646_v11 = vrot.slane %v4864_v59, 9  ;;  %v6647_v62 = vrot.slane %v4863_v41, 9 }
 0x22d   : > { %v5818_v10 = vunpack.c.l.b16 %v6774_v33  ;;  %v5820_v51 = vunpack.c.l.b16 %v6776_v40  ;;  %v5338_v27 = vmax.f32 %v4856_v18, %v6645_v38  ;;  %v4873_v16 = vrot.slane %v4770_v57, %v9414_v54 }
 0x22e   : > { %v5896_v49 = vrot.slane %v5819_v7, 6  ;;  %v6648_v56 = vrot.slane %v4865_v5, 9  ;;  %v5339_v2 = vmax.f32 %v4864_v59, %v6646_v11  ;;  %v5340_v23 = vmax.f32 %v4863_v41, %v6647_v62 }
 0x22f   : > { %v5894_v34 = vrot.slane %v5818_v10, 7  ;;  %v5898_v24 = vrot.slane %v5820_v51, 5  ;;  %v5437_v32 = vadd.f32 %v9420_v17, %v5338_v27  ;;  %v4880_v55 = vrot.slane %v4866_v36, %v9414_v54  ;;  %v9532_v29 = vpop.f32.mrb[20].mxu0 }
 0x230   : > { %v5341_v30 = vmax.f32 %v4865_v5, %v6648_v56  ;;  %v5438_v13 = vadd.f32 %v9440_v1, %v5339_v2  ;;  %v5439_v28 = vadd.f32 %v9428_v63, %v5340_v23  ;;  %v4881_v53 = vcombine.high %v4873_v16, %v4873_v16  ;;  %v9536_v8 = vpop.f32.mrb[20].mxu1  ;;  %v9538_v52 = vpop.f32.mrb[21].mxu0 }
 0x231   : > { %v5895_v22 = vsel %vm5874_vm7, %v5894_v34, %v5817_v20  ;;  %v5501_v18 = vmax.f32 %v5437_v32, 0.0  ;;  %v4882_v57 = vcombine.high %v4880_v55, %v4880_v55  ;;  %v6649_v15 = vrot.slane %v4873_v16, 9  ;;  %v9541_v35 = vpop.f32.mrb[21].mxu1  ;;  %v9543_v48 = vpop.f32.mrb[22].mxu0 }
 0x232   : > { %v5897_v58 = vsel %vm5877_vm8, %v5896_v49, %v5895_v22  ;;  %v5440_v41 = vadd.f32 %v9443_v46, %v5341_v30  ;;  %v5502_v59 = vmax.f32 %v5438_v13, 0.0  ;;  %v5503_v38 = vmax.f32 %v5439_v28, 0.0  ;;  %v9547_v33 = vpop.f32.mrb[22].mxu1  ;;  %v9549_v40 = vpop.f32.mrb[23].mxu0 }
 0x233   : > { %v6777_v36 = vpack.c.bf16 %v5501_v18, %v5501_v18  ;;  %v5899_v20 = vsel %vm5880_vm9, %v5898_v24, %v5897_v58  ;;  %v6650_v7 = vrot.slane %v4881_v53, 9  ;;  %v6651_v5 = vrot.slane %v4880_v55, 9  ;;  %v9552_v11 = vpop.f32.mrb[23].mxu1 }
 0x234   : > { %v5504_v62 = vmax.f32 %v5440_v41, 0.0  ;;  %v6778_v10 = vpack.c.bf16 %v5502_v59, %v5502_v59  ;;  %v6779_v51 = vpack.c.bf16 %v5503_v38, %v5503_v38  ;;  %v6652_v27 = vrot.slane %v4882_v57, 9 }
 0x235   : > { %v5821_v49 = vunpack.c.l.b16 %v6777_v36  ;;  %v5342_v56 = vmax.f32 %v4873_v16, %v6649_v15  ;;  %v5343_v2 = vmax.f32 %v4881_v53, %v6650_v7  ;;  %v5344_v23 = vmax.f32 %v4880_v55, %v6651_v5 }
 0x236   : > { %v6780_v34 = vpack.c.bf16 %v5504_v62, %v5504_v62  ;;  %v5822_v32 = vunpack.c.l.b16 %v6778_v10  ;;  %v5823_v30 = vunpack.c.l.b16 %v6779_v51  ;;  %v5345_v13 = vmax.f32 %v4882_v57, %v6652_v27 }
 0x237   : > { %v5900_v28 = vrot.slane %v5821_v49, 4  ;;  %v5441_v22 = vadd.f32 %v9417_v61, %v5342_v56  ;;  %v5442_v24 = vadd.f32 %v9432_v25, %v5343_v2  ;;  %v5443_v18 = vadd.f32 %v9424_v31, %v5344_v23  ;;  %v9557_v58 = vpop.f32.mrb[24].mxu0 }
 0x238   : > { %v5824_v41 = vunpack.c.l.b16 %v6780_v34  ;;  %v5902_v59 = vrot.slane %v5822_v32, 3  ;;  %v5904_v38 = vrot.slane %v5823_v30, 2  ;;  %v5444_v16 = vadd.f32 %v9435_v19, %v5345_v13  ;;  %v9560_v53 = vpop.f32.mrb[24].mxu1  ;;  %v9562_v55 = vpop.f32.mrb[25].mxu0 }
 0x239   : > { %v5901_v57 = vsel %vm5883_vm10, %v5900_v28, %v5899_v20  ;;  %v5505_v15 = vmax.f32 %v5441_v22, 0.0  ;;  %v5506_v36 = vmax.f32 %v5442_v24, 0.0  ;;  %v5507_v7 = vmax.f32 %v5443_v18, 0.0  ;;  %v9565_v5 = vpop.f32.mrb[25].mxu1  ;;  %v9567_v62 = vpop.f32.mrb[26].mxu0 }
 0x23a   : > { %v5903_v10 = vsel %vm5886_vm11, %v5902_v59, %v5901_v57  ;;  %v5906_v51 = vrot.slane %v5824_v41, 1  ;;  %v5508_v27 = vmax.f32 %v5444_v16, 0.0  ;;  %v4771_v49 = vmax.f32 %v9516_v50, %v9503_v3  ;;  %v9572_v56 = vpop.f32.mrb[26].mxu1  ;;  %v9574_v2 = vpop.f32.mrb[27].mxu0 }
 0x23b   : > { %v5905_v20 = vsel %vm5889_vm12, %v5904_v38, %v5903_v10  ;;  %v6781_v23 = vpack.c.bf16 %v5505_v15, %v5505_v15  ;;  %v6782_v34 = vpack.c.bf16 %v5506_v36, %v5506_v36  ;;  %v6783_v32 = vpack.c.bf16 %v5507_v7, %v5507_v7  ;;  %v9577_v30 = vpop.f32.mrb[27].mxu1 }
 0x23c   : > { %v5907_v13 = vsel %vm5892_vm13, %v5906_v51, %v5905_v20  ;;  %v6784_v28 = vpack.c.bf16 %v5508_v27, %v5508_v27  ;;  %v4883_v22 = vcombine.high %v4771_v49, %v4771_v49  ;;  %v4890_v24 = vrot.slane %v4771_v49, %v9414_v54 }
 0x23d   : > { %v5993_v18 = vpack.c.b16 %v5907_v13, %v5907_v13  ;;  %v5825_v3 = vunpack.c.l.b16 %v6781_v23  ;;  %v5826_v50 = vunpack.c.l.b16 %v6782_v34  ;;  %v5827_v41 = vunpack.c.l.b16 %v6783_v32 }
 0x23e   : > { %v5828_v59 = vunpack.c.l.b16 %v6784_v28  ;;  %v4897_v16 = vrot.slane %v4883_v22, %v9414_v54  ;;  %v4898_v38 = vcombine.high %v4890_v24, %v4890_v24  ;;  %v6653_v57 = vrot.slane %v4890_v24, 9 }
 0x23f   : > { %6010 = vst.msk [vmem:[%s9492_s19 + $0x4] sm:$0xf] %vm6008_vm14, %v5993_v18  ;;  %v5908_v15 = vrot.slane %v5826_v50, 7  ;;  %v5910_v36 = vrot.slane %v5827_v41, 6  ;;  %v7302_v7 = vadd.f32 %v9469_v6, %v9403_v0  ;;  %v7303_v10 = vadd.f32 %v9472_v9, %v9405_v4  ;;  %v9588_v51 = vpop.f32.mrb[28].mxu0 }
 0x240   : > { %9832 = vst [vmem:[#allocation8_spill] sm:$0xff] %v9588_v51  ;;  %v5912_v27 = vrot.slane %v5828_v59, 5  ;;  %v4899_v49 = vcombine.high %v4897_v16, %v4897_v16  ;;  %v6654_v20 = vrot.slane %v4898_v38, 9  ;;  %v6655_v23 = vrot.slane %v4897_v16, 9  ;;  %v9590_v34 = vpop.f32.mrb[28].mxu1  ;;  %v9592_v32 = vpop.f32.mrb[29].mxu0 }
 0x241   : > { %9833 = vst [vmem:[#allocation9_spill] sm:$0xff] %v9592_v32  ;;  %v5909_v13 = vsel %vm5874_vm7, %v5908_v15, %v5825_v3  ;;  %v5346_v28 = vmax.f32 %v4890_v24, %v6653_v57  ;;  %v4772_v22 = vmax.f32 %v7303_v10, %v7302_v7  ;;  %v7304_v0 = vadd.f32 %v9475_v12, %v9410_v47  ;;  %v9597_v6 = vpop.f32.mrb[29].mxu1  ;;  %v9599_v4 = vpop.f32.mrb[30].mxu0 }
 0x242   : > { %9834 = vst [vmem:[#allocation10_spill] sm:$0xff] %v9597_v6  ;;  %9835 = vst [vmem:[#allocation11_spill] sm:$0xff] %v9599_v4  ;;  %v5911_v9 = vsel %vm5877_vm8, %v5910_v36, %v5909_v13  ;;  %v6656_v18 = vrot.slane %v4899_v49, 9  ;;  %v5347_v50 = vmax.f32 %v4898_v38, %v6654_v20  ;;  %v5348_v41 = vmax.f32 %v4897_v16, %v6655_v23  ;;  %v9602_v59 = vpop.f32.mrb[30].mxu1  ;;  %v9604_v51 = vpop.f32.mrb[31].mxu0 }
 0x243   : > { %9836 = vst [vmem:[#allocation15_spill] sm:$0xff] %v9602_v59  ;;  %9837 = vst [vmem:[#allocation12_spill] sm:$0xff] %v9604_v51  ;;  %v5445_v3 = vadd.f32 %v9420_v17, %v5346_v28  ;;  %v5913_v24 = vsel %vm5880_vm9, %v5912_v27, %v5911_v9  ;;  %v4900_v57 = vcombine.high %v4772_v22, %v4772_v22  ;;  %v9609_v12 = vpop.f32.mrb[31].mxu1 }
 0x244   : > { %v4907_v47 = vrot.slane %v4772_v22, %v9414_v54  ;;  %9838 = vst [vmem:[#allocation3_spill] sm:$0xff] %v9609_v12  ;;  %v5349_v15 = vmax.f32 %v4899_v49, %v6656_v18  ;;  %v5446_v7 = vadd.f32 %v9440_v1, %v5347_v50  ;;  %v5447_v36 = vadd.f32 %v9428_v63, %v5348_v41 }
 0x245   : > { %v7305_v16 = vadd.f32 %v9481_v37, %v9412_v42  ;;  %v5509_v38 = vmax.f32 %v5445_v3, 0.0  ;;  %v4914_v10 = vrot.slane %v4900_v57, %v9414_v54 }
 0x246   : > { %v4915_v20 = vcombine.high %v4907_v47, %v4907_v47  ;;  %v6657_v23 = vrot.slane %v4907_v47, 9  ;;  %v5448_v27 = vadd.f32 %v9443_v46, %v5349_v15  ;;  %v5510_v13 = vmax.f32 %v5446_v7, 0.0 }
 0x247   : > { %v5511_v28 = vmax.f32 %v5447_v36, 0.0  ;;  %v4773_v22 = vmax.f32 %v7305_v16, %v7304_v0  ;;  %v6785_v9 = vpack.c.bf16 %v5509_v38, %v5509_v38  ;;  %v4916_v51 = vcombine.high %v4914_v10, %v4914_v10 }
 0x248   : > { %v6658_v49 = vrot.slane %v4915_v20, 9  ;;  %v6659_v18 = vrot.slane %v4914_v10, 9  ;;  %v5512_v50 = vmax.f32 %v5448_v27, 0.0  ;;  %v6786_v12 = vpack.c.bf16 %v5510_v13, %v5510_v13 }
 0x249   : > { %v6787_v41 = vpack.c.bf16 %v5511_v28, %v5511_v28  ;;  %v5350_v4 = vmax.f32 %v4907_v47, %v6657_v23  ;;  %v5829_v59 = vunpack.c.l.b16 %v6785_v9  ;;  %v6660_v42 = vrot.slane %v4916_v51, 9 }
 0x24a   : > { %v5351_v37 = vmax.f32 %v4915_v20, %v6658_v49  ;;  %v5352_v3 = vmax.f32 %v4914_v10, %v6659_v18  ;;  %v6788_v57 = vpack.c.bf16 %v5512_v50, %v5512_v50  ;;  %v5830_v32 = vunpack.c.l.b16 %v6786_v12 }
 0x24b   : > { %v5831_v6 = vunpack.c.l.b16 %v6787_v41  ;;  %v5449_v15 = vadd.f32 %v9417_v61, %v5350_v4  ;;  %v5914_v7 = vrot.slane %v5829_v59, 4  ;;  %v5353_v36 = vmax.f32 %v4916_v51, %v6660_v42 }
 0x24c   : > { %v5450_v0 = vadd.f32 %v9432_v25, %v5351_v37  ;;  %v5451_v16 = vadd.f32 %v9424_v31, %v5352_v3  ;;  %v5832_v38 = vunpack.c.l.b16 %v6788_v57  ;;  %v5916_v27 = vrot.slane %v5830_v32, 3 }
 0x24d   : > { %v5918_v13 = vrot.slane %v5831_v6, 2  ;;  %v5513_v28 = vmax.f32 %v5449_v15, 0.0  ;;  %v5915_v47 = vsel %vm5883_vm10, %v5914_v7, %v5913_v24  ;;  %v5452_v20 = vadd.f32 %v9435_v19, %v5353_v36 }
 0x24e   : > { %v5514_v10 = vmax.f32 %v5450_v0, 0.0  ;;  %v5515_v23 = vmax.f32 %v5451_v16, 0.0  ;;  %v5917_v12 = vsel %vm5886_vm11, %v5916_v27, %v5915_v47  ;;  %v5920_v9 = vrot.slane %v5832_v38, 1 }
 0x24f   : > { %v6789_v4 = vpack.c.bf16 %v5513_v28, %v5513_v28  ;;  %v4917_v59 = vcombine.high %v4773_v22, %v4773_v22  ;;  %v5919_v51 = vsel %vm5889_vm12, %v5918_v13, %v5917_v12  ;;  %v5516_v49 = vmax.f32 %v5452_v20, 0.0 }
 0x250   : > { %v6790_v18 = vpack.c.bf16 %v5514_v10, %v5514_v10  ;;  %v6791_v50 = vpack.c.bf16 %v5515_v23, %v5515_v23  ;;  %v5921_v32 = vsel %vm5892_vm13, %v5920_v9, %v5919_v51  ;;  %v4924_v24 = vrot.slane %v4773_v22, %v9414_v54 }
 0x251   : > { %v5833_v6 = vunpack.c.l.b16 %v6789_v4  ;;  %v4931_v41 = vrot.slane %v4917_v59, %v9414_v54  ;;  %v5994_v42 = vpack.c.b16 %v5921_v32, %v5921_v32  ;;  %v6792_v37 = vpack.c.bf16 %v5516_v49, %v5516_v49 }
 0x252   : > { %v5834_v3 = vunpack.c.l.b16 %v6790_v18  ;;  %v5835_v57 = vunpack.c.l.b16 %v6791_v50  ;;  %v4932_v15 = vcombine.high %v4924_v24, %v4924_v24  ;;  %v6661_v36 = vrot.slane %v4924_v24, 9 }
 0x253   : > { %v4933_v7 = vcombine.high %v4931_v41, %v4931_v41  ;;  %v6663_v0 = vrot.slane %v4931_v41, 9  ;;  %6011 = vst.msk [vmem:[%s9492_s19 + $0x8] sm:$0xf] %vm6008_vm14, %v5994_v42  ;;  %v5836_v16 = vunpack.c.l.b16 %v6792_v37  ;;  %v7306_v13 = vadd.f32 %v9505_v39, %v9510_v26 }
 0x254   : > { %v5922_v38 = vrot.slane %v5834_v3, 7  ;;  %v5924_v27 = vrot.slane %v5835_v57, 6  ;;  %v6662_v28 = vrot.slane %v4932_v15, 9  ;;  %v5354_v47 = vmax.f32 %v4924_v24, %v6661_v36 }
 0x255   : > { %v6664_v22 = vrot.slane %v4933_v7, 9  ;;  %v5356_v20 = vmax.f32 %v4931_v41, %v6663_v0  ;;  %v5926_v23 = vrot.slane %v5836_v16, 5  ;;  %v7307_v12 = vadd.f32 %v9512_v45, %v9518_v14 }
 0x256   : > { %v5923_v10 = vsel %vm5874_vm7, %v5922_v38, %v5833_v6  ;;  %v7308_v9 = vadd.f32 %v9520_v43, %v9523_v21  ;;  %v5355_v59 = vmax.f32 %v4932_v15, %v6662_v28  ;;  %v5453_v49 = vadd.f32 %v9420_v17, %v5354_v47 }
 0x257   : > { %v5925_v4 = vsel %vm5877_vm8, %v5924_v27, %v5923_v10  ;;  %v5357_v51 = vmax.f32 %v4933_v7, %v6664_v22  ;;  %v5455_v39 = vadd.f32 %v9428_v63, %v5356_v20  ;;  %v4774_v18 = vmax.f32 %v7307_v12, %v7306_v13 }
 0x258   : > { %v5927_v26 = vsel %vm5880_vm9, %v5926_v23, %v5925_v4  ;;  %v7309_v50 = vadd.f32 %v9525_v44, %v9527_v60  ;;  %v5454_v32 = vadd.f32 %v9440_v1, %v5355_v59  ;;  %v5517_v14 = vmax.f32 %v5453_v49, 0.0 }
 0x259   : > { %v5456_v45 = vadd.f32 %v9443_v46, %v5357_v51  ;;  %v7310_v43 = vadd.f32 %v9532_v29, %v9536_v8  ;;  %v5519_v21 = vmax.f32 %v5455_v39, 0.0  ;;  %v4934_v6 = vcombine.high %v4774_v18, %v4774_v18 }
 0x25a   : > { %v4941_v24 = vrot.slane %v4774_v18, %v9414_v54  ;;  %v4775_v41 = vmax.f32 %v7309_v50, %v7308_v9  ;;  %v5518_v42 = vmax.f32 %v5454_v32, 0.0  ;;  %v6793_v3 = vpack.c.bf16 %v5517_v14, %v5517_v14 }
 0x25b   : > { %v5520_v37 = vmax.f32 %v5456_v45, 0.0  ;;  %v7311_v57 = vadd.f32 %v9538_v52, %v9541_v35  ;;  %v6795_v44 = vpack.c.bf16 %v5519_v21, %v5519_v21  ;;  %v4948_v60 = vrot.slane %v4934_v6, %v9414_v54 }
 0x25c   : > { %v4949_v15 = vcombine.high %v4941_v24, %v4941_v24  ;;  %v6665_v7 = vrot.slane %v4941_v24, 9  ;;  %v6794_v36 = vpack.c.bf16 %v5518_v42, %v5518_v42  ;;  %v5837_v16 = vunpack.c.l.b16 %v6793_v3 }
 0x25d   : > { %v6796_v0 = vpack.c.bf16 %v5520_v37, %v5520_v37  ;;  %v4951_v29 = vcombine.high %v4775_v41, %v4775_v41  ;;  %v5839_v8 = vunpack.c.l.b16 %v6795_v44  ;;  %v4950_v38 = vcombine.high %v4948_v60, %v4948_v60 }
 0x25e   : > { %v6666_v27 = vrot.slane %v4949_v15, 9  ;;  %v6667_v13 = vrot.slane %v4948_v60, 9  ;;  %v5838_v28 = vunpack.c.l.b16 %v6794_v36  ;;  %v5928_v47 = vrot.slane %v5837_v16, 4 }
 0x25f   : > { %v5840_v22 = vunpack.c.l.b16 %v6796_v0  ;;  %v5358_v20 = vmax.f32 %v4941_v24, %v6665_v7  ;;  %v5932_v10 = vrot.slane %v5839_v8, 2  ;;  %v6668_v23 = vrot.slane %v4950_v38, 9 }
 0x260   : > { %v5359_v52 = vmax.f32 %v4949_v15, %v6666_v27  ;;  %v5360_v35 = vmax.f32 %v4948_v60, %v6667_v13  ;;  %v5929_v12 = vsel %vm5883_vm10, %v5928_v47, %v5927_v26  ;;  %v5930_v9 = vrot.slane %v5838_v28, 3 }
 0x261   : > { %v5934_v4 = vrot.slane %v5840_v22, 1  ;;  %v5457_v59 = vadd.f32 %v9417_v61, %v5358_v20  ;;  %v5361_v51 = vmax.f32 %v4950_v38, %v6668_v23  ;;  %v4958_v18 = vrot.slane %v4775_v41, %v9414_v54 }
 0x262   : > { %v5458_v49 = vadd.f32 %v9432_v25, %v5359_v52  ;;  %v5459_v39 = vadd.f32 %v9424_v31, %v5360_v35  ;;  %v5931_v50 = vsel %vm5886_vm11, %v5930_v9, %v5929_v12  ;;  %v4965_v45 = vrot.slane %v4951_v29, %v9414_v54 }
 0x263   : > { %v5521_v32 = vmax.f32 %v5457_v59, 0.0  ;;  %v4776_v14 = vmax.f32 %v7311_v57, %v7310_v43  ;;  %v5933_v21 = vsel %vm5889_vm12, %v5932_v10, %v5931_v50  ;;  %v5460_v26 = vadd.f32 %v9435_v19, %v5361_v51 }
 0x264   : > { %v5522_v6 = vmax.f32 %v5458_v49, 0.0  ;;  %v5523_v24 = vmax.f32 %v5459_v39, 0.0  ;;  %v5935_v42 = vsel %vm5892_vm13, %v5934_v4, %v5933_v21  ;;  %v4966_v3 = vcombine.high %v4958_v18, %v4958_v18 }
 0x265   : > { %v6797_v37 = vpack.c.bf16 %v5521_v32, %v5521_v32  ;;  %v4967_v44 = vcombine.high %v4965_v45, %v4965_v45  ;;  %v5995_v60 = vpack.c.b16 %v5935_v42, %v5935_v42  ;;  %v5524_v41 = vmax.f32 %v5460_v26, 0.0 }
 0x266   : > { %v6798_v15 = vpack.c.bf16 %v5522_v6, %v5522_v6  ;;  %v6799_v7 = vpack.c.bf16 %v5523_v24, %v5523_v24  ;;  %v6669_v0 = vrot.slane %v4958_v18, 9  ;;  %v6670_v16 = vrot.slane %v4966_v3, 9 }
 0x267   : > { %v5841_v36 = vunpack.c.l.b16 %v6797_v37  ;;  %v6671_v43 = vrot.slane %v4965_v45, 9  ;;  %6012 = vst.msk [vmem:[%s9492_s19 + $0xc] sm:$0xf] %vm6008_vm14, %v5995_v60  ;;  %v6800_v57 = vpack.c.bf16 %v5524_v41, %v5524_v41  ;;  %v6672_v38 = vrot.slane %v4967_v44, 9 }
 0x268   : > { %v5842_v29 = vunpack.c.l.b16 %v6798_v15  ;;  %v5843_v8 = vunpack.c.l.b16 %v6799_v7  ;;  %v5362_v27 = vmax.f32 %v4958_v18, %v6669_v0  ;;  %v5363_v13 = vmax.f32 %v4966_v3, %v6670_v16 }
 0x269   : > { %v5364_v28 = vmax.f32 %v4965_v45, %v6671_v43  ;;  %v4968_v22 = vcombine.high %v4776_v14, %v4776_v14  ;;  %v5844_v47 = vunpack.c.l.b16 %v6800_v57  ;;  %v5365_v23 = vmax.f32 %v4967_v44, %v6672_v38 }
 0x26a   : > { %v5936_v20 = vrot.slane %v5842_v29, 7  ;;  %v5938_v10 = vrot.slane %v5843_v8, 6  ;;  %v5461_v52 = vadd.f32 %v9420_v17, %v5362_v27  ;;  %v5462_v35 = vadd.f32 %v9440_v1, %v5363_v13 }
 0x26b   : > { %v5463_v12 = vadd.f32 %v9428_v63, %v5364_v28  ;;  %v4975_v9 = vrot.slane %v4776_v14, %v9414_v54  ;;  %v5940_v59 = vrot.slane %v5844_v47, 5  ;;  %v5464_v51 = vadd.f32 %v9443_v46, %v5365_v23 }
 0x26c   : > { %v5937_v4 = vsel %vm5874_vm7, %v5936_v20, %v5841_v36  ;;  %v4982_v49 = vrot.slane %v4968_v22, %v9414_v54  ;;  %v5525_v18 = vmax.f32 %v5461_v52, 0.0  ;;  %v5526_v50 = vmax.f32 %v5462_v35, 0.0 }
 0x26d   : > { %v5939_v39 = vsel %vm5877_vm8, %v5938_v10, %v5937_v4  ;;  %v5527_v32 = vmax.f32 %v5463_v12, 0.0  ;;  %v5528_v45 = vmax.f32 %v5464_v51, 0.0  ;;  %v4983_v26 = vcombine.high %v4975_v9, %v4975_v9 }
 0x26e   : > { %v5941_v21 = vsel %vm5880_vm9, %v5940_v59, %v5939_v39  ;;  %v4984_v6 = vcombine.high %v4982_v49, %v4982_v49  ;;  %v6801_v24 = vpack.c.bf16 %v5525_v18, %v5525_v18  ;;  %v6802_v42 = vpack.c.bf16 %v5526_v50, %v5526_v50 }
 0x26f   : > { %v6803_v14 = vpack.c.bf16 %v5527_v32, %v5527_v32  ;;  %v6673_v37 = vrot.slane %v4975_v9, 9  ;;  %v6804_v3 = vpack.c.bf16 %v5528_v45, %v5528_v45  ;;  %v6674_v44 = vrot.slane %v4983_v26, 9 }
 0x270   : > { %v6675_v60 = vrot.slane %v4982_v49, 9  ;;  %v6676_v41 = vrot.slane %v4984_v6, 9  ;;  %v5845_v15 = vunpack.c.l.b16 %v6801_v24  ;;  %v5846_v7 = vunpack.c.l.b16 %v6802_v42 }
 0x271   : > { %v5847_v36 = vunpack.c.l.b16 %v6803_v14  ;;  %v5366_v0 = vmax.f32 %v4975_v9, %v6673_v37  ;;  %v5848_v16 = vunpack.c.l.b16 %v6804_v3  ;;  %v5367_v43 = vmax.f32 %v4983_v26, %v6674_v44 }
 0x272   : > { %v5368_v57 = vmax.f32 %v4982_v49, %v6675_v60  ;;  %v5369_v29 = vmax.f32 %v4984_v6, %v6676_v41  ;;  %v5942_v8 = vrot.slane %v5845_v15, 4  ;;  %v5944_v38 = vrot.slane %v5846_v7, 3 }
 0x273   : > { %v5946_v27 = vrot.slane %v5847_v36, 2  ;;  %v5465_v13 = vadd.f32 %v9417_v61, %v5366_v0  ;;  %v5948_v28 = vrot.slane %v5848_v16, 1  ;;  %v5466_v22 = vadd.f32 %v9432_v25, %v5367_v43 }
 0x274   : > { %v5467_v47 = vadd.f32 %v9424_v31, %v5368_v57  ;;  %v5468_v20 = vadd.f32 %v9435_v19, %v5369_v29  ;;  %v5943_v10 = vsel %vm5883_vm10, %v5942_v8, %v5941_v21  ;;  %v7312_v52 = vadd.f32 %v9543_v48, %v9547_v33 }
 0x275   : > { %v5529_v23 = vmax.f32 %v5465_v13, 0.0  ;;  %v7313_v35 = vadd.f32 %v9549_v40, %v9552_v11  ;;  %v5945_v12 = vsel %vm5886_vm11, %v5944_v38, %v5943_v10  ;;  %v5530_v9 = vmax.f32 %v5466_v22, 0.0 }
 0x276   : > { %v5531_v4 = vmax.f32 %v5467_v47, 0.0  ;;  %v5532_v59 = vmax.f32 %v5468_v20, 0.0  ;;  %v5947_v51 = vsel %vm5889_vm12, %v5946_v27, %v5945_v12  ;;  %v7314_v18 = vadd.f32 %v9557_v58, %v9560_v53 }
 0x277   : > { %v6805_v49 = vpack.c.bf16 %v5529_v23, %v5529_v23  ;;  %v4777_v39 = vmax.f32 %v7313_v35, %v7312_v52  ;;  %v5949_v50 = vsel %vm5892_vm13, %v5948_v28, %v5947_v51  ;;  %v6806_v32 = vpack.c.bf16 %v5530_v9, %v5530_v9 }
 0x278   : > { %v6807_v48 = vpack.c.bf16 %v5531_v4, %v5531_v4  ;;  %v6808_v33 = vpack.c.bf16 %v5532_v59, %v5532_v59  ;;  %v5996_v45 = vpack.c.b16 %v5949_v50, %v5949_v50  ;;  %v7315_v42 = vadd.f32 %v9562_v55, %v9565_v5 }
 0x279   : > { %v5849_v40 = vunpack.c.l.b16 %v6805_v49  ;;  %v4985_v11 = vcombine.high %v4777_v39, %v4777_v39  ;;  %v4992_v21 = vrot.slane %v4777_v39, %v9414_v54  ;;  %v5850_v26 = vunpack.c.l.b16 %v6806_v32 }
 0x27a   : > { %v5851_v6 = vunpack.c.l.b16 %v6807_v48  ;;  %v5852_v24 = vunpack.c.l.b16 %v6808_v33  ;;  %6013 = vst.msk [vmem:[%s9492_s19 + $0x10] sm:$0xf] %vm6008_vm14, %v5996_v45  ;;  %v9693_v37 = vadd.f32 %v9567_v62, %v9572_v56  ;;  %v4778_v41 = vmax.f32 %v7315_v42, %v7314_v18 }
 0x27b   : > { %v4999_v58 = vrot.slane %v4985_v11, %v9414_v54  ;;  %v5000_v53 = vcombine.high %v4992_v21, %v4992_v21  ;;  %v6677_v14 = vrot.slane %v4992_v21, 9  ;;  %v5950_v3 = vrot.slane %v5850_v26, 7 }
 0x27c   : > { %v5952_v44 = vrot.slane %v5851_v6, 6  ;;  %v5954_v60 = vrot.slane %v5852_v24, 5  ;;  %v5002_v5 = vcombine.high %v4778_v41, %v4778_v41  ;;  %v5009_v16 = vrot.slane %v4778_v41, %v9414_v54 }
 0x27d   : > { %v5001_v15 = vcombine.high %v4999_v58, %v4999_v58  ;;  %v6678_v7 = vrot.slane %v5000_v53, 9  ;;  %v6679_v36 = vrot.slane %v4999_v58, 9  ;;  %v5370_v0 = vmax.f32 %v4992_v21, %v6677_v14 }
 0x27e   : > { %v5951_v55 = vsel %vm5874_vm7, %v5950_v3, %v5849_v40  ;;  %v7317_v43 = vadd.f32 %v9574_v2, %v9577_v30  ;;  %v5016_v27 = vrot.slane %v5002_v5, %v9414_v54  ;;  %v5017_v13 = vcombine.high %v5009_v16, %v5009_v16 }
 0x27f   : > { %v5953_v57 = vsel %vm5877_vm8, %v5952_v44, %v5951_v55  ;;  %v6680_v62 = vrot.slane %v5001_v15, 9  ;;  %v5371_v56 = vmax.f32 %v5000_v53, %v6678_v7  ;;  %v5372_v29 = vmax.f32 %v4999_v58, %v6679_v36 }
 0x280   : > { %v5469_v8 = vadd.f32 %v9420_v17, %v5370_v0  ;;  %v5955_v38 = vsel %vm5880_vm9, %v5954_v60, %v5953_v57  ;;  %v6681_v20 = vrot.slane %v5009_v16, 9  ;;  %v5018_v2 = vcombine.high %v5016_v27, %v5016_v27 }
 0x281   : > { %v5373_v28 = vmax.f32 %v5001_v15, %v6680_v62  ;;  %v5470_v22 = vadd.f32 %v9440_v1, %v5371_v56  ;;  %v5471_v47 = vadd.f32 %v9428_v63, %v5372_v29  ;;  %v6682_v30 = vrot.slane %v5017_v13, 9 }
 0x282   : > { %v5533_v10 = vmax.f32 %v5469_v8, 0.0  ;;  %v6683_v23 = vrot.slane %v5016_v27, 9  ;;  %v5374_v9 = vmax.f32 %v5009_v16, %v6681_v20  ;;  %v6684_v59 = vrot.slane %v5018_v2, 9 }
 0x283   : > { %v5472_v52 = vadd.f32 %v9443_v46, %v5373_v28  ;;  %v5534_v35 = vmax.f32 %v5470_v22, 0.0  ;;  %v5535_v12 = vmax.f32 %v5471_v47, 0.0  ;;  %v5375_v51 = vmax.f32 %v5017_v13, %v6682_v30  ;;  %v9839_v13 = vld [vmem:[#allocation8_spill] sm:$0xff]  ;;  %v9840_v30 = vld [vmem:[#allocation10_spill] sm:$0xff] }
 0x284   : > { %v6809_v4 = vpack.c.bf16 %v5533_v10, %v5533_v10  ;;  %v5376_v49 = vmax.f32 %v5016_v27, %v6683_v23  ;;  %v5473_v32 = vadd.f32 %v9417_v61, %v5374_v9  ;;  %v5377_v33 = vmax.f32 %v5018_v2, %v6684_v59  ;;  %v9841_v23 = vld [vmem:[#allocation9_spill] sm:$0xff]  ;;  %v9842_v9 = vld [vmem:[#allocation15_spill] sm:$0xff] }
 0x285   : > { %v5536_v39 = vmax.f32 %v5472_v52, 0.0  ;;  %v6810_v18 = vpack.c.bf16 %v5534_v35, %v5534_v35  ;;  %v6811_v50 = vpack.c.bf16 %v5535_v12, %v5535_v12  ;;  %v5474_v45 = vadd.f32 %v9432_v25, %v5375_v51  ;;  %v9845_v51 = vld [vmem:[#allocation12_spill] sm:$0xff] }
 0x286   : > { %v5853_v48 = vunpack.c.l.b16 %v6809_v4  ;;  %v5475_v40 = vadd.f32 %v9424_v31, %v5376_v49  ;;  %v5537_v6 = vmax.f32 %v5473_v32, 0.0  ;;  %v5476_v42 = vadd.f32 %v9435_v19, %v5377_v33  ;;  %v9843_v4 = vld [vmem:[#allocation11_spill] sm:$0xff] }
 0x287   : > { %v6812_v11 = vpack.c.bf16 %v5536_v39, %v5536_v39  ;;  %v5854_v21 = vunpack.c.l.b16 %v6810_v18  ;;  %v5855_v26 = vunpack.c.l.b16 %v6811_v50  ;;  %v5538_v58 = vmax.f32 %v5474_v45, 0.0 }
 0x288   : > { %v5956_v24 = vrot.slane %v5853_v48, 4  ;;  %v5539_v53 = vmax.f32 %v5475_v40, 0.0  ;;  %v6813_v60 = vpack.c.bf16 %v5537_v6, %v5537_v6  ;;  %v5540_v15 = vmax.f32 %v5476_v42, 0.0 }
 0x289   : > { %v5856_v14 = vunpack.c.l.b16 %v6812_v11  ;;  %v5958_v3 = vrot.slane %v5854_v21, 3  ;;  %v5960_v44 = vrot.slane %v5855_v26, 2  ;;  %v6814_v7 = vpack.c.bf16 %v5538_v58, %v5538_v58 }
 0x28a   : > { %v5957_v41 = vsel %vm5883_vm10, %v5956_v24, %v5955_v38  ;;  %v6815_v36 = vpack.c.bf16 %v5539_v53, %v5539_v53  ;;  %v5857_v5 = vunpack.c.l.b16 %v6813_v60  ;;  %v4779_v16 = vmax.f32 %v7317_v43, %v9693_v37 }
 0x28b   : > { %v5959_v0 = vsel %vm5886_vm11, %v5958_v3, %v5957_v41  ;;  %v5962_v55 = vrot.slane %v5856_v14, 1  ;;  %v6816_v62 = vpack.c.bf16 %v5540_v15, %v5540_v15  ;;  %v5858_v56 = vunpack.c.l.b16 %v6814_v7 }
 0x28c   : > { %v5961_v57 = vsel %vm5889_vm12, %v5960_v44, %v5959_v0  ;;  %v5859_v29 = vunpack.c.l.b16 %v6815_v36  ;;  %v5019_v27 = vcombine.high %v4779_v16, %v4779_v16  ;;  %v5026_v38 = vrot.slane %v4779_v16, %v9414_v54 }
 0x28d   : > { %v5963_v8 = vsel %vm5892_vm13, %v5962_v55, %v5961_v57  ;;  %v7318_v28 = vadd.f32 %v9839_v13, %v9590_v34  ;;  %v5860_v47 = vunpack.c.l.b16 %v6816_v62  ;;  %v5964_v20 = vrot.slane %v5858_v56, 7  ;;  %v9844_v34 = vld [vmem:[#allocation3_spill] sm:$0xff] }
 0x28e   : > { %v5997_v22 = vpack.c.b16 %v5963_v8, %v5963_v8  ;;  %v5966_v10 = vrot.slane %v5859_v29, 6  ;;  %v5033_v37 = vrot.slane %v5019_v27, %v9414_v54  ;;  %v5034_v43 = vcombine.high %v5026_v38, %v5026_v38 }
 0x28f   : > { %v6685_v2 = vrot.slane %v5026_v38, 9  ;;  %v7319_v52 = vadd.f32 %v9841_v23, %v9840_v30  ;;  %v5965_v35 = vsel %vm5874_vm7, %v5964_v20, %v5857_v5  ;;  %v5968_v12 = vrot.slane %v5860_v47, 5 }
 0x290   : > { %6014 = vst.msk [vmem:[%s9492_s19 + $0x14] sm:$0xf] %vm6008_vm14, %v5997_v22  ;;  %v7320_v59 = vadd.f32 %v9843_v4, %v9842_v9  ;;  %v7321_v49 = vadd.f32 %v9845_v51, %v9844_v34  ;;  %v5967_v39 = vsel %vm5877_vm8, %v5966_v10, %v5965_v35  ;;  %v5035_v18 = vcombine.high %v5033_v37, %v5033_v37 }
 0x291   : > { %v6686_v50 = vrot.slane %v5034_v43, 9  ;;  %v6687_v32 = vrot.slane %v5033_v37, 9  ;;  %v5378_v48 = vmax.f32 %v5026_v38, %v6685_v2  ;;  %v4780_v33 = vmax.f32 %v7319_v52, %v7318_v28 }
 0x292   : > { %v4781_v45 = vmax.f32 %v7321_v49, %v7320_v59  ;;  %v6688_v40 = vrot.slane %v5035_v18, 9  ;;  %v5969_v26 = vsel %vm5880_vm9, %v5968_v12, %v5967_v39 }
 0x293   : > { %v5379_v11 = vmax.f32 %v5034_v43, %v6686_v50  ;;  %v5380_v21 = vmax.f32 %v5033_v37, %v6687_v32  ;;  %v5477_v6 = vadd.f32 %v9420_v17, %v5378_v48  ;;  %v5036_v24 = vcombine.high %v4780_v33, %v4780_v33 }
 0x294   : > { %v5043_v42 = vrot.slane %v4780_v33, %v9414_v54  ;;  %v5053_v58 = vcombine.high %v4781_v45, %v4781_v45  ;;  %v5381_v53 = vmax.f32 %v5035_v18, %v6688_v40  ;;  %v5060_v44 = vrot.slane %v4781_v45, %v9414_v54 }
 0x295   : > { %v5478_v14 = vadd.f32 %v9440_v1, %v5379_v11  ;;  %v5479_v3 = vadd.f32 %v9428_v63, %v5380_v21  ;;  %v5541_v60 = vmax.f32 %v5477_v6, 0.0  ;;  %v5050_v41 = vrot.slane %v5036_v24, %v9414_v54 }
 0x296   : > { %v5051_v15 = vcombine.high %v5043_v42, %v5043_v42  ;;  %v6689_v7 = vrot.slane %v5043_v42, 9  ;;  %v5480_v36 = vadd.f32 %v9443_v46, %v5381_v53  ;;  %v5067_v5 = vrot.slane %v5053_v58, %v9414_v54 }
 0x297   : > { %v5542_v0 = vmax.f32 %v5478_v14, 0.0  ;;  %v5543_v55 = vmax.f32 %v5479_v3, 0.0  ;;  %v6817_v16 = vpack.c.bf16 %v5541_v60, %v5541_v60  ;;  %v5052_v57 = vcombine.high %v5050_v41, %v5050_v41 }
 0x298   : > { %v6690_v62 = vrot.slane %v5051_v15, 9  ;;  %v6691_v56 = vrot.slane %v5050_v41, 9  ;;  %v5544_v29 = vmax.f32 %v5480_v36, 0.0  ;;  %v5382_v38 = vmax.f32 %v5043_v42, %v6689_v7 }
 0x299   : > { %v6818_v8 = vpack.c.bf16 %v5542_v0, %v5542_v0  ;;  %v6819_v27 = vpack.c.bf16 %v5543_v55, %v5543_v55  ;;  %v5861_v13 = vunpack.c.l.b16 %v6817_v16  ;;  %v6692_v28 = vrot.slane %v5052_v57, 9 }
 0x29a   : > { %v5383_v22 = vmax.f32 %v5051_v15, %v6690_v62  ;;  %v5384_v47 = vmax.f32 %v5050_v41, %v6691_v56  ;;  %v6820_v20 = vpack.c.bf16 %v5544_v29, %v5544_v29  ;;  %v5481_v43 = vadd.f32 %v9417_v61, %v5382_v38 }
 0x29b   : > { %v5862_v10 = vunpack.c.l.b16 %v6818_v8  ;;  %v5863_v37 = vunpack.c.l.b16 %v6819_v27  ;;  %v5970_v2 = vrot.slane %v5861_v13, 4  ;;  %v5385_v30 = vmax.f32 %v5052_v57, %v6692_v28 }
 0x29c   : > { %v5482_v54 = vadd.f32 %v9432_v25, %v5383_v22  ;;  %v5483_v23 = vadd.f32 %v9424_v31, %v5384_v47  ;;  %v5864_v52 = vunpack.c.l.b16 %v6820_v20  ;;  %v5545_v9 = vmax.f32 %v5481_v43, 0.0 }
 0x29d   : > { %v5972_v35 = vrot.slane %v5862_v10, 3  ;;  %v5974_v12 = vrot.slane %v5863_v37, 2  ;;  %v5971_v4 = vsel %vm5883_vm10, %v5970_v2, %v5969_v26  ;;  %v5484_v59 = vadd.f32 %v9435_v19, %v5385_v30 }
 0x29e   : > { %v5546_v34 = vmax.f32 %v5482_v54, 0.0  ;;  %v5547_v51 = vmax.f32 %v5483_v23, 0.0  ;;  %v5976_v39 = vrot.slane %v5864_v52, 1  ;;  %v6821_v61 = vpack.c.bf16 %v5545_v9, %v5545_v9 }
 0x29f   : > { %v5973_v49 = vsel %vm5886_vm11, %v5972_v35, %v5971_v4  ;;  %v5068_v18 = vcombine.high %v5060_v44, %v5060_v44  ;;  %v5548_v50 = vmax.f32 %v5484_v59, 0.0  ;;  %v5069_v33 = vcombine.high %v5067_v5, %v5067_v5 }
 0x2a0   : > { %v5975_v25 = vsel %vm5889_vm12, %v5974_v12, %v5973_v49  ;;  %v6822_v31 = vpack.c.bf16 %v5546_v34, %v5546_v34  ;;  %v6823_v32 = vpack.c.bf16 %v5547_v51, %v5547_v51  ;;  %v6693_v45 = vrot.slane %v5060_v44, 9 }
 0x2a1   : > { %v5977_v48 = vsel %vm5892_vm13, %v5976_v39, %v5975_v25  ;;  %v6824_v11 = vpack.c.bf16 %v5548_v50, %v5548_v50  ;;  %v6694_v26 = vrot.slane %v5068_v18, 9  ;;  %v6695_v6 = vrot.slane %v5067_v5, 9 }
 0x2a2   : > { %v5998_v40 = vpack.c.b16 %v5977_v48, %v5977_v48  ;;  %v5866_v19 = vunpack.c.l.b16 %v6822_v31  ;;  %v5867_v21 = vunpack.c.l.b16 %v6823_v32  ;;  %v6696_v24 = vrot.slane %v5069_v33, 9 }
 0x2a3   : > { %v5386_v42 = vmax.f32 %v5060_v44, %v6693_v45  ;;  %v5865_v58 = vunpack.c.l.b16 %v6821_v61  ;;  %v5868_v53 = vunpack.c.l.b16 %v6824_v11  ;;  %v5387_v3 = vmax.f32 %v5068_v18, %v6694_v26 }
 0x2a4   : > { %6015 = vst.msk [vmem:[%s9492_s19 + $0x18] sm:$0xf] %vm6008_vm14, %v5998_v40  ;;  %v5978_v14 = vrot.slane %v5866_v19, 7  ;;  %v5388_v60 = vmax.f32 %v5067_v5, %v6695_v6  ;;  %v5389_v41 = vmax.f32 %v5069_v33, %v6696_v24  ;;  %v5980_v7 = vrot.slane %v5867_v21, 6 }
 0x2a5   : > { %v5485_v15 = vadd.f32 %v9420_v17, %v5386_v42  ;;  %v5486_v0 = vadd.f32 %v9440_v1, %v5387_v3  ;;  %v5982_v57 = vrot.slane %v5868_v53, 5 }
 0x2a6   : > { %v5979_v36 = vsel %vm5874_vm7, %v5978_v14, %v5865_v58  ;;  %v5487_v55 = vadd.f32 %v9428_v63, %v5388_v60  ;;  %v5488_v16 = vadd.f32 %v9443_v46, %v5389_v41 }
 0x2a7   : > { %v5549_v44 = vmax.f32 %v5485_v15, 0.0  ;;  %v5550_v62 = vmax.f32 %v5486_v0, 0.0  ;;  %v5981_v8 = vsel %vm5877_vm8, %v5980_v7, %v5979_v36 }
 0x2a8   : > { %v5551_v56 = vmax.f32 %v5487_v55, 0.0  ;;  %v5552_v29 = vmax.f32 %v5488_v16, 0.0  ;;  %v5983_v63 = vsel %vm5880_vm9, %v5982_v57, %v5981_v8 }
 0x2a9   : > { %v6825_v5 = vpack.c.bf16 %v5549_v44, %v5549_v44  ;;  %v6826_v27 = vpack.c.bf16 %v5550_v62, %v5550_v62 }
 0x2aa   : > { %v6827_v38 = vpack.c.bf16 %v5551_v56, %v5551_v56  ;;  %v6828_v17 = vpack.c.bf16 %v5552_v29, %v5552_v29 }
 0x2ab   : > { %v5869_v13 = vunpack.c.l.b16 %v6825_v5  ;;  %v5870_v28 = vunpack.c.l.b16 %v6826_v27 }
 0x2ac   : > { %v5871_v22 = vunpack.c.l.b16 %v6827_v38  ;;  %v5872_v1 = vunpack.c.l.b16 %v6828_v17 }
 0x2ad   : > { %v5984_v47 = vrot.slane %v5869_v13, 4  ;;  %v5986_v46 = vrot.slane %v5870_v28, 3 }
 0x2ae   : > { %v5988_v10 = vrot.slane %v5871_v22, 2  ;;  %v5990_v43 = vrot.slane %v5872_v1, 1 }
 0x2af   : > { %v5985_v20 = vsel %vm5883_vm10, %v5984_v47, %v5983_v63 }
 0x2b0   : > { %v5987_v37 = vsel %vm5886_vm11, %v5986_v46, %v5985_v20 }
 0x2b1   : > { %v5989_v2 = vsel %vm5889_vm12, %v5988_v10, %v5987_v37 }
 0x2b2   : > { %v5991_v30 = vsel %vm5892_vm13, %v5990_v43, %v5989_v2 }
 0x2b3   : > { %v5999_v54 = vpack.c.b16 %v5991_v30, %v5991_v30 }
 0x2b5   : > { %6016 = vst.msk [vmem:[%s9492_s19 + $0x1c] sm:$0xf] %vm6008_vm14, %v5999_v54 }
 0x2b6 PF: > { %s13_s12 = sadd.s32 1, %s7678_s12  }
 0x2b7   : > { %p10_p4 = scmp.ge.s32.totalorder %s13_s12, 4  }
 0x2b9   :  { %12 = sbr.rel (!%p10_p4) target bundleno = 1 (0x1), region = 72 }

</bundles_post_ra>
